<compile_context>
chip_gen: v7x
topology: tpu7x:2x2x1
jax: 0.10.0
libtpu: 0.0.40
codegen_flags: <defaults>
</compile_context>

<pallas_src>
import jax
import jax.numpy as jnp
from jax.experimental import pallas as pl
from jax.experimental.pallas import tpu as pltpu  # noqa: F401  (kept for memory-space use)


# ---------------------------------------------------------------------------
# Fused kernel: encoder tail (AvgPool + Linear + ReLU), time-invariant v_g gate
# contribution, and the full Decoder_E -> Decoder_D recurrence for all T steps.
# ---------------------------------------------------------------------------
def fused_encoder_recurrence_kernel(feat_ref, w_enc_ref, b_enc_ref,
                                    wih_ev_ref, gbias_e_ref,
                                    cap_emb_ref, wih_dv_ref, gbias_d_ref,
                                    wce_ref, whhe_ref, whd_ref, whhd_ref,
                                    hid_ref):
    # feat_ref:   (B, S, C)   lane-dense C=2048
    # w_enc:      (C, E)      b_enc: (1, E)
    # wih_ev:     (E, 4H) = wih_e[E:, :]   gbias_e: (1, 4H) = ba_e @ wih_e[:E] + b_e
    # cap_emb:    (T, B, E)   wih_dv: (E, 4H) = wih_d[E:, :]
    # gbias_d:    (1, 4H) = ba_d @ wih_d[:E] + b_d
    # wce/whhe/whd/whhd: (H, 4H) fused gate weights
    # hid_ref:    (T, B, H) output hidden states of Decoder_D
    T, B, H = hid_ref.shape

    # ---- encoder tail: AvgPool2d(7) -> Linear(2048, E) -> ReLU (dropout = id) ----
    pooled = jnp.mean(feat_ref[...], axis=1)                           # (B, C)
    v_g = jnp.maximum(
        jnp.dot(pooled, w_enc_ref[...], preferred_element_type=jnp.float32)
        + b_enc_ref[...], 0.0)                                         # (B, E)

    # ---- time-invariant LSTM_E gate contribution of v_g + fused biases ----
    v_gate = (jnp.dot(v_g, wih_ev_ref[...], preferred_element_type=jnp.float32)
              + gbias_e_ref[...])                                      # (B, 4H)

    # hoist loop-invariant weights out of the recurrence
    w_ce, w_hhe = wce_ref[...], whhe_ref[...]
    w_hd, w_hhd = whd_ref[...], whhd_ref[...]
    wih_dv = wih_dv_ref[...]
    gbias_d = gbias_d_ref[...]

    def lstm_act(gates, c):
        # PyTorch gate order: i, f, g, o
        i = jax.nn.sigmoid(gates[:, 0 * H:1 * H])
        f = jax.nn.sigmoid(gates[:, 1 * H:2 * H])
        g = jnp.tanh(gates[:, 2 * H:3 * H])
        o = jax.nn.sigmoid(gates[:, 3 * H:4 * H])
        c_new = f * c + i * g
        return o * jnp.tanh(c_new), c_new

    def body(t, carry):
        h_e, c_e, h_d, c_d = carry
        # caption gate contribution: independent of the carry -> overlaps with LSTM_E
        cap_gate_t = (jnp.dot(cap_emb_ref[t], wih_dv,
                              preferred_element_type=jnp.float32) + gbias_d)
        # ---- Decoder_E: gates = c_d @ (wa_e@wih_e[:E]) + h_e @ whh_e + v_gate ----
        gates_e = (jnp.dot(c_d, w_ce, preferred_element_type=jnp.float32)
                   + jnp.dot(h_e, w_hhe, preferred_element_type=jnp.float32)
                   + v_gate)
        h_e, c_e = lstm_act(gates_e, c_e)
        # ---- Decoder_D: gates = h_e @ (wa_d@wih_d[:E]) + h_d @ whh_d + cap_gate ----
        gates_d = (jnp.dot(h_e, w_hd, preferred_element_type=jnp.float32)
                   + jnp.dot(h_d, w_hhd, preferred_element_type=jnp.float32)
                   + cap_gate_t)
        h_d, c_d = lstm_act(gates_d, c_d)
        hid_ref[t] = h_d
        return (h_e, c_e, h_d, c_d)

    zero = jnp.zeros((B, H), jnp.float32)
    jax.lax.fori_loop(0, T, body, (zero, zero, zero, zero), unroll=True)


# ---------------------------------------------------------------------------
# Batched affine kernel (MLP head): o = x @ W + b over all (t, b) rows at once.
# ---------------------------------------------------------------------------
def affine_kernel(x_ref, w_ref, b_ref, o_ref):
    o_ref[...] = (jnp.dot(x_ref[...], w_ref[...], preferred_element_type=jnp.float32)
                  + b_ref[...])


# ---------------------------------------------------------------------------
# Wrapper
# ---------------------------------------------------------------------------
def myattentive_forward(feat, captions, params, lengths):
    B, C, Hs, Ws = feat.shape
    S = Hs * Ws
    E = params["w_enc"].shape[1]
    H = params["wa_e"].shape[0]
    V = params["wmlp"].shape[1]
    T = captions.shape[1]

    # ---- trace-time weight composition (affine layers fused into LSTM gates) ----
    wih_e, wih_d = params["wih_e"], params["wih_d"]
    w_ce = params["wa_e"] @ wih_e[:E, :]                         # (H, 4H)  cell_d path
    gbias_e = params["ba_e"] @ wih_e[:E, :] + params["b_e"]      # (1, 4H)
    wih_e_v = wih_e[E:, :]                                       # (E, 4H)  v_g path
    w_hd = params["wa_d"] @ wih_d[:E, :]                         # (H, 4H)  h_e path
    gbias_d = params["ba_d"] @ wih_d[:E, :] + params["b_d"]      # (1, 4H)
    wih_d_v = wih_d[E:, :]                                       # (E, 4H)  caption path

    # ---- plain-JAX glue: layout + embedding gather (XLA handles the gather) ----
    feat_bsc = jnp.transpose(feat.reshape(B, C, S), (0, 2, 1))   # (B, S, C), lane-dense C
    cap_emb = jnp.take(params["embed"], captions, axis=0)        # (B, T, E)
    cap_emb_t = jnp.transpose(cap_emb, (1, 0, 2))                # (T, B, E)

    # ---- single fused pallas_call: encoder tail + full recurrence ----
    hiddens = pl.pallas_call(
        fused_encoder_recurrence_kernel,
        out_shape=jax.ShapeDtypeStruct((T, B, H), jnp.float32),
    )(feat_bsc, params["w_enc"], params["b_enc"],
      wih_e_v, gbias_e,
      cap_emb_t, wih_d_v, gbias_d,
      w_ce, params["whh_e"], w_hd, params["whh_d"])

    # ---- batched MLP head over all (t, b) rows (one MXU-friendly matmul) ----
    scores_flat = pl.pallas_call(
        affine_kernel,
        out_shape=jax.ShapeDtypeStruct((T * B, V), jnp.float32),
    )(hiddens.reshape(T * B, H), params["wmlp"], params["bmlp"])
    scores = jnp.transpose(scores_flat.reshape(T, B, V), (1, 0, 2))   # (B, T, V)

    # ---- pack_padded_sequence (plain-JAX glue, lengths sorted descending) ----
    # TODO(synk): pack_padded_sequence has no Pallas equivalent; plain-JAX/Python glue.
    max_len = max(lengths)
    batch_sizes = [sum(1 for l in lengths if l > t) for t in range(max_len)]
    packed_data = jnp.concatenate(
        [scores[:bs, t, :] for t, bs in enumerate(batch_sizes)], axis=0)
    return packed_data, jnp.asarray(batch_sizes, dtype=jnp.int32), scores


# ---------------------------------------------------------------------------
# Pure-JAX reference (unfused, mirrors the PyTorch module) for correctness check
# ---------------------------------------------------------------------------
def reference_scores(feat, captions, params):
    B, C, Hs, Ws = feat.shape
    H = params["wa_e"].shape[0]
    pooled = feat.reshape(B, C, Hs * Ws).mean(-1)
    v_g = jax.nn.relu(pooled @ params["w_enc"] + params["b_enc"])

    def lstm(x, h, c, wih, whh, b):
        g = x @ wih + h @ whh + b
        i = jax.nn.sigmoid(g[:, :H]); f = jax.nn.sigmoid(g[:, H:2 * H])
        gg = jnp.tanh(g[:, 2 * H:3 * H]); o = jax.nn.sigmoid(g[:, 3 * H:])
        c2 = f * c + i * gg
        return o * jnp.tanh(c2), c2

    cap_emb = params["embed"][captions]                          # (B, T, E)
    T = captions.shape[1]
    h_e = c_e = h_d = c_d = jnp.zeros((B, H), jnp.float32)
    hs = []
    for t in range(T):
        x_e = jnp.concatenate([c_d @ params["wa_e"] + params["ba_e"], v_g], axis=1)
        h_e, c_e = lstm(x_e, h_e, c_e, params["wih_e"], params["whh_e"], params["b_e"])
        x_d = jnp.concatenate([h_e @ params["wa_d"] + params["ba_d"], cap_emb[:, t]], axis=1)
        h_d, c_d = lstm(x_d, h_d, c_d, params["wih_d"], params["whh_d"], params["b_d"])
        hs.append(h_d)
    hid = jnp.stack(hs, axis=1)
    return hid @ params["wmlp"] + params["bmlp"]


# ---------------------------------------------------------------------------
if __name__ == "__main__":
    # Small shapes consistent with the module: resnet features (B, 2048, 7, 7)
    B, C, SP = 2, 2048, 7
    E, H, V, T = 32, 32, 64, 8
    lengths = [8, 6]

    key = jax.random.PRNGKey(0)
    ks = list(jax.random.split(key, 16))
    nrm = lambda k, shp, sc: (jax.random.normal(k, shp, jnp.float32) * sc)

    params = {
        # encoder affine: Linear(2048, E), bias filled with 0 (init_weights)
        "w_enc": nrm(ks[0], (C, E), (2.0 / C) ** 0.5),
        "b_enc": jnp.zeros((1, E), jnp.float32),
        # Decoder_E: affine_a Linear(H, E) + LSTM(2E -> H)
        "wa_e": nrm(ks[1], (H, E), (1.0 / H) ** 0.5),
        "ba_e": nrm(ks[2], (1, E), 0.05),
        "wih_e": nrm(ks[3], (2 * E, 4 * H), (1.0 / (2 * E)) ** 0.5),
        "whh_e": nrm(ks[4], (H, 4 * H), (1.0 / H) ** 0.5),
        "b_e": nrm(ks[5], (1, 4 * H), 0.05),                     # b_ih + b_hh combined
        # Decoder_D: affine Linear(H, E) + Embedding(V, E) + LSTM(2E -> H)
        "wa_d": nrm(ks[6], (H, E), (1.0 / H) ** 0.5),
        "ba_d": nrm(ks[7], (1, E), 0.05),
        "embed": nrm(ks[8], (V, E), 1.0),
        "wih_d": nrm(ks[9], (2 * E, 4 * H), (1.0 / (2 * E)) ** 0.5),
        "whh_d": nrm(ks[10], (H, 4 * H), (1.0 / H) ** 0.5),
        "b_d": nrm(ks[11], (1, 4 * H), 0.05),
        # mlp: Linear(H, V), bias 0 (initweights)
        "wmlp": nrm(ks[12], (H, V), (2.0 / H) ** 0.5),
        "bmlp": jnp.zeros((1, V), jnp.float32),
    }

    feat = jax.random.normal(ks[13], (B, C, SP, SP), jnp.float32)       # resnet conv features
    captions = jax.random.randint(ks[14], (B, T), 0, V, jnp.int32)

    packed, batch_sizes, scores = myattentive_forward(feat, captions, params, lengths)
    packed = jax.block_until_ready(packed)
    scores = jax.block_until_ready(scores)

    ref = jax.block_until_ready(reference_scores(feat, captions, params))
    assert scores.shape == (B, T, V)
    assert packed.shape == (int(sum(batch_sizes)), V)
    assert jnp.allclose(scores, ref, atol=1e-4, rtol=1e-4), "kernel/reference mismatch"

    print("KERNEL_OK")
</pallas_src>

<mosaic_0001>
module attributes {stable_mosaic.version = 11 : i64} {
  func.func @fused_encoder_recurrence_kernel(%arg0: memref<2x49x2048xf32, #tpu.memory_space<vmem>>, %arg1: memref<2048x32xf32, #tpu.memory_space<vmem>>, %arg2: memref<1x32xf32, #tpu.memory_space<vmem>>, %arg3: memref<32x128xf32, #tpu.memory_space<vmem>>, %arg4: memref<1x128xf32, #tpu.memory_space<vmem>>, %arg5: memref<8x2x32xf32, #tpu.memory_space<vmem>>, %arg6: memref<32x128xf32, #tpu.memory_space<vmem>>, %arg7: memref<1x128xf32, #tpu.memory_space<vmem>>, %arg8: memref<32x128xf32, #tpu.memory_space<vmem>>, %arg9: memref<32x128xf32, #tpu.memory_space<vmem>>, %arg10: memref<32x128xf32, #tpu.memory_space<vmem>>, %arg11: memref<32x128xf32, #tpu.memory_space<vmem>>, %arg12: memref<8x2x32xf32, #tpu.memory_space<vmem>>) attributes {dimension_semantics = [], scalar_prefetch = 0 : i64, scratch_operands = 0 : i64, tpu.core_type = #tpu.core_type<tc>} {
    %c0 = arith.constant 0 : index
    %c0_0 = arith.constant 0 : index
    %c0_1 = arith.constant 0 : index
    %0 = vector.load %arg0[%c0, %c0_0, %c0_1] : memref<2x49x2048xf32, #tpu.memory_space<vmem>>, vector<2x49x2048xf32>
    %cst = arith.constant dense<0.000000e+00> : vector<2x2048xf32>
    %1 = vector.multi_reduction <add>, %0, %cst [1] : vector<2x49x2048xf32> to vector<2x2048xf32>
    %cst_2 = arith.constant 4.900000e+01 : f32
    %2 = vector.broadcast %cst_2 : f32 to vector<2x2048xf32>
    %3 = arith.divf %1, %2 : vector<2x2048xf32>
    %c0_3 = arith.constant 0 : index
    %c0_4 = arith.constant 0 : index
    %4 = vector.load %arg1[%c0_3, %c0_4] : memref<2048x32xf32, #tpu.memory_space<vmem>>, vector<2048x32xf32>
    %cst_5 = arith.constant dense<0.000000e+00> : vector<2x32xf32>
    %5 = tpu.matmul %3, %4, %cst_5 {dimension_numbers = #tpu.dot_dimension_numbers<[1], [0], [0], [1], [0, 0, 1, 1], [], []>} : vector<2x2048xf32>, vector<2048x32xf32>, vector<2x32xf32> -> vector<2x32xf32>
    %c0_6 = arith.constant 0 : index
    %c0_7 = arith.constant 0 : index
    %6 = vector.load %arg2[%c0_6, %c0_7] : memref<1x32xf32, #tpu.memory_space<vmem>>, vector<1x32xf32>
    %7 = vector.broadcast %6 : vector<1x32xf32> to vector<2x32xf32>
    %8 = arith.addf %5, %7 : vector<2x32xf32>
    %cst_8 = arith.constant 0.000000e+00 : f32
    %9 = vector.broadcast %cst_8 : f32 to vector<2x32xf32>
    %10 = arith.maximumf %8, %9 : vector<2x32xf32>
    %c0_9 = arith.constant 0 : index
    %c0_10 = arith.constant 0 : index
    %11 = vector.load %arg3[%c0_9, %c0_10] : memref<32x128xf32, #tpu.memory_space<vmem>>, vector<32x128xf32>
    %cst_11 = arith.constant dense<0.000000e+00> : vector<2x128xf32>
    %12 = tpu.matmul %10, %11, %cst_11 {dimension_numbers = #tpu.dot_dimension_numbers<[1], [0], [0], [1], [0, 0, 1, 1], [], []>} : vector<2x32xf32>, vector<32x128xf32>, vector<2x128xf32> -> vector<2x128xf32>
    %c0_12 = arith.constant 0 : index
    %c0_13 = arith.constant 0 : index
    %13 = vector.load %arg4[%c0_12, %c0_13] : memref<1x128xf32, #tpu.memory_space<vmem>>, vector<1x128xf32>
    %14 = vector.broadcast %13 : vector<1x128xf32> to vector<2x128xf32>
    %15 = arith.addf %12, %14 : vector<2x128xf32>
    %c0_14 = arith.constant 0 : index
    %c0_15 = arith.constant 0 : index
    %16 = vector.load %arg8[%c0_14, %c0_15] : memref<32x128xf32, #tpu.memory_space<vmem>>, vector<32x128xf32>
    %c0_16 = arith.constant 0 : index
    %c0_17 = arith.constant 0 : index
    %17 = vector.load %arg9[%c0_16, %c0_17] : memref<32x128xf32, #tpu.memory_space<vmem>>, vector<32x128xf32>
    %c0_18 = arith.constant 0 : index
    %c0_19 = arith.constant 0 : index
    %18 = vector.load %arg10[%c0_18, %c0_19] : memref<32x128xf32, #tpu.memory_space<vmem>>, vector<32x128xf32>
    %c0_20 = arith.constant 0 : index
    %c0_21 = arith.constant 0 : index
    %19 = vector.load %arg11[%c0_20, %c0_21] : memref<32x128xf32, #tpu.memory_space<vmem>>, vector<32x128xf32>
    %c0_22 = arith.constant 0 : index
    %c0_23 = arith.constant 0 : index
    %20 = vector.load %arg6[%c0_22, %c0_23] : memref<32x128xf32, #tpu.memory_space<vmem>>, vector<32x128xf32>
    %c0_24 = arith.constant 0 : index
    %c0_25 = arith.constant 0 : index
    %21 = vector.load %arg7[%c0_24, %c0_25] : memref<1x128xf32, #tpu.memory_space<vmem>>, vector<1x128xf32>
    %cst_26 = arith.constant 0.000000e+00 : f32
    %22 = vector.broadcast %cst_26 : f32 to vector<2x32xf32>
    %c0_i32 = arith.constant 0 : i32
    %23 = arith.index_cast %c0_i32 : i32 to index
    %c0_27 = arith.constant 0 : index
    %c0_28 = arith.constant 0 : index
    %24 = vector.load %arg5[%23, %c0_27, %c0_28] : memref<8x2x32xf32, #tpu.memory_space<vmem>>, vector<1x2x32xf32>
    %25 = vector.shape_cast %24 : vector<1x2x32xf32> to vector<2x32xf32>
    %cst_29 = arith.constant dense<0.000000e+00> : vector<2x128xf32>
    %26 = tpu.matmul %25, %20, %cst_29 {dimension_numbers = #tpu.dot_dimension_numbers<[1], [0], [0], [1], [0, 0, 1, 1], [], []>} : vector<2x32xf32>, vector<32x128xf32>, vector<2x128xf32> -> vector<2x128xf32>
    %27 = vector.broadcast %21 : vector<1x128xf32> to vector<2x128xf32>
    %28 = arith.addf %26, %27 : vector<2x128xf32>
    %cst_30 = arith.constant dense<0.000000e+00> : vector<2x128xf32>
    %29 = tpu.matmul %22, %16, %cst_30 {dimension_numbers = #tpu.dot_dimension_numbers<[1], [0], [0], [1], [0, 0, 1, 1], [], []>} : vector<2x32xf32>, vector<32x128xf32>, vector<2x128xf32> -> vector<2x128xf32>
    %cst_31 = arith.constant dense<0.000000e+00> : vector<2x128xf32>
    %30 = tpu.matmul %22, %17, %cst_31 {dimension_numbers = #tpu.dot_dimension_numbers<[1], [0], [0], [1], [0, 0, 1, 1], [], []>} : vector<2x32xf32>, vector<32x128xf32>, vector<2x128xf32> -> vector<2x128xf32>
    %31 = arith.addf %29, %30 : vector<2x128xf32>
    %32 = arith.addf %31, %15 : vector<2x128xf32>
    %33 = vector.extract_strided_slice %32 {offsets = [0, 0], sizes = [2, 32], strides = [1, 1]} : vector<2x128xf32> to vector<2x32xf32>
    %34 = arith.negf %33 : vector<2x32xf32>
    %35 = math.exp %34 : vector<2x32xf32>
    %cst_32 = arith.constant 1.000000e+00 : f32
    %36 = vector.broadcast %cst_32 : f32 to vector<2x32xf32>
    %37 = arith.addf %36, %35 : vector<2x32xf32>
    %38 = arith.divf %36, %37 : vector<2x32xf32>
    %39 = vector.extract_strided_slice %32 {offsets = [0, 32], sizes = [2, 32], strides = [1, 1]} : vector<2x128xf32> to vector<2x32xf32>
    %40 = arith.negf %39 : vector<2x32xf32>
    %41 = math.exp %40 : vector<2x32xf32>
    %cst_33 = arith.constant 1.000000e+00 : f32
    %42 = vector.broadcast %cst_33 : f32 to vector<2x32xf32>
    %43 = arith.addf %42, %41 : vector<2x32xf32>
    %44 = arith.divf %42, %43 : vector<2x32xf32>
    %45 = vector.extract_strided_slice %32 {offsets = [0, 64], sizes = [2, 32], strides = [1, 1]} : vector<2x128xf32> to vector<2x32xf32>
    %46 = math.tanh %45 : vector<2x32xf32>
    %47 = vector.extract_strided_slice %32 {offsets = [0, 96], sizes = [2, 32], strides = [1, 1]} : vector<2x128xf32> to vector<2x32xf32>
    %48 = arith.negf %47 : vector<2x32xf32>
    %49 = math.exp %48 : vector<2x32xf32>
    %cst_34 = arith.constant 1.000000e+00 : f32
    %50 = vector.broadcast %cst_34 : f32 to vector<2x32xf32>
    %51 = arith.addf %50, %49 : vector<2x32xf32>
    %52 = arith.divf %50, %51 : vector<2x32xf32>
    %53 = arith.mulf %44, %22 : vector<2x32xf32>
    %54 = arith.mulf %38, %46 : vector<2x32xf32>
    %55 = arith.addf %53, %54 : vector<2x32xf32>
    %56 = math.tanh %55 : vector<2x32xf32>
    %57 = arith.mulf %52, %56 : vector<2x32xf32>
    %cst_35 = arith.constant dense<0.000000e+00> : vector<2x128xf32>
    %58 = tpu.matmul %57, %18, %cst_35 {dimension_numbers = #tpu.dot_dimension_numbers<[1], [0], [0], [1], [0, 0, 1, 1], [], []>} : vector<2x32xf32>, vector<32x128xf32>, vector<2x128xf32> -> vector<2x128xf32>
    %cst_36 = arith.constant dense<0.000000e+00> : vector<2x128xf32>
    %59 = tpu.matmul %22, %19, %cst_36 {dimension_numbers = #tpu.dot_dimension_numbers<[1], [0], [0], [1], [0, 0, 1, 1], [], []>} : vector<2x32xf32>, vector<32x128xf32>, vector<2x128xf32> -> vector<2x128xf32>
    %60 = arith.addf %58, %59 : vector<2x128xf32>
    %61 = arith.addf %60, %28 : vector<2x128xf32>
    %62 = vector.extract_strided_slice %61 {offsets = [0, 0], sizes = [2, 32], strides = [1, 1]} : vector<2x128xf32> to vector<2x32xf32>
    %63 = arith.negf %62 : vector<2x32xf32>
    %64 = math.exp %63 : vector<2x32xf32>
    %cst_37 = arith.constant 1.000000e+00 : f32
    %65 = vector.broadcast %cst_37 : f32 to vector<2x32xf32>
    %66 = arith.addf %65, %64 : vector<2x32xf32>
    %67 = arith.divf %65, %66 : vector<2x32xf32>
    %68 = vector.extract_strided_slice %61 {offsets = [0, 32], sizes = [2, 32], strides = [1, 1]} : vector<2x128xf32> to vector<2x32xf32>
    %69 = arith.negf %68 : vector<2x32xf32>
    %70 = math.exp %69 : vector<2x32xf32>
    %cst_38 = arith.constant 1.000000e+00 : f32
    %71 = vector.broadcast %cst_38 : f32 to vector<2x32xf32>
    %72 = arith.addf %71, %70 : vector<2x32xf32>
    %73 = arith.divf %71, %72 : vector<2x32xf32>
    %74 = vector.extract_strided_slice %61 {offsets = [0, 64], sizes = [2, 32], strides = [1, 1]} : vector<2x128xf32> to vector<2x32xf32>
    %75 = math.tanh %74 : vector<2x32xf32>
    %76 = vector.extract_strided_slice %61 {offsets = [0, 96], sizes = [2, 32], strides = [1, 1]} : vector<2x128xf32> to vector<2x32xf32>
    %77 = arith.negf %76 : vector<2x32xf32>
    %78 = math.exp %77 : vector<2x32xf32>
    %cst_39 = arith.constant 1.000000e+00 : f32
    %79 = vector.broadcast %cst_39 : f32 to vector<2x32xf32>
    %80 = arith.addf %79, %78 : vector<2x32xf32>
    %81 = arith.divf %79, %80 : vector<2x32xf32>
    %82 = arith.mulf %73, %22 : vector<2x32xf32>
    %83 = arith.mulf %67, %75 : vector<2x32xf32>
    %84 = arith.addf %82, %83 : vector<2x32xf32>
    %85 = math.tanh %84 : vector<2x32xf32>
    %86 = arith.mulf %81, %85 : vector<2x32xf32>
    %87 = arith.index_cast %c0_i32 : i32 to index
    %c0_40 = arith.constant 0 : index
    %c0_41 = arith.constant 0 : index
    %88 = vector.load %arg12[%87, %c0_40, %c0_41] : memref<8x2x32xf32, #tpu.memory_space<vmem>>, vector<1x2x32xf32>
    %89 = vector.shape_cast %88 : vector<1x2x32xf32> to vector<2x32xf32>
    %90 = vector.shape_cast %86 : vector<2x32xf32> to vector<1x2x32xf32>
    tpu.vector_store %arg12[%87, %c0_40, %c0_41], %90 {strides = array<i32>} : memref<8x2x32xf32, #tpu.memory_space<vmem>>, vector<1x2x32xf32>,
    %c1_i32 = arith.constant 1 : i32
    %91 = arith.index_cast %c1_i32 : i32 to index
    %c0_42 = arith.constant 0 : index
    %c0_43 = arith.constant 0 : index
    %92 = vector.load %arg5[%91, %c0_42, %c0_43] : memref<8x2x32xf32, #tpu.memory_space<vmem>>, vector<1x2x32xf32>
    %93 = vector.shape_cast %92 : vector<1x2x32xf32> to vector<2x32xf32>
    %cst_44 = arith.constant dense<0.000000e+00> : vector<2x128xf32>
    %94 = tpu.matmul %93, %20, %cst_44 {dimension_numbers = #tpu.dot_dimension_numbers<[1], [0], [0], [1], [0, 0, 1, 1], [], []>} : vector<2x32xf32>, vector<32x128xf32>, vector<2x128xf32> -> vector<2x128xf32>
    %95 = vector.broadcast %21 : vector<1x128xf32> to vector<2x128xf32>
    %96 = arith.addf %94, %95 : vector<2x128xf32>
    %cst_45 = arith.constant dense<0.000000e+00> : vector<2x128xf32>
    %97 = tpu.matmul %84, %16, %cst_45 {dimension_numbers = #tpu.dot_dimension_numbers<[1], [0], [0], [1], [0, 0, 1, 1], [], []>} : vector<2x32xf32>, vector<32x128xf32>, vector<2x128xf32> -> vector<2x128xf32>
    %cst_46 = arith.constant dense<0.000000e+00> : vector<2x128xf32>
    %98 = tpu.matmul %57, %17, %cst_46 {dimension_numbers = #tpu.dot_dimension_numbers<[1], [0], [0], [1], [0, 0, 1, 1], [], []>} : vector<2x32xf32>, vector<32x128xf32>, vector<2x128xf32> -> vector<2x128xf32>
    %99 = arith.addf %97, %98 : vector<2x128xf32>
    %100 = arith.addf %99, %15 : vector<2x128xf32>
    %101 = vector.extract_strided_slice %100 {offsets = [0, 0], sizes = [2, 32], strides = [1, 1]} : vector<2x128xf32> to vector<2x32xf32>
    %102 = arith.negf %101 : vector<2x32xf32>
    %103 = math.exp %102 : vector<2x32xf32>
    %cst_47 = arith.constant 1.000000e+00 : f32
    %104 = vector.broadcast %cst_47 : f32 to vector<2x32xf32>
    %105 = arith.addf %104, %103 : vector<2x32xf32>
    %106 = arith.divf %104, %105 : vector<2x32xf32>
    %107 = vector.extract_strided_slice %100 {offsets = [0, 32], sizes = [2, 32], strides = [1, 1]} : vector<2x128xf32> to vector<2x32xf32>
    %108 = arith.negf %107 : vector<2x32xf32>
    %109 = math.exp %108 : vector<2x32xf32>
    %cst_48 = arith.constant 1.000000e+00 : f32
    %110 = vector.broadcast %cst_48 : f32 to vector<2x32xf32>
    %111 = arith.addf %110, %109 : vector<2x32xf32>
    %112 = arith.divf %110, %111 : vector<2x32xf32>
    %113 = vector.extract_strided_slice %100 {offsets = [0, 64], sizes = [2, 32], strides = [1, 1]} : vector<2x128xf32> to vector<2x32xf32>
    %114 = math.tanh %113 : vector<2x32xf32>
    %115 = vector.extract_strided_slice %100 {offsets = [0, 96], sizes = [2, 32], strides = [1, 1]} : vector<2x128xf32> to vector<2x32xf32>
    %116 = arith.negf %115 : vector<2x32xf32>
    %117 = math.exp %116 : vector<2x32xf32>
    %cst_49 = arith.constant 1.000000e+00 : f32
    %118 = vector.broadcast %cst_49 : f32 to vector<2x32xf32>
    %119 = arith.addf %118, %117 : vector<2x32xf32>
    %120 = arith.divf %118, %119 : vector<2x32xf32>
    %121 = arith.mulf %112, %55 : vector<2x32xf32>
    %122 = arith.mulf %106, %114 : vector<2x32xf32>
    %123 = arith.addf %121, %122 : vector<2x32xf32>
    %124 = math.tanh %123 : vector<2x32xf32>
    %125 = arith.mulf %120, %124 : vector<2x32xf32>
    %cst_50 = arith.constant dense<0.000000e+00> : vector<2x128xf32>
    %126 = tpu.matmul %125, %18, %cst_50 {dimension_numbers = #tpu.dot_dimension_numbers<[1], [0], [0], [1], [0, 0, 1, 1], [], []>} : vector<2x32xf32>, vector<32x128xf32>, vector<2x128xf32> -> vector<2x128xf32>
    %cst_51 = arith.constant dense<0.000000e+00> : vector<2x128xf32>
    %127 = tpu.matmul %86, %19, %cst_51 {dimension_numbers = #tpu.dot_dimension_numbers<[1], [0], [0], [1], [0, 0, 1, 1], [], []>} : vector<2x32xf32>, vector<32x128xf32>, vector<2x128xf32> -> vector<2x128xf32>
    %128 = arith.addf %126, %127 : vector<2x128xf32>
    %129 = arith.addf %128, %96 : vector<2x128xf32>
    %130 = vector.extract_strided_slice %129 {offsets = [0, 0], sizes = [2, 32], strides = [1, 1]} : vector<2x128xf32> to vector<2x32xf32>
    %131 = arith.negf %130 : vector<2x32xf32>
    %132 = math.exp %131 : vector<2x32xf32>
    %cst_52 = arith.constant 1.000000e+00 : f32
    %133 = vector.broadcast %cst_52 : f32 to vector<2x32xf32>
    %134 = arith.addf %133, %132 : vector<2x32xf32>
    %135 = arith.divf %133, %134 : vector<2x32xf32>
    %136 = vector.extract_strided_slice %129 {offsets = [0, 32], sizes = [2, 32], strides = [1, 1]} : vector<2x128xf32> to vector<2x32xf32>
    %137 = arith.negf %136 : vector<2x32xf32>
    %138 = math.exp %137 : vector<2x32xf32>
    %cst_53 = arith.constant 1.000000e+00 : f32
    %139 = vector.broadcast %cst_53 : f32 to vector<2x32xf32>
    %140 = arith.addf %139, %138 : vector<2x32xf32>
    %141 = arith.divf %139, %140 : vector<2x32xf32>
    %142 = vector.extract_strided_slice %129 {offsets = [0, 64], sizes = [2, 32], strides = [1, 1]} : vector<2x128xf32> to vector<2x32xf32>
    %143 = math.tanh %142 : vector<2x32xf32>
    %144 = vector.extract_strided_slice %129 {offsets = [0, 96], sizes = [2, 32], strides = [1, 1]} : vector<2x128xf32> to vector<2x32xf32>
    %145 = arith.negf %144 : vector<2x32xf32>
    %146 = math.exp %145 : vector<2x32xf32>
    %cst_54 = arith.constant 1.000000e+00 : f32
    %147 = vector.broadcast %cst_54 : f32 to vector<2x32xf32>
    %148 = arith.addf %147, %146 : vector<2x32xf32>
    %149 = arith.divf %147, %148 : vector<2x32xf32>
    %150 = arith.mulf %141, %84 : vector<2x32xf32>
    %151 = arith.mulf %135, %143 : vector<2x32xf32>
    %152 = arith.addf %150, %151 : vector<2x32xf32>
    %153 = math.tanh %152 : vector<2x32xf32>
    %154 = arith.mulf %149, %153 : vector<2x32xf32>
    %155 = arith.index_cast %c1_i32 : i32 to index
    %c0_55 = arith.constant 0 : index
    %c0_56 = arith.constant 0 : index
    %156 = vector.load %arg12[%155, %c0_55, %c0_56] : memref<8x2x32xf32, #tpu.memory_space<vmem>>, vector<1x2x32xf32>
    %157 = vector.shape_cast %156 : vector<1x2x32xf32> to vector<2x32xf32>
    %158 = vector.shape_cast %154 : vector<2x32xf32> to vector<1x2x32xf32>
    tpu.vector_store %arg12[%155, %c0_55, %c0_56], %158 {strides = array<i32>} : memref<8x2x32xf32, #tpu.memory_space<vmem>>, vector<1x2x32xf32>,
    %c2_i32 = arith.constant 2 : i32
    %159 = arith.index_cast %c2_i32 : i32 to index
    %c0_57 = arith.constant 0 : index
    %c0_58 = arith.constant 0 : index
    %160 = vector.load %arg5[%159, %c0_57, %c0_58] : memref<8x2x32xf32, #tpu.memory_space<vmem>>, vector<1x2x32xf32>
    %161 = vector.shape_cast %160 : vector<1x2x32xf32> to vector<2x32xf32>
    %cst_59 = arith.constant dense<0.000000e+00> : vector<2x128xf32>
    %162 = tpu.matmul %161, %20, %cst_59 {dimension_numbers = #tpu.dot_dimension_numbers<[1], [0], [0], [1], [0, 0, 1, 1], [], []>} : vector<2x32xf32>, vector<32x128xf32>, vector<2x128xf32> -> vector<2x128xf32>
    %163 = vector.broadcast %21 : vector<1x128xf32> to vector<2x128xf32>
    %164 = arith.addf %162, %163 : vector<2x128xf32>
    %cst_60 = arith.constant dense<0.000000e+00> : vector<2x128xf32>
    %165 = tpu.matmul %152, %16, %cst_60 {dimension_numbers = #tpu.dot_dimension_numbers<[1], [0], [0], [1], [0, 0, 1, 1], [], []>} : vector<2x32xf32>, vector<32x128xf32>, vector<2x128xf32> -> vector<2x128xf32>
    %cst_61 = arith.constant dense<0.000000e+00> : vector<2x128xf32>
    %166 = tpu.matmul %125, %17, %cst_61 {dimension_numbers = #tpu.dot_dimension_numbers<[1], [0], [0], [1], [0, 0, 1, 1], [], []>} : vector<2x32xf32>, vector<32x128xf32>, vector<2x128xf32> -> vector<2x128xf32>
    %167 = arith.addf %165, %166 : vector<2x128xf32>
    %168 = arith.addf %167, %15 : vector<2x128xf32>
    %169 = vector.extract_strided_slice %168 {offsets = [0, 0], sizes = [2, 32], strides = [1, 1]} : vector<2x128xf32> to vector<2x32xf32>
    %170 = arith.negf %169 : vector<2x32xf32>
    %171 = math.exp %170 : vector<2x32xf32>
    %cst_62 = arith.constant 1.000000e+00 : f32
    %172 = vector.broadcast %cst_62 : f32 to vector<2x32xf32>
    %173 = arith.addf %172, %171 : vector<2x32xf32>
    %174 = arith.divf %172, %173 : vector<2x32xf32>
    %175 = vector.extract_strided_slice %168 {offsets = [0, 32], sizes = [2, 32], strides = [1, 1]} : vector<2x128xf32> to vector<2x32xf32>
    %176 = arith.negf %175 : vector<2x32xf32>
    %177 = math.exp %176 : vector<2x32xf32>
    %cst_63 = arith.constant 1.000000e+00 : f32
    %178 = vector.broadcast %cst_63 : f32 to vector<2x32xf32>
    %179 = arith.addf %178, %177 : vector<2x32xf32>
    %180 = arith.divf %178, %179 : vector<2x32xf32>
    %181 = vector.extract_strided_slice %168 {offsets = [0, 64], sizes = [2, 32], strides = [1, 1]} : vector<2x128xf32> to vector<2x32xf32>
    %182 = math.tanh %181 : vector<2x32xf32>
    %183 = vector.extract_strided_slice %168 {offsets = [0, 96], sizes = [2, 32], strides = [1, 1]} : vector<2x128xf32> to vector<2x32xf32>
    %184 = arith.negf %183 : vector<2x32xf32>
    %185 = math.exp %184 : vector<2x32xf32>
    %cst_64 = arith.constant 1.000000e+00 : f32
    %186 = vector.broadcast %cst_64 : f32 to vector<2x32xf32>
    %187 = arith.addf %186, %185 : vector<2x32xf32>
    %188 = arith.divf %186, %187 : vector<2x32xf32>
    %189 = arith.mulf %180, %123 : vector<2x32xf32>
    %190 = arith.mulf %174, %182 : vector<2x32xf32>
    %191 = arith.addf %189, %190 : vector<2x32xf32>
    %192 = math.tanh %191 : vector<2x32xf32>
    %193 = arith.mulf %188, %192 : vector<2x32xf32>
    %cst_65 = arith.constant dense<0.000000e+00> : vector<2x128xf32>
    %194 = tpu.matmul %193, %18, %cst_65 {dimension_numbers = #tpu.dot_dimension_numbers<[1], [0], [0], [1], [0, 0, 1, 1], [], []>} : vector<2x32xf32>, vector<32x128xf32>, vector<2x128xf32> -> vector<2x128xf32>
    %cst_66 = arith.constant dense<0.000000e+00> : vector<2x128xf32>
    %195 = tpu.matmul %154, %19, %cst_66 {dimension_numbers = #tpu.dot_dimension_numbers<[1], [0], [0], [1], [0, 0, 1, 1], [], []>} : vector<2x32xf32>, vector<32x128xf32>, vector<2x128xf32> -> vector<2x128xf32>
    %196 = arith.addf %194, %195 : vector<2x128xf32>
    %197 = arith.addf %196, %164 : vector<2x128xf32>
    %198 = vector.extract_strided_slice %197 {offsets = [0, 0], sizes = [2, 32], strides = [1, 1]} : vector<2x128xf32> to vector<2x32xf32>
    %199 = arith.negf %198 : vector<2x32xf32>
    %200 = math.exp %199 : vector<2x32xf32>
    %cst_67 = arith.constant 1.000000e+00 : f32
    %201 = vector.broadcast %cst_67 : f32 to vector<2x32xf32>
    %202 = arith.addf %201, %200 : vector<2x32xf32>
    %203 = arith.divf %201, %202 : vector<2x32xf32>
    %204 = vector.extract_strided_slice %197 {offsets = [0, 32], sizes = [2, 32], strides = [1, 1]} : vector<2x128xf32> to vector<2x32xf32>
    %205 = arith.negf %204 : vector<2x32xf32>
    %206 = math.exp %205 : vector<2x32xf32>
    %cst_68 = arith.constant 1.000000e+00 : f32
    %207 = vector.broadcast %cst_68 : f32 to vector<2x32xf32>
    %208 = arith.addf %207, %206 : vector<2x32xf32>
    %209 = arith.divf %207, %208 : vector<2x32xf32>
    %210 = vector.extract_strided_slice %197 {offsets = [0, 64], sizes = [2, 32], strides = [1, 1]} : vector<2x128xf32> to vector<2x32xf32>
    %211 = math.tanh %210 : vector<2x32xf32>
    %212 = vector.extract_strided_slice %197 {offsets = [0, 96], sizes = [2, 32], strides = [1, 1]} : vector<2x128xf32> to vector<2x32xf32>
    %213 = arith.negf %212 : vector<2x32xf32>
    %214 = math.exp %213 : vector<2x32xf32>
    %cst_69 = arith.constant 1.000000e+00 : f32
    %215 = vector.broadcast %cst_69 : f32 to vector<2x32xf32>
    %216 = arith.addf %215, %214 : vector<2x32xf32>
    %217 = arith.divf %215, %216 : vector<2x32xf32>
    %218 = arith.mulf %209, %152 : vector<2x32xf32>
    %219 = arith.mulf %203, %211 : vector<2x32xf32>
    %220 = arith.addf %218, %219 : vector<2x32xf32>
    %221 = math.tanh %220 : vector<2x32xf32>
    %222 = arith.mulf %217, %221 : vector<2x32xf32>
    %223 = arith.index_cast %c2_i32 : i32 to index
    %c0_70 = arith.constant 0 : index
    %c0_71 = arith.constant 0 : index
    %224 = vector.load %arg12[%223, %c0_70, %c0_71] : memref<8x2x32xf32, #tpu.memory_space<vmem>>, vector<1x2x32xf32>
    %225 = vector.shape_cast %224 : vector<1x2x32xf32> to vector<2x32xf32>
    %226 = vector.shape_cast %222 : vector<2x32xf32> to vector<1x2x32xf32>
    tpu.vector_store %arg12[%223, %c0_70, %c0_71], %226 {strides = array<i32>} : memref<8x2x32xf32, #tpu.memory_space<vmem>>, vector<1x2x32xf32>,
    %c3_i32 = arith.constant 3 : i32
    %227 = arith.index_cast %c3_i32 : i32 to index
    %c0_72 = arith.constant 0 : index
    %c0_73 = arith.constant 0 : index
    %228 = vector.load %arg5[%227, %c0_72, %c0_73] : memref<8x2x32xf32, #tpu.memory_space<vmem>>, vector<1x2x32xf32>
    %229 = vector.shape_cast %228 : vector<1x2x32xf32> to vector<2x32xf32>
    %cst_74 = arith.constant dense<0.000000e+00> : vector<2x128xf32>
    %230 = tpu.matmul %229, %20, %cst_74 {dimension_numbers = #tpu.dot_dimension_numbers<[1], [0], [0], [1], [0, 0, 1, 1], [], []>} : vector<2x32xf32>, vector<32x128xf32>, vector<2x128xf32> -> vector<2x128xf32>
    %231 = vector.broadcast %21 : vector<1x128xf32> to vector<2x128xf32>
    %232 = arith.addf %230, %231 : vector<2x128xf32>
    %cst_75 = arith.constant dense<0.000000e+00> : vector<2x128xf32>
    %233 = tpu.matmul %220, %16, %cst_75 {dimension_numbers = #tpu.dot_dimension_numbers<[1], [0], [0], [1], [0, 0, 1, 1], [], []>} : vector<2x32xf32>, vector<32x128xf32>, vector<2x128xf32> -> vector<2x128xf32>
    %cst_76 = arith.constant dense<0.000000e+00> : vector<2x128xf32>
    %234 = tpu.matmul %193, %17, %cst_76 {dimension_numbers = #tpu.dot_dimension_numbers<[1], [0], [0], [1], [0, 0, 1, 1], [], []>} : vector<2x32xf32>, vector<32x128xf32>, vector<2x128xf32> -> vector<2x128xf32>
    %235 = arith.addf %233, %234 : vector<2x128xf32>
    %236 = arith.addf %235, %15 : vector<2x128xf32>
    %237 = vector.extract_strided_slice %236 {offsets = [0, 0], sizes = [2, 32], strides = [1, 1]} : vector<2x128xf32> to vector<2x32xf32>
    %238 = arith.negf %237 : vector<2x32xf32>
    %239 = math.exp %238 : vector<2x32xf32>
    %cst_77 = arith.constant 1.000000e+00 : f32
    %240 = vector.broadcast %cst_77 : f32 to vector<2x32xf32>
    %241 = arith.addf %240, %239 : vector<2x32xf32>
    %242 = arith.divf %240, %241 : vector<2x32xf32>
    %243 = vector.extract_strided_slice %236 {offsets = [0, 32], sizes = [2, 32], strides = [1, 1]} : vector<2x128xf32> to vector<2x32xf32>
    %244 = arith.negf %243 : vector<2x32xf32>
    %245 = math.exp %244 : vector<2x32xf32>
    %cst_78 = arith.constant 1.000000e+00 : f32
    %246 = vector.broadcast %cst_78 : f32 to vector<2x32xf32>
    %247 = arith.addf %246, %245 : vector<2x32xf32>
    %248 = arith.divf %246, %247 : vector<2x32xf32>
    %249 = vector.extract_strided_slice %236 {offsets = [0, 64], sizes = [2, 32], strides = [1, 1]} : vector<2x128xf32> to vector<2x32xf32>
    %250 = math.tanh %249 : vector<2x32xf32>
    %251 = vector.extract_strided_slice %236 {offsets = [0, 96], sizes = [2, 32], strides = [1, 1]} : vector<2x128xf32> to vector<2x32xf32>
    %252 = arith.negf %251 : vector<2x32xf32>
    %253 = math.exp %252 : vector<2x32xf32>
    %cst_79 = arith.constant 1.000000e+00 : f32
    %254 = vector.broadcast %cst_79 : f32 to vector<2x32xf32>
    %255 = arith.addf %254, %253 : vector<2x32xf32>
    %256 = arith.divf %254, %255 : vector<2x32xf32>
    %257 = arith.mulf %248, %191 : vector<2x32xf32>
    %258 = arith.mulf %242, %250 : vector<2x32xf32>
    %259 = arith.addf %257, %258 : vector<2x32xf32>
    %260 = math.tanh %259 : vector<2x32xf32>
    %261 = arith.mulf %256, %260 : vector<2x32xf32>
    %cst_80 = arith.constant dense<0.000000e+00> : vector<2x128xf32>
    %262 = tpu.matmul %261, %18, %cst_80 {dimension_numbers = #tpu.dot_dimension_numbers<[1], [0], [0], [1], [0, 0, 1, 1], [], []>} : vector<2x32xf32>, vector<32x128xf32>, vector<2x128xf32> -> vector<2x128xf32>
    %cst_81 = arith.constant dense<0.000000e+00> : vector<2x128xf32>
    %263 = tpu.matmul %222, %19, %cst_81 {dimension_numbers = #tpu.dot_dimension_numbers<[1], [0], [0], [1], [0, 0, 1, 1], [], []>} : vector<2x32xf32>, vector<32x128xf32>, vector<2x128xf32> -> vector<2x128xf32>
    %264 = arith.addf %262, %263 : vector<2x128xf32>
    %265 = arith.addf %264, %232 : vector<2x128xf32>
    %266 = vector.extract_strided_slice %265 {offsets = [0, 0], sizes = [2, 32], strides = [1, 1]} : vector<2x128xf32> to vector<2x32xf32>
    %267 = arith.negf %266 : vector<2x32xf32>
    %268 = math.exp %267 : vector<2x32xf32>
    %cst_82 = arith.constant 1.000000e+00 : f32
    %269 = vector.broadcast %cst_82 : f32 to vector<2x32xf32>
    %270 = arith.addf %269, %268 : vector<2x32xf32>
    %271 = arith.divf %269, %270 : vector<2x32xf32>
    %272 = vector.extract_strided_slice %265 {offsets = [0, 32], sizes = [2, 32], strides = [1, 1]} : vector<2x128xf32> to vector<2x32xf32>
    %273 = arith.negf %272 : vector<2x32xf32>
    %274 = math.exp %273 : vector<2x32xf32>
    %cst_83 = arith.constant 1.000000e+00 : f32
    %275 = vector.broadcast %cst_83 : f32 to vector<2x32xf32>
    %276 = arith.addf %275, %274 : vector<2x32xf32>
    %277 = arith.divf %275, %276 : vector<2x32xf32>
    %278 = vector.extract_strided_slice %265 {offsets = [0, 64], sizes = [2, 32], strides = [1, 1]} : vector<2x128xf32> to vector<2x32xf32>
    %279 = math.tanh %278 : vector<2x32xf32>
    %280 = vector.extract_strided_slice %265 {offsets = [0, 96], sizes = [2, 32], strides = [1, 1]} : vector<2x128xf32> to vector<2x32xf32>
    %281 = arith.negf %280 : vector<2x32xf32>
    %282 = math.exp %281 : vector<2x32xf32>
    %cst_84 = arith.constant 1.000000e+00 : f32
    %283 = vector.broadcast %cst_84 : f32 to vector<2x32xf32>
    %284 = arith.addf %283, %282 : vector<2x32xf32>
    %285 = arith.divf %283, %284 : vector<2x32xf32>
    %286 = arith.mulf %277, %220 : vector<2x32xf32>
    %287 = arith.mulf %271, %279 : vector<2x32xf32>
    %288 = arith.addf %286, %287 : vector<2x32xf32>
    %289 = math.tanh %288 : vector<2x32xf32>
    %290 = arith.mulf %285, %289 : vector<2x32xf32>
    %291 = arith.index_cast %c3_i32 : i32 to index
    %c0_85 = arith.constant 0 : index
    %c0_86 = arith.constant 0 : index
    %292 = vector.load %arg12[%291, %c0_85, %c0_86] : memref<8x2x32xf32, #tpu.memory_space<vmem>>, vector<1x2x32xf32>
    %293 = vector.shape_cast %292 : vector<1x2x32xf32> to vector<2x32xf32>
    %294 = vector.shape_cast %290 : vector<2x32xf32> to vector<1x2x32xf32>
    tpu.vector_store %arg12[%291, %c0_85, %c0_86], %294 {strides = array<i32>} : memref<8x2x32xf32, #tpu.memory_space<vmem>>, vector<1x2x32xf32>,
    %c4_i32 = arith.constant 4 : i32
    %295 = arith.index_cast %c4_i32 : i32 to index
    %c0_87 = arith.constant 0 : index
    %c0_88 = arith.constant 0 : index
    %296 = vector.load %arg5[%295, %c0_87, %c0_88] : memref<8x2x32xf32, #tpu.memory_space<vmem>>, vector<1x2x32xf32>
    %297 = vector.shape_cast %296 : vector<1x2x32xf32> to vector<2x32xf32>
    %cst_89 = arith.constant dense<0.000000e+00> : vector<2x128xf32>
    %298 = tpu.matmul %297, %20, %cst_89 {dimension_numbers = #tpu.dot_dimension_numbers<[1], [0], [0], [1], [0, 0, 1, 1], [], []>} : vector<2x32xf32>, vector<32x128xf32>, vector<2x128xf32> -> vector<2x128xf32>
    %299 = vector.broadcast %21 : vector<1x128xf32> to vector<2x128xf32>
    %300 = arith.addf %298, %299 : vector<2x128xf32>
    %cst_90 = arith.constant dense<0.000000e+00> : vector<2x128xf32>
    %301 = tpu.matmul %288, %16, %cst_90 {dimension_numbers = #tpu.dot_dimension_numbers<[1], [0], [0], [1], [0, 0, 1, 1], [], []>} : vector<2x32xf32>, vector<32x128xf32>, vector<2x128xf32> -> vector<2x128xf32>
    %cst_91 = arith.constant dense<0.000000e+00> : vector<2x128xf32>
    %302 = tpu.matmul %261, %17, %cst_91 {dimension_numbers = #tpu.dot_dimension_numbers<[1], [0], [0], [1], [0, 0, 1, 1], [], []>} : vector<2x32xf32>, vector<32x128xf32>, vector<2x128xf32> -> vector<2x128xf32>
    %303 = arith.addf %301, %302 : vector<2x128xf32>
    %304 = arith.addf %303, %15 : vector<2x128xf32>
    %305 = vector.extract_strided_slice %304 {offsets = [0, 0], sizes = [2, 32], strides = [1, 1]} : vector<2x128xf32> to vector<2x32xf32>
    %306 = arith.negf %305 : vector<2x32xf32>
    %307 = math.exp %306 : vector<2x32xf32>
    %cst_92 = arith.constant 1.000000e+00 : f32
    %308 = vector.broadcast %cst_92 : f32 to vector<2x32xf32>
    %309 = arith.addf %308, %307 : vector<2x32xf32>
    %310 = arith.divf %308, %309 : vector<2x32xf32>
    %311 = vector.extract_strided_slice %304 {offsets = [0, 32], sizes = [2, 32], strides = [1, 1]} : vector<2x128xf32> to vector<2x32xf32>
    %312 = arith.negf %311 : vector<2x32xf32>
    %313 = math.exp %312 : vector<2x32xf32>
    %cst_93 = arith.constant 1.000000e+00 : f32
    %314 = vector.broadcast %cst_93 : f32 to vector<2x32xf32>
    %315 = arith.addf %314, %313 : vector<2x32xf32>
    %316 = arith.divf %314, %315 : vector<2x32xf32>
    %317 = vector.extract_strided_slice %304 {offsets = [0, 64], sizes = [2, 32], strides = [1, 1]} : vector<2x128xf32> to vector<2x32xf32>
    %318 = math.tanh %317 : vector<2x32xf32>
    %319 = vector.extract_strided_slice %304 {offsets = [0, 96], sizes = [2, 32], strides = [1, 1]} : vector<2x128xf32> to vector<2x32xf32>
    %320 = arith.negf %319 : vector<2x32xf32>
    %321 = math.exp %320 : vector<2x32xf32>
    %cst_94 = arith.constant 1.000000e+00 : f32
    %322 = vector.broadcast %cst_94 : f32 to vector<2x32xf32>
    %323 = arith.addf %322, %321 : vector<2x32xf32>
    %324 = arith.divf %322, %323 : vector<2x32xf32>
    %325 = arith.mulf %316, %259 : vector<2x32xf32>
    %326 = arith.mulf %310, %318 : vector<2x32xf32>
    %327 = arith.addf %325, %326 : vector<2x32xf32>
    %328 = math.tanh %327 : vector<2x32xf32>
    %329 = arith.mulf %324, %328 : vector<2x32xf32>
    %cst_95 = arith.constant dense<0.000000e+00> : vector<2x128xf32>
    %330 = tpu.matmul %329, %18, %cst_95 {dimension_numbers = #tpu.dot_dimension_numbers<[1], [0], [0], [1], [0, 0, 1, 1], [], []>} : vector<2x32xf32>, vector<32x128xf32>, vector<2x128xf32> -> vector<2x128xf32>
    %cst_96 = arith.constant dense<0.000000e+00> : vector<2x128xf32>
    %331 = tpu.matmul %290, %19, %cst_96 {dimension_numbers = #tpu.dot_dimension_numbers<[1], [0], [0], [1], [0, 0, 1, 1], [], []>} : vector<2x32xf32>, vector<32x128xf32>, vector<2x128xf32> -> vector<2x128xf32>
    %332 = arith.addf %330, %331 : vector<2x128xf32>
    %333 = arith.addf %332, %300 : vector<2x128xf32>
    %334 = vector.extract_strided_slice %333 {offsets = [0, 0], sizes = [2, 32], strides = [1, 1]} : vector<2x128xf32> to vector<2x32xf32>
    %335 = arith.negf %334 : vector<2x32xf32>
    %336 = math.exp %335 : vector<2x32xf32>
    %cst_97 = arith.constant 1.000000e+00 : f32
    %337 = vector.broadcast %cst_97 : f32 to vector<2x32xf32>
    %338 = arith.addf %337, %336 : vector<2x32xf32>
    %339 = arith.divf %337, %338 : vector<2x32xf32>
    %340 = vector.extract_strided_slice %333 {offsets = [0, 32], sizes = [2, 32], strides = [1, 1]} : vector<2x128xf32> to vector<2x32xf32>
    %341 = arith.negf %340 : vector<2x32xf32>
    %342 = math.exp %341 : vector<2x32xf32>
    %cst_98 = arith.constant 1.000000e+00 : f32
    %343 = vector.broadcast %cst_98 : f32 to vector<2x32xf32>
    %344 = arith.addf %343, %342 : vector<2x32xf32>
    %345 = arith.divf %343, %344 : vector<2x32xf32>
    %346 = vector.extract_strided_slice %333 {offsets = [0, 64], sizes = [2, 32], strides = [1, 1]} : vector<2x128xf32> to vector<2x32xf32>
    %347 = math.tanh %346 : vector<2x32xf32>
    %348 = vector.extract_strided_slice %333 {offsets = [0, 96], sizes = [2, 32], strides = [1, 1]} : vector<2x128xf32> to vector<2x32xf32>
    %349 = arith.negf %348 : vector<2x32xf32>
    %350 = math.exp %349 : vector<2x32xf32>
    %cst_99 = arith.constant 1.000000e+00 : f32
    %351 = vector.broadcast %cst_99 : f32 to vector<2x32xf32>
    %352 = arith.addf %351, %350 : vector<2x32xf32>
    %353 = arith.divf %351, %352 : vector<2x32xf32>
    %354 = arith.mulf %345, %288 : vector<2x32xf32>
    %355 = arith.mulf %339, %347 : vector<2x32xf32>
    %356 = arith.addf %354, %355 : vector<2x32xf32>
    %357 = math.tanh %356 : vector<2x32xf32>
    %358 = arith.mulf %353, %357 : vector<2x32xf32>
    %359 = arith.index_cast %c4_i32 : i32 to index
    %c0_100 = arith.constant 0 : index
    %c0_101 = arith.constant 0 : index
    %360 = vector.load %arg12[%359, %c0_100, %c0_101] : memref<8x2x32xf32, #tpu.memory_space<vmem>>, vector<1x2x32xf32>
    %361 = vector.shape_cast %360 : vector<1x2x32xf32> to vector<2x32xf32>
    %362 = vector.shape_cast %358 : vector<2x32xf32> to vector<1x2x32xf32>
    tpu.vector_store %arg12[%359, %c0_100, %c0_101], %362 {strides = array<i32>} : memref<8x2x32xf32, #tpu.memory_space<vmem>>, vector<1x2x32xf32>,
    %c5_i32 = arith.constant 5 : i32
    %363 = arith.index_cast %c5_i32 : i32 to index
    %c0_102 = arith.constant 0 : index
    %c0_103 = arith.constant 0 : index
    %364 = vector.load %arg5[%363, %c0_102, %c0_103] : memref<8x2x32xf32, #tpu.memory_space<vmem>>, vector<1x2x32xf32>
    %365 = vector.shape_cast %364 : vector<1x2x32xf32> to vector<2x32xf32>
    %cst_104 = arith.constant dense<0.000000e+00> : vector<2x128xf32>
    %366 = tpu.matmul %365, %20, %cst_104 {dimension_numbers = #tpu.dot_dimension_numbers<[1], [0], [0], [1], [0, 0, 1, 1], [], []>} : vector<2x32xf32>, vector<32x128xf32>, vector<2x128xf32> -> vector<2x128xf32>
    %367 = vector.broadcast %21 : vector<1x128xf32> to vector<2x128xf32>
    %368 = arith.addf %366, %367 : vector<2x128xf32>
    %cst_105 = arith.constant dense<0.000000e+00> : vector<2x128xf32>
    %369 = tpu.matmul %356, %16, %cst_105 {dimension_numbers = #tpu.dot_dimension_numbers<[1], [0], [0], [1], [0, 0, 1, 1], [], []>} : vector<2x32xf32>, vector<32x128xf32>, vector<2x128xf32> -> vector<2x128xf32>
    %cst_106 = arith.constant dense<0.000000e+00> : vector<2x128xf32>
    %370 = tpu.matmul %329, %17, %cst_106 {dimension_numbers = #tpu.dot_dimension_numbers<[1], [0], [0], [1], [0, 0, 1, 1], [], []>} : vector<2x32xf32>, vector<32x128xf32>, vector<2x128xf32> -> vector<2x128xf32>
    %371 = arith.addf %369, %370 : vector<2x128xf32>
    %372 = arith.addf %371, %15 : vector<2x128xf32>
    %373 = vector.extract_strided_slice %372 {offsets = [0, 0], sizes = [2, 32], strides = [1, 1]} : vector<2x128xf32> to vector<2x32xf32>
    %374 = arith.negf %373 : vector<2x32xf32>
    %375 = math.exp %374 : vector<2x32xf32>
    %cst_107 = arith.constant 1.000000e+00 : f32
    %376 = vector.broadcast %cst_107 : f32 to vector<2x32xf32>
    %377 = arith.addf %376, %375 : vector<2x32xf32>
    %378 = arith.divf %376, %377 : vector<2x32xf32>
    %379 = vector.extract_strided_slice %372 {offsets = [0, 32], sizes = [2, 32], strides = [1, 1]} : vector<2x128xf32> to vector<2x32xf32>
    %380 = arith.negf %379 : vector<2x32xf32>
    %381 = math.exp %380 : vector<2x32xf32>
    %cst_108 = arith.constant 1.000000e+00 : f32
    %382 = vector.broadcast %cst_108 : f32 to vector<2x32xf32>
    %383 = arith.addf %382, %381 : vector<2x32xf32>
    %384 = arith.divf %382, %383 : vector<2x32xf32>
    %385 = vector.extract_strided_slice %372 {offsets = [0, 64], sizes = [2, 32], strides = [1, 1]} : vector<2x128xf32> to vector<2x32xf32>
    %386 = math.tanh %385 : vector<2x32xf32>
    %387 = vector.extract_strided_slice %372 {offsets = [0, 96], sizes = [2, 32], strides = [1, 1]} : vector<2x128xf32> to vector<2x32xf32>
    %388 = arith.negf %387 : vector<2x32xf32>
    %389 = math.exp %388 : vector<2x32xf32>
    %cst_109 = arith.constant 1.000000e+00 : f32
    %390 = vector.broadcast %cst_109 : f32 to vector<2x32xf32>
    %391 = arith.addf %390, %389 : vector<2x32xf32>
    %392 = arith.divf %390, %391 : vector<2x32xf32>
    %393 = arith.mulf %384, %327 : vector<2x32xf32>
    %394 = arith.mulf %378, %386 : vector<2x32xf32>
    %395 = arith.addf %393, %394 : vector<2x32xf32>
    %396 = math.tanh %395 : vector<2x32xf32>
    %397 = arith.mulf %392, %396 : vector<2x32xf32>
    %cst_110 = arith.constant dense<0.000000e+00> : vector<2x128xf32>
    %398 = tpu.matmul %397, %18, %cst_110 {dimension_numbers = #tpu.dot_dimension_numbers<[1], [0], [0], [1], [0, 0, 1, 1], [], []>} : vector<2x32xf32>, vector<32x128xf32>, vector<2x128xf32> -> vector<2x128xf32>
    %cst_111 = arith.constant dense<0.000000e+00> : vector<2x128xf32>
    %399 = tpu.matmul %358, %19, %cst_111 {dimension_numbers = #tpu.dot_dimension_numbers<[1], [0], [0], [1], [0, 0, 1, 1], [], []>} : vector<2x32xf32>, vector<32x128xf32>, vector<2x128xf32> -> vector<2x128xf32>
    %400 = arith.addf %398, %399 : vector<2x128xf32>
    %401 = arith.addf %400, %368 : vector<2x128xf32>
    %402 = vector.extract_strided_slice %401 {offsets = [0, 0], sizes = [2, 32], strides = [1, 1]} : vector<2x128xf32> to vector<2x32xf32>
    %403 = arith.negf %402 : vector<2x32xf32>
    %404 = math.exp %403 : vector<2x32xf32>
    %cst_112 = arith.constant 1.000000e+00 : f32
    %405 = vector.broadcast %cst_112 : f32 to vector<2x32xf32>
    %406 = arith.addf %405, %404 : vector<2x32xf32>
    %407 = arith.divf %405, %406 : vector<2x32xf32>
    %408 = vector.extract_strided_slice %401 {offsets = [0, 32], sizes = [2, 32], strides = [1, 1]} : vector<2x128xf32> to vector<2x32xf32>
    %409 = arith.negf %408 : vector<2x32xf32>
    %410 = math.exp %409 : vector<2x32xf32>
    %cst_113 = arith.constant 1.000000e+00 : f32
    %411 = vector.broadcast %cst_113 : f32 to vector<2x32xf32>
    %412 = arith.addf %411, %410 : vector<2x32xf32>
    %413 = arith.divf %411, %412 : vector<2x32xf32>
    %414 = vector.extract_strided_slice %401 {offsets = [0, 64], sizes = [2, 32], strides = [1, 1]} : vector<2x128xf32> to vector<2x32xf32>
    %415 = math.tanh %414 : vector<2x32xf32>
    %416 = vector.extract_strided_slice %401 {offsets = [0, 96], sizes = [2, 32], strides = [1, 1]} : vector<2x128xf32> to vector<2x32xf32>
    %417 = arith.negf %416 : vector<2x32xf32>
    %418 = math.exp %417 : vector<2x32xf32>
    %cst_114 = arith.constant 1.000000e+00 : f32
    %419 = vector.broadcast %cst_114 : f32 to vector<2x32xf32>
    %420 = arith.addf %419, %418 : vector<2x32xf32>
    %421 = arith.divf %419, %420 : vector<2x32xf32>
    %422 = arith.mulf %413, %356 : vector<2x32xf32>
    %423 = arith.mulf %407, %415 : vector<2x32xf32>
    %424 = arith.addf %422, %423 : vector<2x32xf32>
    %425 = math.tanh %424 : vector<2x32xf32>
    %426 = arith.mulf %421, %425 : vector<2x32xf32>
    %427 = arith.index_cast %c5_i32 : i32 to index
    %c0_115 = arith.constant 0 : index
    %c0_116 = arith.constant 0 : index
    %428 = vector.load %arg12[%427, %c0_115, %c0_116] : memref<8x2x32xf32, #tpu.memory_space<vmem>>, vector<1x2x32xf32>
    %429 = vector.shape_cast %428 : vector<1x2x32xf32> to vector<2x32xf32>
    %430 = vector.shape_cast %426 : vector<2x32xf32> to vector<1x2x32xf32>
    tpu.vector_store %arg12[%427, %c0_115, %c0_116], %430 {strides = array<i32>} : memref<8x2x32xf32, #tpu.memory_space<vmem>>, vector<1x2x32xf32>,
    %c6_i32 = arith.constant 6 : i32
    %431 = arith.index_cast %c6_i32 : i32 to index
    %c0_117 = arith.constant 0 : index
    %c0_118 = arith.constant 0 : index
    %432 = vector.load %arg5[%431, %c0_117, %c0_118] : memref<8x2x32xf32, #tpu.memory_space<vmem>>, vector<1x2x32xf32>
    %433 = vector.shape_cast %432 : vector<1x2x32xf32> to vector<2x32xf32>
    %cst_119 = arith.constant dense<0.000000e+00> : vector<2x128xf32>
    %434 = tpu.matmul %433, %20, %cst_119 {dimension_numbers = #tpu.dot_dimension_numbers<[1], [0], [0], [1], [0, 0, 1, 1], [], []>} : vector<2x32xf32>, vector<32x128xf32>, vector<2x128xf32> -> vector<2x128xf32>
    %435 = vector.broadcast %21 : vector<1x128xf32> to vector<2x128xf32>
    %436 = arith.addf %434, %435 : vector<2x128xf32>
    %cst_120 = arith.constant dense<0.000000e+00> : vector<2x128xf32>
    %437 = tpu.matmul %424, %16, %cst_120 {dimension_numbers = #tpu.dot_dimension_numbers<[1], [0], [0], [1], [0, 0, 1, 1], [], []>} : vector<2x32xf32>, vector<32x128xf32>, vector<2x128xf32> -> vector<2x128xf32>
    %cst_121 = arith.constant dense<0.000000e+00> : vector<2x128xf32>
    %438 = tpu.matmul %397, %17, %cst_121 {dimension_numbers = #tpu.dot_dimension_numbers<[1], [0], [0], [1], [0, 0, 1, 1], [], []>} : vector<2x32xf32>, vector<32x128xf32>, vector<2x128xf32> -> vector<2x128xf32>
    %439 = arith.addf %437, %438 : vector<2x128xf32>
    %440 = arith.addf %439, %15 : vector<2x128xf32>
    %441 = vector.extract_strided_slice %440 {offsets = [0, 0], sizes = [2, 32], strides = [1, 1]} : vector<2x128xf32> to vector<2x32xf32>
    %442 = arith.negf %441 : vector<2x32xf32>
    %443 = math.exp %442 : vector<2x32xf32>
    %cst_122 = arith.constant 1.000000e+00 : f32
    %444 = vector.broadcast %cst_122 : f32 to vector<2x32xf32>
    %445 = arith.addf %444, %443 : vector<2x32xf32>
    %446 = arith.divf %444, %445 : vector<2x32xf32>
    %447 = vector.extract_strided_slice %440 {offsets = [0, 32], sizes = [2, 32], strides = [1, 1]} : vector<2x128xf32> to vector<2x32xf32>
    %448 = arith.negf %447 : vector<2x32xf32>
    %449 = math.exp %448 : vector<2x32xf32>
    %cst_123 = arith.constant 1.000000e+00 : f32
    %450 = vector.broadcast %cst_123 : f32 to vector<2x32xf32>
    %451 = arith.addf %450, %449 : vector<2x32xf32>
    %452 = arith.divf %450, %451 : vector<2x32xf32>
    %453 = vector.extract_strided_slice %440 {offsets = [0, 64], sizes = [2, 32], strides = [1, 1]} : vector<2x128xf32> to vector<2x32xf32>
    %454 = math.tanh %453 : vector<2x32xf32>
    %455 = vector.extract_strided_slice %440 {offsets = [0, 96], sizes = [2, 32], strides = [1, 1]} : vector<2x128xf32> to vector<2x32xf32>
    %456 = arith.negf %455 : vector<2x32xf32>
    %457 = math.exp %456 : vector<2x32xf32>
    %cst_124 = arith.constant 1.000000e+00 : f32
    %458 = vector.broadcast %cst_124 : f32 to vector<2x32xf32>
    %459 = arith.addf %458, %457 : vector<2x32xf32>
    %460 = arith.divf %458, %459 : vector<2x32xf32>
    %461 = arith.mulf %452, %395 : vector<2x32xf32>
    %462 = arith.mulf %446, %454 : vector<2x32xf32>
    %463 = arith.addf %461, %462 : vector<2x32xf32>
    %464 = math.tanh %463 : vector<2x32xf32>
    %465 = arith.mulf %460, %464 : vector<2x32xf32>
    %cst_125 = arith.constant dense<0.000000e+00> : vector<2x128xf32>
    %466 = tpu.matmul %465, %18, %cst_125 {dimension_numbers = #tpu.dot_dimension_numbers<[1], [0], [0], [1], [0, 0, 1, 1], [], []>} : vector<2x32xf32>, vector<32x128xf32>, vector<2x128xf32> -> vector<2x128xf32>
    %cst_126 = arith.constant dense<0.000000e+00> : vector<2x128xf32>
    %467 = tpu.matmul %426, %19, %cst_126 {dimension_numbers = #tpu.dot_dimension_numbers<[1], [0], [0], [1], [0, 0, 1, 1], [], []>} : vector<2x32xf32>, vector<32x128xf32>, vector<2x128xf32> -> vector<2x128xf32>
    %468 = arith.addf %466, %467 : vector<2x128xf32>
    %469 = arith.addf %468, %436 : vector<2x128xf32>
    %470 = vector.extract_strided_slice %469 {offsets = [0, 0], sizes = [2, 32], strides = [1, 1]} : vector<2x128xf32> to vector<2x32xf32>
    %471 = arith.negf %470 : vector<2x32xf32>
    %472 = math.exp %471 : vector<2x32xf32>
    %cst_127 = arith.constant 1.000000e+00 : f32
    %473 = vector.broadcast %cst_127 : f32 to vector<2x32xf32>
    %474 = arith.addf %473, %472 : vector<2x32xf32>
    %475 = arith.divf %473, %474 : vector<2x32xf32>
    %476 = vector.extract_strided_slice %469 {offsets = [0, 32], sizes = [2, 32], strides = [1, 1]} : vector<2x128xf32> to vector<2x32xf32>
    %477 = arith.negf %476 : vector<2x32xf32>
    %478 = math.exp %477 : vector<2x32xf32>
    %cst_128 = arith.constant 1.000000e+00 : f32
    %479 = vector.broadcast %cst_128 : f32 to vector<2x32xf32>
    %480 = arith.addf %479, %478 : vector<2x32xf32>
    %481 = arith.divf %479, %480 : vector<2x32xf32>
    %482 = vector.extract_strided_slice %469 {offsets = [0, 64], sizes = [2, 32], strides = [1, 1]} : vector<2x128xf32> to vector<2x32xf32>
    %483 = math.tanh %482 : vector<2x32xf32>
    %484 = vector.extract_strided_slice %469 {offsets = [0, 96], sizes = [2, 32], strides = [1, 1]} : vector<2x128xf32> to vector<2x32xf32>
    %485 = arith.negf %484 : vector<2x32xf32>
    %486 = math.exp %485 : vector<2x32xf32>
    %cst_129 = arith.constant 1.000000e+00 : f32
    %487 = vector.broadcast %cst_129 : f32 to vector<2x32xf32>
    %488 = arith.addf %487, %486 : vector<2x32xf32>
    %489 = arith.divf %487, %488 : vector<2x32xf32>
    %490 = arith.mulf %481, %424 : vector<2x32xf32>
    %491 = arith.mulf %475, %483 : vector<2x32xf32>
    %492 = arith.addf %490, %491 : vector<2x32xf32>
    %493 = math.tanh %492 : vector<2x32xf32>
    %494 = arith.mulf %489, %493 : vector<2x32xf32>
    %495 = arith.index_cast %c6_i32 : i32 to index
    %c0_130 = arith.constant 0 : index
    %c0_131 = arith.constant 0 : index
    %496 = vector.load %arg12[%495, %c0_130, %c0_131] : memref<8x2x32xf32, #tpu.memory_space<vmem>>, vector<1x2x32xf32>
    %497 = vector.shape_cast %496 : vector<1x2x32xf32> to vector<2x32xf32>
    %498 = vector.shape_cast %494 : vector<2x32xf32> to vector<1x2x32xf32>
    tpu.vector_store %arg12[%495, %c0_130, %c0_131], %498 {strides = array<i32>} : memref<8x2x32xf32, #tpu.memory_space<vmem>>, vector<1x2x32xf32>,
    %c7_i32 = arith.constant 7 : i32
    %499 = arith.index_cast %c7_i32 : i32 to index
    %c0_132 = arith.constant 0 : index
    %c0_133 = arith.constant 0 : index
    %500 = vector.load %arg5[%499, %c0_132, %c0_133] : memref<8x2x32xf32, #tpu.memory_space<vmem>>, vector<1x2x32xf32>
    %501 = vector.shape_cast %500 : vector<1x2x32xf32> to vector<2x32xf32>
    %cst_134 = arith.constant dense<0.000000e+00> : vector<2x128xf32>
    %502 = tpu.matmul %501, %20, %cst_134 {dimension_numbers = #tpu.dot_dimension_numbers<[1], [0], [0], [1], [0, 0, 1, 1], [], []>} : vector<2x32xf32>, vector<32x128xf32>, vector<2x128xf32> -> vector<2x128xf32>
    %503 = vector.broadcast %21 : vector<1x128xf32> to vector<2x128xf32>
    %504 = arith.addf %502, %503 : vector<2x128xf32>
    %cst_135 = arith.constant dense<0.000000e+00> : vector<2x128xf32>
    %505 = tpu.matmul %492, %16, %cst_135 {dimension_numbers = #tpu.dot_dimension_numbers<[1], [0], [0], [1], [0, 0, 1, 1], [], []>} : vector<2x32xf32>, vector<32x128xf32>, vector<2x128xf32> -> vector<2x128xf32>
    %cst_136 = arith.constant dense<0.000000e+00> : vector<2x128xf32>
    %506 = tpu.matmul %465, %17, %cst_136 {dimension_numbers = #tpu.dot_dimension_numbers<[1], [0], [0], [1], [0, 0, 1, 1], [], []>} : vector<2x32xf32>, vector<32x128xf32>, vector<2x128xf32> -> vector<2x128xf32>
    %507 = arith.addf %505, %506 : vector<2x128xf32>
    %508 = arith.addf %507, %15 : vector<2x128xf32>
    %509 = vector.extract_strided_slice %508 {offsets = [0, 0], sizes = [2, 32], strides = [1, 1]} : vector<2x128xf32> to vector<2x32xf32>
    %510 = arith.negf %509 : vector<2x32xf32>
    %511 = math.exp %510 : vector<2x32xf32>
    %cst_137 = arith.constant 1.000000e+00 : f32
    %512 = vector.broadcast %cst_137 : f32 to vector<2x32xf32>
    %513 = arith.addf %512, %511 : vector<2x32xf32>
    %514 = arith.divf %512, %513 : vector<2x32xf32>
    %515 = vector.extract_strided_slice %508 {offsets = [0, 32], sizes = [2, 32], strides = [1, 1]} : vector<2x128xf32> to vector<2x32xf32>
    %516 = arith.negf %515 : vector<2x32xf32>
    %517 = math.exp %516 : vector<2x32xf32>
    %cst_138 = arith.constant 1.000000e+00 : f32
    %518 = vector.broadcast %cst_138 : f32 to vector<2x32xf32>
    %519 = arith.addf %518, %517 : vector<2x32xf32>
    %520 = arith.divf %518, %519 : vector<2x32xf32>
    %521 = vector.extract_strided_slice %508 {offsets = [0, 64], sizes = [2, 32], strides = [1, 1]} : vector<2x128xf32> to vector<2x32xf32>
    %522 = math.tanh %521 : vector<2x32xf32>
    %523 = vector.extract_strided_slice %508 {offsets = [0, 96], sizes = [2, 32], strides = [1, 1]} : vector<2x128xf32> to vector<2x32xf32>
    %524 = arith.negf %523 : vector<2x32xf32>
    %525 = math.exp %524 : vector<2x32xf32>
    %cst_139 = arith.constant 1.000000e+00 : f32
    %526 = vector.broadcast %cst_139 : f32 to vector<2x32xf32>
    %527 = arith.addf %526, %525 : vector<2x32xf32>
    %528 = arith.divf %526, %527 : vector<2x32xf32>
    %529 = arith.mulf %520, %463 : vector<2x32xf32>
    %530 = arith.mulf %514, %522 : vector<2x32xf32>
    %531 = arith.addf %529, %530 : vector<2x32xf32>
    %532 = math.tanh %531 : vector<2x32xf32>
    %533 = arith.mulf %528, %532 : vector<2x32xf32>
    %cst_140 = arith.constant dense<0.000000e+00> : vector<2x128xf32>
    %534 = tpu.matmul %533, %18, %cst_140 {dimension_numbers = #tpu.dot_dimension_numbers<[1], [0], [0], [1], [0, 0, 1, 1], [], []>} : vector<2x32xf32>, vector<32x128xf32>, vector<2x128xf32> -> vector<2x128xf32>
    %cst_141 = arith.constant dense<0.000000e+00> : vector<2x128xf32>
    %535 = tpu.matmul %494, %19, %cst_141 {dimension_numbers = #tpu.dot_dimension_numbers<[1], [0], [0], [1], [0, 0, 1, 1], [], []>} : vector<2x32xf32>, vector<32x128xf32>, vector<2x128xf32> -> vector<2x128xf32>
    %536 = arith.addf %534, %535 : vector<2x128xf32>
    %537 = arith.addf %536, %504 : vector<2x128xf32>
    %538 = vector.extract_strided_slice %537 {offsets = [0, 0], sizes = [2, 32], strides = [1, 1]} : vector<2x128xf32> to vector<2x32xf32>
    %539 = arith.negf %538 : vector<2x32xf32>
    %540 = math.exp %539 : vector<2x32xf32>
    %cst_142 = arith.constant 1.000000e+00 : f32
    %541 = vector.broadcast %cst_142 : f32 to vector<2x32xf32>
    %542 = arith.addf %541, %540 : vector<2x32xf32>
    %543 = arith.divf %541, %542 : vector<2x32xf32>
    %544 = vector.extract_strided_slice %537 {offsets = [0, 32], sizes = [2, 32], strides = [1, 1]} : vector<2x128xf32> to vector<2x32xf32>
    %545 = arith.negf %544 : vector<2x32xf32>
    %546 = math.exp %545 : vector<2x32xf32>
    %cst_143 = arith.constant 1.000000e+00 : f32
    %547 = vector.broadcast %cst_143 : f32 to vector<2x32xf32>
    %548 = arith.addf %547, %546 : vector<2x32xf32>
    %549 = arith.divf %547, %548 : vector<2x32xf32>
    %550 = vector.extract_strided_slice %537 {offsets = [0, 64], sizes = [2, 32], strides = [1, 1]} : vector<2x128xf32> to vector<2x32xf32>
    %551 = math.tanh %550 : vector<2x32xf32>
    %552 = vector.extract_strided_slice %537 {offsets = [0, 96], sizes = [2, 32], strides = [1, 1]} : vector<2x128xf32> to vector<2x32xf32>
    %553 = arith.negf %552 : vector<2x32xf32>
    %554 = math.exp %553 : vector<2x32xf32>
    %cst_144 = arith.constant 1.000000e+00 : f32
    %555 = vector.broadcast %cst_144 : f32 to vector<2x32xf32>
    %556 = arith.addf %555, %554 : vector<2x32xf32>
    %557 = arith.divf %555, %556 : vector<2x32xf32>
    %558 = arith.mulf %549, %492 : vector<2x32xf32>
    %559 = arith.mulf %543, %551 : vector<2x32xf32>
    %560 = arith.addf %558, %559 : vector<2x32xf32>
    %561 = math.tanh %560 : vector<2x32xf32>
    %562 = arith.mulf %557, %561 : vector<2x32xf32>
    %563 = arith.index_cast %c7_i32 : i32 to index
    %c0_145 = arith.constant 0 : index
    %c0_146 = arith.constant 0 : index
    %564 = vector.load %arg12[%563, %c0_145, %c0_146] : memref<8x2x32xf32, #tpu.memory_space<vmem>>, vector<1x2x32xf32>
    %565 = vector.shape_cast %564 : vector<1x2x32xf32> to vector<2x32xf32>
    %566 = vector.shape_cast %562 : vector<2x32xf32> to vector<1x2x32xf32>
    tpu.vector_store %arg12[%563, %c0_145, %c0_146], %566 {strides = array<i32>} : memref<8x2x32xf32, #tpu.memory_space<vmem>>, vector<1x2x32xf32>,
    %c8_i32 = arith.constant 8 : i32
    return
  }
}

</mosaic_0001>

<bundles_post_ra>
// kernel: tpu_custom_call.1
= control target key start
LH: loop header
LB: loop body
LE: loop exit
PB: predicated region body
PF: predicated region fallthrough
CT: control target
= control target key end

     0   :  { %vm271_vm0 = vcmask 1040384   ;;  %vm1011_vm1 = vcmask 1041409   ;;  %s9600_s0 = inlined_call_operand.vmem [shape: f32[2,49,2048], index: 0, kind: input, shape index: {}]   ;;  %s9601_s1 = inlined_call_operand.vmem [shape: f32[2048,32], index: 1, kind: input, shape index: {}]   ;;  %s9602_s2 = inlined_call_operand.vmem [shape: f32[1,32], index: 2, kind: input, shape index: {}]   ;;  %s9603_s3 = inlined_call_operand.vmem [shape: f32[32,128], index: 3, kind: input, shape index: {}]   ;;  %s9604_s4 = inlined_call_operand.vmem [shape: f32[1,128], index: 4, kind: input, shape index: {}]   ;;  %s9605_s5 = inlined_call_operand.vmem [shape: f32[8,2,32], index: 5, kind: input, shape index: {}]   ;;  %s9606_s6 = inlined_call_operand.vmem [shape: f32[32,128], index: 6, kind: input, shape index: {}]   ;;  %s9607_s7 = inlined_call_operand.vmem [shape: f32[1,128], index: 7, kind: input, shape index: {}]   ;;  %s9608_s8 = inlined_call_operand.vmem [shape: f32[32,128], index: 8, kind: input, shape index: {}]   ;;  %s9609_s9 = inlined_call_operand.vmem [shape: f32[32,128], index: 9, kind: input, shape index: {}]   ;;  %s9610_s10 = inlined_call_operand.vmem [shape: f32[32,128], index: 10, kind: input, shape index: {}]   ;;  %s9611_s11 = inlined_call_operand.vmem [shape: f32[32,128], index: 11, kind: input, shape index: {}]   ;;  %s9612_s12 = inlined_call_operand.hbm [shape: f32[8,2,32], index: 12, kind: output, shape index: {}]  }
   0x1   :  { %v732_v0 = vld [vmem:[%s9601_s1 + $0x80] sm:$0xff]  ;;  %v733_v1 = vld [vmem:[%s9601_s1 + $0x88] sm:$0xff]  ;;  %v734_v11 = vld [vmem:[%s9601_s1 + $0x90] sm:$0xff] }
   0x2   :  { %v716_v2 = vld [vmem:[%s9601_s1] sm:$0xff]  ;;  %v6112_v3 = vpack.c.bf16 %v733_v1, %v732_v0  ;;  %v717_v4 = vld [vmem:[%s9601_s1 + $0x8] sm:$0xff]  ;;  %v735_v13 = vld [vmem:[%s9601_s1 + $0x98] sm:$0xff] }
   0x3   :  { %v764_v5 = vld [vmem:[%s9601_s1 + $0x180] sm:$0xff]  ;;  %v765_v6 = vld [vmem:[%s9601_s1 + $0x188] sm:$0xff]  ;;  %v6114_v7 = vpack.c.bf16 %v717_v4, %v716_v2  ;;  %v718_v14 = vld [vmem:[%s9601_s1 + $0x10] sm:$0xff]  ;;  %v6116_v16 = vpack.c.bf16 %v735_v13, %v734_v11 }
   0x4   :  { %v6144_v8 = vpack.c.bf16 %v765_v6, %v764_v5  ;;  %v748_v9 = vld [vmem:[%s9601_s1 + $0x100] sm:$0xff]  ;;  %v749_v10 = vld [vmem:[%s9601_s1 + $0x108] sm:$0xff]  ;;  %6113 = vmatprep.subr.bf16.mxu0 %v6112_v3  ;;  %v719_v15 = vld [vmem:[%s9601_s1 + $0x18] sm:$0xff] }
   0x5   :  { %v6146_v12 = vpack.c.bf16 %v749_v10, %v748_v9  ;;  %6115 = vmatpush3.bf16.msra.mxu0 %v6114_v7  ;;  %v6118_v17 = vpack.c.bf16 %v719_v15, %v718_v14  ;;  %v766_v18 = vld [vmem:[%s9601_s1 + $0x190] sm:$0xff]  ;;  %v767_v19 = vld [vmem:[%s9601_s1 + $0x198] sm:$0xff]  ;;  %v736_v23 = vld [vmem:[%s9601_s1 + $0xa0] sm:$0xff] }
   0x6   :  { %6145 = vmatprep.subr.bf16.mxu1 %v6144_v8  ;;  %v750_v20 = vld [vmem:[%s9601_s1 + $0x110] sm:$0xff]  ;;  %v6148_v21 = vpack.c.bf16 %v767_v19, %v766_v18  ;;  %v751_v22 = vld [vmem:[%s9601_s1 + $0x118] sm:$0xff]  ;;  %v737_v24 = vld [vmem:[%s9601_s1 + $0xa8] sm:$0xff]  ;;  %6117 = vmatprep.subr.bf16.mxu0 %v6116_v16 }
   0x7   :  { %6147 = vmatpush3.bf16.msra.mxu1 %v6146_v12  ;;  %v6150_v25 = vpack.c.bf16 %v751_v22, %v750_v20  ;;  %v6120_v26 = vpack.c.bf16 %v737_v24, %v736_v23  ;;  %v720_v27 = vld [vmem:[%s9601_s1 + $0x20] sm:$0xff]  ;;  %v721_v28 = vld [vmem:[%s9601_s1 + $0x28] sm:$0xff]  ;;  %v738_v35 = vld [vmem:[%s9601_s1 + $0xb0] sm:$0xff] }
   0x8   :  { %v768_v29 = vld [vmem:[%s9601_s1 + $0x1a0] sm:$0xff]  ;;  %6149 = vmatprep.subr.bf16.mxu1 %v6148_v21  ;;  %v769_v30 = vld [vmem:[%s9601_s1 + $0x1a8] sm:$0xff]  ;;  %v6122_v33 = vpack.c.bf16 %v721_v28, %v720_v27  ;;  %v739_v36 = vld [vmem:[%s9601_s1 + $0xb8] sm:$0xff] }
   0x9   :  { %v752_v31 = vld [vmem:[%s9601_s1 + $0x120] sm:$0xff]  ;;  %v753_v32 = vld [vmem:[%s9601_s1 + $0x128] sm:$0xff]  ;;  %6119 = vmatpush3.bf16.msra.mxu0 %v6118_v17  ;;  %v6152_v34 = vpack.c.bf16 %v769_v30, %v768_v29  ;;  %v722_v37 = vld [vmem:[%s9601_s1 + $0x30] sm:$0xff]  ;;  %v6124_v39 = vpack.c.bf16 %v739_v36, %v738_v35 }
   0xa   :  { %6121 = vmatprep.subr.bf16.mxu0 %v6120_v26  ;;  %v6154_v38 = vpack.c.bf16 %v753_v32, %v752_v31  ;;  %v723_v40 = vld [vmem:[%s9601_s1 + $0x38] sm:$0xff]  ;;  %v770_v41 = vld [vmem:[%s9601_s1 + $0x1b0] sm:$0xff]  ;;  %v740_v46 = vld [vmem:[%s9601_s1 + $0xc0] sm:$0xff] }
   0xb   :  { %6151 = vmatpush3.bf16.msra.mxu1 %v6150_v25  ;;  %v771_v42 = vld [vmem:[%s9601_s1 + $0x1b8] sm:$0xff]  ;;  %v754_v44 = vld [vmem:[%s9601_s1 + $0x130] sm:$0xff]  ;;  %v741_v47 = vld [vmem:[%s9601_s1 + $0xc8] sm:$0xff]  ;;  %v6126_v48 = vpack.c.bf16 %v723_v40, %v722_v37 }
   0xc   :  { %6153 = vmatprep.subr.bf16.mxu1 %v6152_v34  ;;  %v6156_v43 = vpack.c.bf16 %v771_v42, %v770_v41  ;;  %v755_v45 = vld [vmem:[%s9601_s1 + $0x138] sm:$0xff]  ;;  %v772_v49 = vld [vmem:[%s9601_s1 + $0x1c0] sm:$0xff]  ;;  %v773_v50 = vld [vmem:[%s9601_s1 + $0x1c8] sm:$0xff]  ;;  %v6128_v52 = vpack.c.bf16 %v741_v47, %v740_v46 }
   0xd   :  { %6123 = vmatpush3.bf16.msra.mxu0 %v6122_v33  ;;  %v6158_v51 = vpack.c.bf16 %v755_v45, %v754_v44  ;;  %v724_v53 = vld [vmem:[%s9601_s1 + $0x40] sm:$0xff]  ;;  %v725_v54 = vld [vmem:[%s9601_s1 + $0x48] sm:$0xff]  ;;  %v6160_v56 = vpack.c.bf16 %v773_v50, %v772_v49  ;;  %v742_v58 = vld [vmem:[%s9601_s1 + $0xd0] sm:$0xff] }
   0xe   :  { %6125 = vmatprep.subr.bf16.mxu0 %v6124_v39  ;;  %v756_v55 = vld [vmem:[%s9601_s1 + $0x140] sm:$0xff]  ;;  %v757_v57 = vld [vmem:[%s9601_s1 + $0x148] sm:$0xff]  ;;  %v743_v59 = vld [vmem:[%s9601_s1 + $0xd8] sm:$0xff]  ;;  %v6130_v62 = vpack.c.bf16 %v725_v54, %v724_v53 }
   0xf   :  { %6155 = vmatpush3.bf16.msra.mxu1 %v6154_v38  ;;  %v774_v60 = vld [vmem:[%s9601_s1 + $0x1d0] sm:$0xff]  ;;  %v775_v61 = vld [vmem:[%s9601_s1 + $0x1d8] sm:$0xff]  ;;  %v6162_v63 = vpack.c.bf16 %v757_v57, %v756_v55  ;;  %v6132_v0 = vpack.c.bf16 %v743_v59, %v742_v58  ;;  %v744_v6 = vld [vmem:[%s9601_s1 + $0xe0] sm:$0xff] }
  0x10   :  { %6157 = vmatprep.subr.bf16.mxu1 %v6156_v43  ;;  %v726_v1 = vld [vmem:[%s9601_s1 + $0x50] sm:$0xff]  ;;  %v727_v2 = vld [vmem:[%s9601_s1 + $0x58] sm:$0xff]  ;;  %v6164_v4 = vpack.c.bf16 %v775_v61, %v774_v60  ;;  %v745_v7 = vld [vmem:[%s9601_s1 + $0xe8] sm:$0xff] }
  0x11   :  { %6127 = vmatpush3.bf16.msra.mxu0 %v6126_v48  ;;  %v758_v3 = vld [vmem:[%s9601_s1 + $0x150] sm:$0xff]  ;;  %v759_v5 = vld [vmem:[%s9601_s1 + $0x158] sm:$0xff]  ;;  %v728_v8 = vld [vmem:[%s9601_s1 + $0x60] sm:$0xff]  ;;  %v6134_v12 = vpack.c.bf16 %v727_v2, %v726_v1  ;;  %v6136_v17 = vpack.c.bf16 %v745_v7, %v744_v6 }
  0x12   :  { %6129 = vmatprep.subr.bf16.mxu0 %v6128_v52  ;;  %v729_v9 = vld [vmem:[%s9601_s1 + $0x68] sm:$0xff]  ;;  %v776_v10 = vld [vmem:[%s9601_s1 + $0x1e0] sm:$0xff]  ;;  %v746_v15 = vld [vmem:[%s9601_s1 + $0xf0] sm:$0xff]  ;;  %v6166_v16 = vpack.c.bf16 %v759_v5, %v758_v3 }
  0x13   :  { %6159 = vmatpush3.bf16.msra.mxu1 %v6158_v51  ;;  %v777_v11 = vld [vmem:[%s9601_s1 + $0x1e8] sm:$0xff]  ;;  %v760_v13 = vld [vmem:[%s9601_s1 + $0x160] sm:$0xff]  ;;  %v747_v18 = vld [vmem:[%s9601_s1 + $0xf8] sm:$0xff]  ;;  %v6138_v31 = vpack.c.bf16 %v729_v9, %v728_v8 }
  0x14   :  { %6161 = vmatprep.subr.bf16.mxu1 %v6160_v56  ;;  %v761_v14 = vld [vmem:[%s9601_s1 + $0x168] sm:$0xff]  ;;  %v6168_v21 = vpack.c.bf16 %v777_v11, %v776_v10  ;;  %v778_v22 = vld [vmem:[%s9601_s1 + $0x1f0] sm:$0xff]  ;;  %v779_v23 = vld [vmem:[%s9601_s1 + $0x1f8] sm:$0xff]  ;;  %v6140_v37 = vpack.c.bf16 %v747_v18, %v746_v15 }
  0x15   :  { %6131 = vmatpush3.bf16.msra.mxu0 %v6130_v62  ;;  %v43_v19 = vld [vmem:[%s9600_s0 + $0x8] sm:$0xff]  ;;  %v730_v26 = vld [vmem:[%s9601_s1 + $0x70] sm:$0xff]  ;;  %v731_v27 = vld [vmem:[%s9601_s1 + $0x78] sm:$0xff]  ;;  %v6170_v36 = vpack.c.bf16 %v761_v14, %v760_v13  ;;  %v6172_v42 = vpack.c.bf16 %v779_v23, %v778_v22 }
  0x16   :  { %6133 = vmatprep.subr.bf16.mxu0 %v6132_v0  ;;  %v59_v20 = vld [vmem:[%s9600_s0 + $0x88] sm:$0xff]  ;;  %v7086_v28 = vld [vmem:[%s9601_s1 + $0x170] sm:$0xff]  ;;  %v763_v32 = vld [vmem:[%s9601_s1 + $0x178] sm:$0xff]  ;;  %v6142_v51 = vpack.c.bf16 %v731_v27, %v730_v26 }
  0x17   :  { %6163 = vmatpush3.bf16.msra.mxu1 %v6162_v63  ;;  %v75_v24 = vld [vmem:[%s9600_s0 + $0x108] sm:$0xff]  ;;  %v280_v25 = vadd.f32 %v59_v20, %v43_v19  ;;  %v42_v44 = vld [vmem:[%s9600_s0] sm:$0xff]  ;;  %v6174_v52 = vpack.c.bf16 %v763_v32, %v7086_v28  ;;  %v45_v10 = vld [vmem:[%s9600_s0 + $0x18] sm:$0xff] }
  0x18   :  { %6165 = vmatprep.subr.bf16.mxu1 %v6164_v4  ;;  %v91_v29 = vld [vmem:[%s9600_s0 + $0x188] sm:$0xff]  ;;  %v58_v45 = vld [vmem:[%s9600_s0 + $0x80] sm:$0xff]  ;;  %v61_v11 = vld [vmem:[%s9600_s0 + $0x98] sm:$0xff] }
  0x19   :  { %v155_v30 = vld [vmem:[%s9600_s0 + $0x388] sm:$0xff]  ;;  %6135 = vmatpush3.bf16.msra.mxu0 %v6134_v12  ;;  %v281_v35 = vadd.f32 %v280_v25, %v75_v24  ;;  %v74_v46 = vld [vmem:[%s9600_s0 + $0x100] sm:$0xff]  ;;  %v266_v50 = vadd.f32 %v58_v45, %v42_v44  ;;  %v306_v18 = vadd.f32 %v61_v11, %v45_v10  ;;  %v93_v22 = vld [vmem:[%s9600_s0 + $0x198] sm:$0xff] }
  0x1a   :  { %v171_v33 = vld [vmem:[%s9600_s0 + $0x408] sm:$0xff]  ;;  %6137 = vmatprep.subr.bf16.mxu0 %v6136_v17  ;;  %v90_v55 = vld [vmem:[%s9600_s0 + $0x180] sm:$0xff]  ;;  %v77_v17 = vld [vmem:[%s9600_s0 + $0x118] sm:$0xff] }
  0x1b   :  { %v187_v34 = vld [vmem:[%s9600_s0 + $0x488] sm:$0xff]  ;;  %6167 = vmatpush3.bf16.msra.mxu1 %v6166_v16  ;;  %v488_v41 = vadd.f32 %v171_v33, %v155_v30  ;;  %v282_v43 = vadd.f32 %v281_v35, %v91_v29  ;;  %v154_v56 = vld [vmem:[%s9600_s0 + $0x380] sm:$0xff]  ;;  %v267_v63 = vadd.f32 %v266_v50, %v74_v46  ;;  %v141_v23 = vld [vmem:[%s9600_s0 + $0x318] sm:$0x1]  ;;  %v307_v30 = vadd.f32 %v306_v18, %v77_v17 }
  0x1c   :  { %v107_v38 = vld [vmem:[%s9600_s0 + $0x208] sm:$0xff]  ;;  %6169 = vmatprep.subr.bf16.mxu1 %v6168_v21  ;;  %v170_v57 = vld [vmem:[%s9600_s0 + $0x400] sm:$0xff]  ;;  %v157_v24 = vld [vmem:[%s9600_s0 + $0x398] sm:$0xff] }
  0x1d   :  { %v139_v39 = vld [vmem:[%s9600_s0 + $0x308] sm:$0x1]  ;;  %v489_v49 = vadd.f32 %v488_v41, %v187_v34  ;;  %6139 = vmatpush3.bf16.msra.mxu0 %v6138_v31  ;;  %v283_v54 = vadd.f32 %v282_v43, %v107_v38  ;;  %v106_v61 = vld [vmem:[%s9600_s0 + $0x200] sm:$0xff]  ;;  %v475_v0 = vadd.f32 %v170_v57, %v154_v56  ;;  %v268_v7 = vadd.f32 %v267_v63, %v90_v55  ;;  %v173_v28 = vld [vmem:[%s9600_s0 + $0x418] sm:$0xff] }
  0x1e   :  { %v203_v40 = vld [vmem:[%s9600_s0 + $0x508] sm:$0xff]  ;;  %6141 = vmatprep.subr.bf16.mxu0 %v6140_v37  ;;  %v285_v59 = vsel %vm271_vm0, %v139_v39, 0.0  ;;  %v186_v62 = vld [vmem:[%s9600_s0 + $0x480] sm:$0xff]  ;;  %v189_v29 = vld [vmem:[%s9600_s0 + $0x498] sm:$0xff]  ;;  %v308_v41 = vadd.f32 %v307_v30, %v93_v22 }
  0x1f   :  { %v123_v47 = vld [vmem:[%s9600_s0 + $0x288] sm:$0xff]  ;;  %6171 = vmatpush3.bf16.msra.mxu1 %v6170_v36  ;;  %v490_v60 = vadd.f32 %v489_v49, %v203_v40  ;;  %v122_v2 = vld [vmem:[%s9600_s0 + $0x280] sm:$0xff]  ;;  %v476_v8 = vadd.f32 %v475_v0, %v186_v62  ;;  %v269_v20 = vadd.f32 %v268_v7, %v106_v61  ;;  %v109_v34 = vld [vmem:[%s9600_s0 + $0x218] sm:$0xff]  ;;  %v514_v36 = vadd.f32 %v173_v28, %v157_v24 }
  0x20   :  { %v219_v48 = vld [vmem:[%s9600_s0 + $0x588] sm:$0xff]  ;;  %6173 = vmatprep.subr.bf16.mxu1 %v6172_v42  ;;  %v284_v1 = vadd.f32 %v283_v54, %v123_v47  ;;  %v138_v3 = vld [vmem:[%s9600_s0 + $0x300] sm:$0x1]  ;;  %v253_v35 = vld [vmem:[%s9600_s0 + $0x698] sm:$0x1]  ;;  %v311_v42 = vsel %vm271_vm0, %v141_v23, 0.0 }
  0x21   :  { %v235_v53 = vld [vmem:[%s9600_s0 + $0x608] sm:$0xff]  ;;  %v202_v4 = vld [vmem:[%s9600_s0 + $0x500] sm:$0xff]  ;;  %v491_v6 = vadd.f32 %v490_v60, %v219_v48  ;;  %6143 = vmatpush3.bf16.msra.mxu0 %v6142_v51  ;;  %v272_v27 = vsel %vm271_vm0, %v138_v3, 0.0  ;;  %v270_v32 = vadd.f32 %v269_v20, %v122_v2  ;;  %v125_v39 = vld [vmem:[%s9600_s0 + $0x298] sm:$0xff]  ;;  %v515_v47 = vadd.f32 %v514_v36, %v189_v29 }
  0x22   :  { %v251_v58 = vld [vmem:[%s9600_s0 + $0x688] sm:$0x1]  ;;  %v796_v5 = vld [vmem:[%s9601_s1 + $0x280] sm:$0xff]  ;;  %v286_v12 = vadd.f32 %v285_v59, %v284_v1  ;;  %v477_v21 = vadd.f32 %v476_v8, %v202_v4  ;;  %v205_v40 = vld [vmem:[%s9600_s0 + $0x518] sm:$0xff]  ;;  %v519_v54 = vsel %vm271_vm0, %v253_v35, 0.0 }
  0x23   :  { %v797_v9 = vld [vmem:[%s9601_s1 + $0x288] sm:$0xff]  ;;  %v493_v13 = vsel %vm271_vm0, %v251_v58, 0.0  ;;  %v218_v14 = vld [vmem:[%s9600_s0 + $0x580] sm:$0xff]  ;;  %6175 = vmatpush3.bf16.msra.mxu1 %v6174_v52  ;;  %v492_v19 = vadd.f32 %v491_v6, %v235_v53  ;;  %v273_v45 = vadd.f32 %v272_v27, %v270_v32  ;;  %v44_v49 = vld [vmem:[%s9600_s0 + $0x10] sm:$0xff]  ;;  %v309_v53 = vadd.f32 %v308_v41, %v109_v34 }
  0x24   :  { %v250_v15 = vld [vmem:[%s9600_s0 + $0x680] sm:$0x1]  ;;  %v6176_v16 = vpack.c.bf16 %v797_v9, %v796_v5  ;;  %v287_v25 = vrot.slane %v286_v12, 4  ;;  %v478_v33 = vadd.f32 %v477_v21, %v218_v14  ;;  %v829_v48 = vld [vmem:[%s9601_s1 + $0x388] sm:$0xff]  ;;  %v60_v50 = vld [vmem:[%s9600_s0 + $0x90] sm:$0xff]  ;;  %v516_v59 = vadd.f32 %v515_v47, %v205_v40 }
  0x25   :  { %v234_v26 = vld [vmem:[%s9600_s0 + $0x600] sm:$0xff]  ;;  %v494_v31 = vadd.f32 %v493_v13, %v492_v19  ;;  %v480_v38 = vsel %vm271_vm0, %v250_v15, 0.0  ;;  %v221_v52 = vld [vmem:[%s9600_s0 + $0x598] sm:$0xff]  ;;  %v274_v57 = vrot.slane %v273_v45, 4  ;;  %v76_v60 = vld [vmem:[%s9600_s0 + $0x110] sm:$0xff]  ;;  %v310_v1 = vadd.f32 %v309_v53, %v125_v39 }
  0x26   :  { %6177 = vmatprep.subr.bf16.mxu0 %v6176_v16  ;;  %v288_v37 = vadd.f32 %v287_v25, %v286_v12  ;;  %v828_v43 = vld [vmem:[%s9601_s1 + $0x380] sm:$0xff]  ;;  %v479_v46 = vadd.f32 %v478_v33, %v234_v26  ;;  %v140_v61 = vld [vmem:[%s9600_s0 + $0x310] sm:$0x1]  ;;  %v237_v0 = vld [vmem:[%s9600_s0 + $0x618] sm:$0xff]  ;;  %v293_v3 = vadd.f32 %v60_v50, %v44_v49  ;;  %v517_v8 = vadd.f32 %v516_v59, %v221_v52 }
  0x27   :  { %v495_v44 = vrot.slane %v494_v31, 4  ;;  %v6208_v55 = vpack.c.bf16 %v829_v48, %v828_v43  ;;  %v156_v62 = vld [vmem:[%s9600_s0 + $0x390] sm:$0xff]  ;;  %v298_v4 = vsel %vm271_vm0, %v140_v61, 0.0  ;;  %v275_v6 = vadd.f32 %v274_v57, %v273_v45  ;;  %v780_v50 = vld [vmem:[%s9601_s1 + $0x200] sm:$0xff]  ;;  %v799_v59 = vld [vmem:[%s9601_s1 + $0x298] sm:$0xff] }
  0x28   :  { %v289_v51 = vrot.slane %v288_v37, 2  ;;  %v481_v58 = vadd.f32 %v480_v38, %v479_v46  ;;  %v172_v2 = vld [vmem:[%s9600_s0 + $0x410] sm:$0xff]  ;;  %v312_v12 = vadd.f32 %v311_v42, %v310_v1  ;;  %v294_v13 = vadd.f32 %v293_v3, %v76_v60 }
  0x29   :  { %v496_v56 = vadd.f32 %v495_v44, %v494_v31  ;;  %6209 = vmatprep.subr.bf16.mxu1 %v6208_v55  ;;  %v92_v9 = vld [vmem:[%s9600_s0 + $0x190] sm:$0xff]  ;;  %v501_v14 = vadd.f32 %v172_v2, %v156_v62  ;;  %v276_v16 = vrot.slane %v275_v6, 2  ;;  %v518_v18 = vadd.f32 %v517_v8, %v237_v0 }
  0x2a   :  { %v290_v63 = vadd.f32 %v289_v51, %v288_v37  ;;  %v482_v7 = vrot.slane %v481_v58, 4  ;;  %v188_v10 = vld [vmem:[%s9600_s0 + $0x490] sm:$0xff]  ;;  %v313_v22 = vrot.slane %v312_v12, 4  ;;  %v295_v23 = vadd.f32 %v294_v13, %v92_v9  ;;  %v781_v51 = vld [vmem:[%s9601_s1 + $0x208] sm:$0xff] }
  0x2b   :  { %v497_v5 = vrot.slane %v496_v56, 2  ;;  %v108_v19 = vld [vmem:[%s9600_s0 + $0x210] sm:$0xff]  ;;  %v502_v24 = vadd.f32 %v501_v14, %v188_v10  ;;  %v277_v26 = vadd.f32 %v276_v16, %v275_v6  ;;  %v520_v28 = vadd.f32 %v519_v54, %v518_v18  ;;  %v800_v10 = vld [vmem:[%s9601_s1 + $0x2a0] sm:$0xff] }
  0x2c   :  { %v291_v11 = vrot.slane %v290_v63, 1  ;;  %v483_v17 = vadd.f32 %v482_v7, %v481_v58  ;;  %v204_v20 = vld [vmem:[%s9600_s0 + $0x510] sm:$0xff]  ;;  %v314_v33 = vadd.f32 %v313_v22, %v312_v12  ;;  %v296_v34 = vadd.f32 %v295_v23, %v108_v19  ;;  %v783_v7 = vld [vmem:[%s9601_s1 + $0x218] sm:$0xff]  ;;  %v7300_v14 = vld [vmem:[%s9601_s1 + $0x300] sm:$0xff] }
  0x2d   :  { %v498_v15 = vadd.f32 %v497_v5, %v496_v56  ;;  %v124_v29 = vld [vmem:[%s9600_s0 + $0x290] sm:$0xff]  ;;  %v503_v35 = vadd.f32 %v502_v24, %v204_v20  ;;  %v278_v37 = vrot.slane %v277_v26, 1  ;;  %v521_v39 = vrot.slane %v520_v28, 4  ;;  %v7315_v20 = vld [vmem:[%s9601_s1 + $0x398] sm:$0xff]  ;;  %v7325_v22 = vld [vmem:[%s9601_s1 + $0x228] sm:$0xff] }
  0x2e   :  { %v292_v21 = vadd.f32 %v291_v11, %v290_v63  ;;  %v484_v27 = vrot.slane %v483_v17, 2  ;;  %v220_v30 = vld [vmem:[%s9600_s0 + $0x590] sm:$0xff]  ;;  %v315_v41 = vrot.slane %v314_v33, 2  ;;  %v297_v42 = vadd.f32 %v296_v34, %v124_v29  ;;  %v801_v11 = vld [vmem:[%s9601_s1 + $0x2a8] sm:$0xff]  ;;  %v7345_v29 = vld [vmem:[%s9601_s1 + $0x3a0] sm:$0xff] }
  0x2f   :  { %v499_v25 = vrot.slane %v498_v15, 1  ;;  %v252_v31 = vld [vmem:[%s9600_s0 + $0x690] sm:$0x1]  ;;  %v504_v43 = vadd.f32 %v503_v35, %v220_v30  ;;  %v279_v46 = vadd.f32 %v278_v37, %v277_v26  ;;  %v522_v48 = vadd.f32 %v521_v39, %v520_v28  ;;  %v7350_v30 = vld [vmem:[%s9601_s1 + $0x3a8] sm:$0xff]  ;;  %v7375_v35 = vld [vmem:[%s9601_s1 + $0x238] sm:$0xff] }
  0x30   :  { %v685_v32 = vmul.f32 0.020408163, %v292_v21  ;;  %v485_v38 = vadd.f32 %v484_v27, %v483_v17  ;;  %v236_v40 = vld [vmem:[%s9600_s0 + $0x610] sm:$0xff]  ;;  %v506_v44 = vsel %vm271_vm0, %v252_v31, 0.0  ;;  %v316_v49 = vadd.f32 %v315_v41, %v314_v33  ;;  %v7320_v21 = vld [vmem:[%s9601_s1 + $0x220] sm:$0xff]  ;;  %v7340_v27 = vld [vmem:[%s9601_s1 + $0x318] sm:$0xff] }
  0x31   :  { %v500_v36 = vadd.f32 %v499_v25, %v498_v15  ;;  %v299_v52 = vadd.f32 %v298_v4, %v297_v42  ;;  %v505_v53 = vadd.f32 %v504_v43, %v236_v40  ;;  %v684_v56 = vmul.f32 0.020408163, %v279_v46  ;;  %v798_v58 = vld [vmem:[%s9601_s1 + $0x290] sm:$0xff]  ;;  %v7305_v15 = vld [vmem:[%s9601_s1 + $0x308] sm:$0xff]  ;;  %v7355_v31 = vld [vmem:[%s9601_s1 + $0x320] sm:$0xff] }
  0x32   :  { %v486_v47 = vrot.slane %v485_v38, 1  ;;  %v523_v57 = vrot.slane %v522_v48, 2  ;;  %v317_v60 = vrot.slane %v316_v49, 1  ;;  %v6178_v1 = vpack.c.bf16 %v781_v51, %v780_v50  ;;  %v782_v6 = vld [vmem:[%s9601_s1 + $0x210] sm:$0xff]  ;;  %v7365_v33 = vld [vmem:[%s9601_s1 + $0x2b8] sm:$0xff]  ;;  %v7400_v43 = vld [vmem:[%s9601_s1 + $0x2c0] sm:$0xff] }
  0x33   :  { %v701_v45 = vmul.f32 0.020408163, %v500_v36  ;;  %v300_v61 = vrot.slane %v299_v52, 4  ;;  %v507_v62 = vadd.f32 %v506_v44, %v505_v53  ;;  %v6180_v5 = vpack.c.bf16 %v799_v59, %v798_v58  ;;  %v7310_v19 = vld [vmem:[%s9601_s1 + $0x390] sm:$0xff]  ;;  %v7395_v40 = vld [vmem:[%s9601_s1 + $0x338] sm:$0xff]  ;;  %v7405_v44 = vld [vmem:[%s9601_s1 + $0x2c8] sm:$0xff] }
  0x34   :  { %v487_v55 = vadd.f32 %v486_v47, %v485_v38  ;;  %v524_v0 = vadd.f32 %v523_v57, %v522_v48  ;;  %v318_v2 = vadd.f32 %v317_v60, %v316_v49  ;;  %v6182_v18 = vpack.c.bf16 %v783_v7, %v782_v6  ;;  %v7330_v23 = vld [vmem:[%s9601_s1 + $0x2b0] sm:$0xff]  ;;  %v7385_v38 = vld [vmem:[%s9601_s1 + $0x3b8] sm:$0xff]  ;;  %v7415_v46 = vld [vmem:[%s9601_s1 + $0x248] sm:$0xff] }
  0x35   :  { %v1013_v54 = vsel %vm1011_vm1, %v701_v45, %v685_v32  ;;  %v301_v3 = vadd.f32 %v300_v61, %v299_v52  ;;  %v508_v4 = vrot.slane %v507_v62, 4  ;;  %v7335_v26 = vld [vmem:[%s9601_s1 + $0x310] sm:$0xff]  ;;  %v6184_v28 = vpack.c.bf16 %v801_v11, %v800_v10  ;;  %v7360_v32 = vld [vmem:[%s9601_s1 + $0x328] sm:$0xff]  ;;  %v7410_v45 = vld [vmem:[%s9601_s1 + $0x240] sm:$0xff] }
  0x36   :  { %1108 = vmatprep.mubr.f32.mxu0 %v1013_v54  ;;  %v700_v63 = vmul.f32 0.020408163, %v487_v55  ;;  %v525_v9 = vrot.slane %v524_v0, 1  ;;  %v687_v17 = vmul.f32 0.020408163, %v318_v2  ;;  %v7370_v34 = vld [vmem:[%s9601_s1 + $0x230] sm:$0xff]  ;;  %v6210_v48 = vpack.c.bf16 %v7305_v15, %v7300_v14 }
  0x37   :  { %v302_v12 = vrot.slane %v301_v3, 2  ;;  %v509_v13 = vadd.f32 %v508_v4, %v507_v62  ;;  %v7380_v37 = vld [vmem:[%s9601_s1 + $0x3b0] sm:$0xff]  ;;  %v6186_v49 = vpack.c.bf16 %v7325_v22, %v7320_v21  ;;  %v7425_v50 = vld [vmem:[%s9601_s1 + $0x3c0] sm:$0xff]  ;;  %v7430_v51 = vld [vmem:[%s9601_s1 + $0x3c8] sm:$0xff]  ;;  %v6212_v58 = vpack.c.bf16 %v7315_v20, %v7310_v19 }
  0x38   :  { %v1012_v8 = vsel %vm1011_vm1, %v700_v63, %v684_v56  ;;  %v526_v16 = vadd.f32 %v525_v9, %v524_v0  ;;  %v7390_v39 = vld [vmem:[%s9601_s1 + $0x330] sm:$0xff]  ;;  %v7435_v52 = vld [vmem:[%s9601_s1 + $0x340] sm:$0xff]  ;;  %v7440_v53 = vld [vmem:[%s9601_s1 + $0x348] sm:$0xff]  ;;  %v6188_v59 = vpack.c.bf16 %v7365_v33, %v7330_v23  ;;  %v6192_v22 = vpack.c.bf16 %v7405_v44, %v7400_v43 }
  0x39   :  { %1109 = vmatmul.mubr.f32.vlgmr.msra.gmra.mrb[0].mxu0 %v1012_v8  ;;  %v303_v24 = vadd.f32 %v302_v12, %v301_v3  ;;  %v510_v25 = vrot.slane %v509_v13, 2  ;;  %v7445_v54 = vld [vmem:[%s9601_s1 + $0x2d0] sm:$0xff]  ;;  %v7450_v55 = vld [vmem:[%s9601_s1 + $0x2d8] sm:$0xff]  ;;  %v47_v62 = vld [vmem:[%s9600_s0 + $0x28] sm:$0xff]  ;;  %v6190_v3 = vpack.c.bf16 %v7375_v35, %v7370_v34  ;;  %v6194_v23 = vpack.c.bf16 %v7415_v46, %v7410_v45 }
  0x3a   :  { %6179 = vmatpush3.bf16.msra.mxu0 %v6178_v1  ;;  %v703_v36 = vmul.f32 0.020408163, %v526_v16  ;;  %v7459_v60 = vld [vmem:[%s9601_s1 + $0x250] sm:$0xff]  ;;  %v7464_v61 = vld [vmem:[%s9601_s1 + $0x258] sm:$0xff]  ;;  %v63_v63 = vld [vmem:[%s9600_s0 + $0xa8] sm:$0xff]  ;;  %v9615_v46 = vpack.c.bf16 %v7340_v27, %v7335_v26 }
  0x3b   :  { %6181 = vmatprep.subr.bf16.mxu0 %v6180_v5  ;;  %v304_v41 = vrot.slane %v303_v24, 1  ;;  %v511_v42 = vadd.f32 %v510_v25, %v509_v13  ;;  %v7483_v4 = vld [vmem:[%s9601_s1 + $0x3d0] sm:$0xff]  ;;  %v7488_v5 = vld [vmem:[%s9601_s1 + $0x3d8] sm:$0xff]  ;;  %v7503_v8 = vld [vmem:[%s9601_s1 + $0x2e0] sm:$0xff] }
  0x3c   :  { %v1015_v47 = vsel %vm1011_vm1, %v703_v36, %v687_v17  ;;  %v7493_v6 = vld [vmem:[%s9601_s1 + $0x350] sm:$0xff]  ;;  %v7498_v7 = vld [vmem:[%s9601_s1 + $0x358] sm:$0xff]  ;;  %v7508_v9 = vld [vmem:[%s9601_s1 + $0x2e8] sm:$0xff]  ;;  %v332_v36 = vadd.f32 %v63_v63, %v47_v62 }
  0x3d   :  { %1178 = vmatprep.mubr.f32.mxu1 %v1015_v47  ;;  %v305_v56 = vadd.f32 %v304_v41, %v303_v24  ;;  %v512_v57 = vrot.slane %v511_v42, 1  ;;  %v159_v10 = vld [vmem:[%s9600_s0 + $0x3a8] sm:$0xff]  ;;  %v7533_v24 = vld [vmem:[%s9601_s1 + $0x260] sm:$0xff]  ;;  %v7599_v1 = vld [vmem:[%s9601_s1 + $0x2f0] sm:$0xff] }
  0x3e   :  { %6183 = vmatpush3.bf16.msra.mxu0 %v6182_v18  ;;  %v79_v17 = vld [vmem:[%s9600_s0 + $0x128] sm:$0xff]  ;;  %v190_v13 = vld [vmem:[%s9600_s0 + $0x4a0] sm:$0xff]  ;;  %v161_v45 = vld [vmem:[%s9600_s0 + $0x3b8] sm:$0xff] }
  0x3f   :  { %6185 = vmatprep.subr.bf16.mxu0 %v6184_v28  ;;  %v513_v11 = vadd.f32 %v512_v57, %v511_v42  ;;  %v686_v12 = vmul.f32 0.020408163, %v305_v56  ;;  %v175_v18 = vld [vmem:[%s9600_s0 + $0x428] sm:$0xff]  ;;  %v7543_v28 = vld [vmem:[%s9601_s1 + $0x3e0] sm:$0xff]  ;;  %v177_v26 = vld [vmem:[%s9600_s0 + $0x438] sm:$0xff] }
  0x40   :  { %v191_v21 = vld [vmem:[%s9600_s0 + $0x4a8] sm:$0xff]  ;;  %v540_v41 = vadd.f32 %v175_v18, %v159_v10  ;;  %v46_v56 = vld [vmem:[%s9600_s0 + $0x20] sm:$0xff]  ;;  %v333_v18 = vadd.f32 %v332_v36, %v79_v17  ;;  %v7604_v17 = vld [vmem:[%s9601_s1 + $0x2f8] sm:$0xff] }
  0x41   :  { %v7538_v25 = vld [vmem:[%s9601_s1 + $0x268] sm:$0xff]  ;;  %v702_v42 = vmul.f32 0.020408163, %v513_v11  ;;  %v62_v57 = vld [vmem:[%s9600_s0 + $0xa0] sm:$0xff]  ;;  %v193_v27 = vld [vmem:[%s9600_s0 + $0x4b8] sm:$0xff] }
  0x42   :  { %6187 = vmatpush3.bf16.msra.mxu0 %v6186_v49  ;;  %v7548_v33 = vld [vmem:[%s9601_s1 + $0x3e8] sm:$0xff]  ;;  %v7565_v49 = vld [vmem:[%s9601_s1 + $0x360] sm:$0xff]  ;;  %v541_v44 = vadd.f32 %v540_v41, %v191_v21  ;;  %v319_v43 = vadd.f32 %v62_v57, %v46_v56  ;;  %v7626_v56 = vld [vmem:[%s9601_s1 + $0x278] sm:$0xff]  ;;  %v6202_v47 = vpack.c.bf16 %v7538_v25, %v7533_v24  ;;  %v9622_v24 = vpack.c.bf16 %v7395_v40, %v7390_v39 }
  0x43   :  { %v95_v34 = vld [vmem:[%s9600_s0 + $0x1a8] sm:$0xff]  ;;  %6189 = vmatprep.subr.bf16.mxu0 %v6188_v59  ;;  %v78_v59 = vld [vmem:[%s9600_s0 + $0x120] sm:$0xff]  ;;  %v1014_v16 = vsel %vm1011_vm1, %v702_v42, %v686_v12  ;;  %v7621_v42 = vld [vmem:[%s9601_s1 + $0x270] sm:$0xff]  ;;  %v6232_v0 = vpack.c.bf16 %v7548_v33, %v7543_v28 }
  0x44   :  { %v207_v35 = vld [vmem:[%s9600_s0 + $0x528] sm:$0xff]  ;;  %v94_v21 = vld [vmem:[%s9600_s0 + $0x1a0] sm:$0xff]  ;;  %1179 = vmatmul.mubr.f32.vlgmr.msra.gmra.mrb[0].mxu1 %v1014_v16  ;;  %v334_v16 = vadd.f32 %v333_v18, %v95_v34  ;;  %v320_v62 = vadd.f32 %v319_v43, %v78_v59  ;;  %v7666_v43 = vld [vmem:[%s9601_s1 + $0x3f8] sm:$0xff] }
  0x45   :  { %v7581_v63 = vld [vmem:[%s9601_s1 + $0x368] sm:$0xff]  ;;  %v158_v36 = vld [vmem:[%s9600_s0 + $0x3a0] sm:$0xff]  ;;  %6211 = vmatpush3.bf16.msra.mxu1 %v6210_v48  ;;  %v65_v18 = vld [vmem:[%s9600_s0 + $0xb8] sm:$0xff] }
  0x46   :  { %v111_v10 = vld [vmem:[%s9600_s0 + $0x228] sm:$0xff]  ;;  %v174_v41 = vld [vmem:[%s9600_s0 + $0x420] sm:$0xff]  ;;  %6191 = vmatpush3.bf16.msra.mxu0 %v6190_v3  ;;  %v542_v3 = vadd.f32 %v541_v44, %v207_v35  ;;  %6213 = vmatprep.subr.bf16.mxu1 %v6212_v58  ;;  %v321_v20 = vadd.f32 %v320_v62, %v94_v21  ;;  %v49_v58 = vld [vmem:[%s9600_s0 + $0x38] sm:$0xff] }
  0x47   :  { %v223_v11 = vld [vmem:[%s9600_s0 + $0x5a8] sm:$0xff]  ;;  %6193 = vmatprep.subr.bf16.mxu0 %v6192_v22  ;;  %v110_v35 = vld [vmem:[%s9600_s0 + $0x220] sm:$0xff]  ;;  %v527_v15 = vadd.f32 %v174_v41, %v158_v36  ;;  %v7661_v22 = vld [vmem:[%s9601_s1 + $0x3f0] sm:$0xff]  ;;  %v335_v44 = vadd.f32 %v334_v16, %v111_v10  ;;  %v358_v16 = vadd.f32 %v65_v18, %v49_v58 }
  0x48   :  { %v127_v12 = vld [vmem:[%s9600_s0 + $0x2a8] sm:$0xff]  ;;  %v142_v14 = vld [vmem:[%s9600_s0 + $0x320] sm:$0x1]  ;;  %v543_v59 = vadd.f32 %v542_v3, %v223_v11  ;;  %v81_v21 = vld [vmem:[%s9600_s0 + $0x138] sm:$0xff] }
  0x49   :  { %v143_v57 = vld [vmem:[%s9600_s0 + $0x328] sm:$0x1]  ;;  %v206_v19 = vld [vmem:[%s9600_s0 + $0x520] sm:$0xff]  ;;  %v528_v11 = vadd.f32 %v527_v15, %v190_v13  ;;  %v322_v15 = vadd.f32 %v321_v20, %v110_v35  ;;  %v97_v58 = vld [vmem:[%s9600_s0 + $0x1b8] sm:$0xff]  ;;  %6215 = vmatpush3.bf16.msra.mxu1 %v9615_v46 }
  0x4a   :  { %v255_v2 = vld [vmem:[%s9600_s0 + $0x6a8] sm:$0x1]  ;;  %v337_v36 = vsel %vm271_vm0, %v143_v57, 0.0  ;;  %v126_v10 = vld [vmem:[%s9600_s0 + $0x2a0] sm:$0xff]  ;;  %6195 = vmatpush3.bf16.msra.mxu0 %v6194_v23  ;;  %v336_v57 = vadd.f32 %v335_v44, %v127_v12  ;;  %v9616_v23 = vpack.c.bf16 %v7450_v55, %v7445_v54  ;;  %v6206_v12 = vpack.c.bf16 %v7626_v56, %v7621_v42  ;;  %v113_v18 = vld [vmem:[%s9600_s0 + $0x238] sm:$0xff] }
  0x4b   :  { %v239_v34 = vld [vmem:[%s9600_s0 + $0x628] sm:$0xff]  ;;  %v545_v41 = vsel %vm271_vm0, %v255_v2, 0.0  ;;  %v222_v62 = vld [vmem:[%s9600_s0 + $0x5a0] sm:$0xff]  ;;  %v6204_v2 = vpack.c.bf16 %v7604_v17, %v7599_v1  ;;  %v529_v35 = vadd.f32 %v528_v11, %v206_v19  ;;  %v359_v54 = vadd.f32 %v358_v16, %v81_v21  ;;  %v145_v11 = vld [vmem:[%s9600_s0 + $0x338] sm:$0x1] }
  0x4c   :  { %v544_v3 = vadd.f32 %v543_v59, %v239_v34  ;;  %v238_v48 = vld [vmem:[%s9600_s0 + $0x620] sm:$0xff]  ;;  %6197 = vmatprep.subr.bf16.mxu0 %v9616_v23  ;;  %v324_v34 = vsel %vm271_vm0, %v142_v14, 0.0  ;;  %v9617_v55 = vpack.c.bf16 %v7350_v30, %v7345_v29  ;;  %v338_v14 = vadd.f32 %v337_v36, %v336_v57  ;;  %v7731_v20 = vld [vmem:[%s9601_s1 + $0x488] sm:$0xff]  ;;  %v48_v46 = vld [vmem:[%s9600_s0 + $0x30] sm:$0xff] }
  0x4d   :  { %v254_v13 = vld [vmem:[%s9600_s0 + $0x6a0] sm:$0x1]  ;;  %v323_v19 = vadd.f32 %v322_v15, %v126_v10  ;;  %v566_v21 = vadd.f32 %v177_v26, %v161_v45  ;;  %v6236_v29 = vpack.c.bf16 %v7666_v43, %v7661_v22  ;;  %v530_v30 = vadd.f32 %v529_v35, %v222_v62  ;;  %v209_v10 = vld [vmem:[%s9600_s0 + $0x538] sm:$0xff]  ;;  %v112_v39 = vld [vmem:[%s9600_s0 + $0x230] sm:$0xff] }
  0x4e   :  { %v7717_v44 = vld [vmem:[%s9601_s1 + $0x480] sm:$0xff]  ;;  %6217 = vmatprep.subr.bf16.mxu1 %v9617_v55  ;;  %v546_v59 = vadd.f32 %v545_v41, %v544_v3  ;;  %v532_v36 = vsel %vm271_vm0, %v254_v13, 0.0  ;;  %v129_v41 = vld [vmem:[%s9600_s0 + $0x2b8] sm:$0xff]  ;;  %v360_v16 = vadd.f32 %v359_v54, %v97_v58  ;;  %v9618_v57 = vpack.c.bf16 %v7464_v61, %v7459_v60  ;;  %v64_v58 = vld [vmem:[%s9600_s0 + $0xb0] sm:$0xff] }
  0x4f   :  { %v339_v3 = vrot.slane %v338_v14, 4  ;;  %v325_v45 = vadd.f32 %v324_v34, %v323_v19  ;;  %v257_v62 = vld [vmem:[%s9600_s0 + $0x6b8] sm:$0x1]  ;;  %v567_v13 = vadd.f32 %v566_v21, %v193_v27  ;;  %v9619_v60 = vpack.c.bf16 %v7360_v32, %v7355_v31  ;;  %v96_v21 = vld [vmem:[%s9600_s0 + $0x1b0] sm:$0xff]  ;;  %v864_v22 = vld [vmem:[%s9601_s1 + $0x4a0] sm:$0xff] }
  0x50   :  { %6199 = vmatpush3.bf16.msra.mxu0 %v9618_v57  ;;  %v547_v15 = vrot.slane %v546_v59, 4  ;;  %v9620_v61 = vpack.c.bf16 %v7508_v9, %v7503_v8  ;;  %v531_v23 = vadd.f32 %v530_v30, %v238_v48  ;;  %v6240_v34 = vpack.c.bf16 %v7731_v20, %v7717_v44  ;;  %v225_v35 = vld [vmem:[%s9600_s0 + $0x5b8] sm:$0xff]  ;;  %v80_v9 = vld [vmem:[%s9600_s0 + $0x130] sm:$0xff]  ;;  %v865_v43 = vld [vmem:[%s9601_s1 + $0x4a8] sm:$0xff] }
  0x51   :  { %6219 = vmatpush3.bf16.msra.mxu1 %v9619_v60  ;;  %v361_v26 = vadd.f32 %v360_v16, %v113_v18  ;;  %v363_v27 = vsel %vm271_vm0, %v145_v11, 0.0  ;;  %v9621_v54 = vpack.c.bf16 %v7385_v38, %v7380_v37  ;;  %v340_v31 = vadd.f32 %v339_v3, %v338_v14  ;;  %v144_v48 = vld [vmem:[%s9600_s0 + $0x330] sm:$0x1]  ;;  %v241_v19 = vld [vmem:[%s9600_s0 + $0x638] sm:$0xff] }
  0x52   :  { %6201 = vmatprep.subr.bf16.mxu0 %v9620_v61  ;;  %v548_v32 = vadd.f32 %v547_v15, %v546_v59  ;;  %v326_v55 = vrot.slane %v325_v45, 4  ;;  %v568_v8 = vadd.f32 %v567_v13, %v209_v10  ;;  %v533_v44 = vadd.f32 %v532_v36, %v531_v23  ;;  %v160_v30 = vld [vmem:[%s9600_s0 + $0x3b0] sm:$0xff]  ;;  %v863_v33 = vld [vmem:[%s9601_s1 + $0x498] sm:$0xff] }
  0x53   :  { %6221 = vmatprep.subr.bf16.mxu1 %v9621_v54  ;;  %v362_v20 = vadd.f32 %v361_v26, %v129_v41  ;;  %v571_v37 = vsel %vm271_vm0, %v257_v62, 0.0  ;;  %v345_v38 = vadd.f32 %v64_v58, %v48_v46  ;;  %v341_v14 = vrot.slane %v340_v31, 2  ;;  %v176_v36 = vld [vmem:[%s9600_s0 + $0x430] sm:$0xff] }
  0x54   :  { %6203 = vmatpush3.bf16.msra.mxu0 %v6202_v47  ;;  %v549_v59 = vrot.slane %v548_v32, 2  ;;  %v327_v18 = vadd.f32 %v326_v55, %v325_v45  ;;  %v569_v11 = vadd.f32 %v568_v8, %v225_v35  ;;  %v534_v25 = vrot.slane %v533_v44, 4  ;;  %v192_v40 = vld [vmem:[%s9600_s0 + $0x4b0] sm:$0xff] }
  0x55   :  { %6223 = vmatpush3.bf16.msra.mxu1 %v9622_v24  ;;  %6205 = vmatprep.subr.bf16.mxu0 %v6204_v2  ;;  %v364_v47 = vadd.f32 %v363_v27, %v362_v20  ;;  %v346_v41 = vadd.f32 %v345_v38, %v80_v9  ;;  %v350_v10 = vsel %vm271_vm0, %v144_v48, 0.0  ;;  %v9623_v16 = vpack.c.bf16 %v7430_v51, %v7425_v50  ;;  %v128_v58 = vld [vmem:[%s9600_s0 + $0x2b0] sm:$0xff] }
  0x56   :  { %v342_v57 = vadd.f32 %v341_v14, %v340_v31  ;;  %v550_v3 = vadd.f32 %v549_v59, %v548_v32  ;;  %v328_v15 = vrot.slane %v327_v18, 2  ;;  %v570_v45 = vadd.f32 %v569_v11, %v241_v19  ;;  %v208_v60 = vld [vmem:[%s9600_s0 + $0x530] sm:$0xff]  ;;  %v844_v59 = vld [vmem:[%s9601_s1 + $0x400] sm:$0xff] }
  0x57   :  { %6225 = vmatprep.subr.bf16.mxu1 %v9623_v16  ;;  %v535_v1 = vadd.f32 %v534_v25, %v533_v44  ;;  %v365_v17 = vrot.slane %v364_v47, 4  ;;  %v347_v2 = vadd.f32 %v346_v41, %v96_v21  ;;  %v553_v62 = vadd.f32 %v176_v36, %v160_v30  ;;  %v224_v32 = vld [vmem:[%s9600_s0 + $0x5b0] sm:$0xff]  ;;  %v892_v36 = vld [vmem:[%s9601_s1 + $0x580] sm:$0xff]  ;;  %v893_v41 = vld [vmem:[%s9601_s1 + $0x588] sm:$0xff] }
  0x58   :  { %6207 = vmatpush3.bf16.msra.mxu0 %v6206_v12  ;;  %v343_v50 = vrot.slane %v342_v57, 1  ;;  %v551_v51 = vrot.slane %v550_v3, 1  ;;  %v329_v13 = vadd.f32 %v328_v15, %v327_v18  ;;  %v572_v46 = vadd.f32 %v571_v37, %v570_v45  ;;  %v240_v19 = vld [vmem:[%s9600_s0 + $0x630] sm:$0xff]  ;;  %v827_v37 = vld [vmem:[%s9601_s1 + $0x378] sm:$0xff]  ;;  %v845_v18 = vld [vmem:[%s9601_s1 + $0x408] sm:$0xff] }
  0x59   :  { %v9624_v61 = vpack.c.bf16 %v7440_v53, %v7435_v52  ;;  %v536_v23 = vrot.slane %v535_v1, 2  ;;  %6241 = vmatprep.subr.bf16.mxu0 %v6240_v34  ;;  %v366_v42 = vadd.f32 %v365_v17, %v364_v47  ;;  %v348_v56 = vadd.f32 %v347_v2, %v112_v39  ;;  %v256_v53 = vld [vmem:[%s9600_s0 + $0x6b0] sm:$0x1] }
  0x5a   :  { %v554_v12 = vadd.f32 %v553_v62, %v192_v40  ;;  %v9625_v35 = vpack.c.bf16 %v7488_v5, %v7483_v4  ;;  %v344_v26 = vadd.f32 %v343_v50, %v342_v57  ;;  %v552_v27 = vadd.f32 %v551_v51, %v550_v3  ;;  %v826_v4 = vld [vmem:[%s9601_s1 + $0x370] sm:$0xff] }
  0x5b   :  { %6227 = vmatpush3.bf16.msra.mxu1 %v9624_v61  ;;  %v330_v54 = vrot.slane %v329_v13, 1  ;;  %v573_v31 = vrot.slane %v572_v46, 4  ;;  %v537_v55 = vadd.f32 %v536_v23, %v535_v1  ;;  %v367_v52 = vrot.slane %v366_v42, 2  ;;  %v846_v50 = vld [vmem:[%s9601_s1 + $0x410] sm:$0xff]  ;;  %v7891_v61 = vld [vmem:[%s9601_s1 + $0x500] sm:$0xff]  ;;  %v7896_v23 = vld [vmem:[%s9601_s1 + $0x508] sm:$0xff] }
  0x5c   :  { %6229 = vmatprep.subr.bf16.mxu1 %v9625_v35  ;;  %v349_v34 = vadd.f32 %v348_v56, %v128_v58  ;;  %v555_v8 = vadd.f32 %v554_v12, %v208_v60  ;;  %v689_v5 = vmul.f32 0.020408163, %v344_v26  ;;  %v705_v9 = vmul.f32 0.020408163, %v552_v27  ;;  %v7901_v56 = vld [vmem:[%s9601_s1 + $0x420] sm:$0xff]  ;;  %v7906_v12 = vld [vmem:[%s9601_s1 + $0x428] sm:$0xff] }
  0x5d   :  { %v331_v48 = vadd.f32 %v330_v54, %v329_v13  ;;  %v574_v44 = vadd.f32 %v573_v31, %v572_v46  ;;  %v9626_v20 = vpack.c.bf16 %v7498_v7, %v7493_v6  ;;  %v538_v38 = vrot.slane %v537_v55, 1  ;;  %v7911_v26 = vld [vmem:[%s9601_s1 + $0x590] sm:$0xff]  ;;  %v7916_v27 = vld [vmem:[%s9601_s1 + $0x598] sm:$0xff] }
  0x5e   :  { %v368_v14 = vadd.f32 %v367_v52, %v366_v42  ;;  %v351_v11 = vadd.f32 %v350_v10, %v349_v34  ;;  %v556_v21 = vadd.f32 %v555_v8, %v224_v32  ;;  %v1017_v6 = vsel %vm1011_vm1, %v705_v9, %v689_v5  ;;  %v7921_v54 = vld [vmem:[%s9601_s1 + $0x510] sm:$0xff]  ;;  %v7926_v31 = vld [vmem:[%s9601_s1 + $0x518] sm:$0xff]  ;;  %v7936_v52 = vld [vmem:[%s9601_s1 + $0x5a8] sm:$0xff] }
  0x5f   :  { %6231 = vmatpush3.bf16.msra.mxu1 %v9626_v20  ;;  %v688_v7 = vmul.f32 0.020408163, %v331_v48  ;;  %v575_v30 = vrot.slane %v574_v44, 2  ;;  %v558_v24 = vsel %vm271_vm0, %v256_v53, 0.0  ;;  %1248 = vmatprep.mubr.f32.mxu0 %v1017_v6  ;;  %v539_v25 = vadd.f32 %v538_v38, %v537_v55  ;;  %v7931_v55 = vld [vmem:[%s9601_s1 + $0x5a0] sm:$0xff]  ;;  %v866_v53 = vld [vmem:[%s9601_s1 + $0x4b0] sm:$0xff] }
  0x60   :  { %6233 = vmatprep.subr.bf16.mxu1 %v6232_v0  ;;  %v369_v47 = vrot.slane %v368_v14, 1  ;;  %v352_v10 = vrot.slane %v351_v11, 4  ;;  %v557_v28 = vadd.f32 %v556_v21, %v240_v19  ;;  %v862_v0 = vld [vmem:[%s9601_s1 + $0x490] sm:$0xff]  ;;  %v6238_v16 = vpack.c.bf16 %v827_v37, %v826_v4  ;;  %v867_v34 = vld [vmem:[%s9601_s1 + $0x4b8] sm:$0xff]  ;;  %v7947_v5 = vld [vmem:[%s9601_s1 + $0x520] sm:$0xff] }
  0x61   :  { %v576_v57 = vadd.f32 %v575_v30, %v574_v44  ;;  %v6242_v3 = vpack.c.bf16 %v845_v18, %v844_v59  ;;  %v9627_v15 = vpack.c.bf16 %v7581_v63, %v7565_v49  ;;  %v704_v45 = vmul.f32 0.020408163, %v539_v25  ;;  %v847_v49 = vld [vmem:[%s9601_s1 + $0x418] sm:$0xff]  ;;  %v7952_v9 = vld [vmem:[%s9601_s1 + $0x528] sm:$0xff]  ;;  %v7957_v48 = vld [vmem:[%s9601_s1 + $0x430] sm:$0xff] }
  0x62   :  { %v370_v39 = vadd.f32 %v369_v47, %v368_v14  ;;  %v353_v40 = vadd.f32 %v352_v10, %v351_v11  ;;  %v559_v1 = vadd.f32 %v558_v24, %v557_v28  ;;  %v6272_v2 = vpack.c.bf16 %v893_v41, %v892_v36  ;;  %v7962_v44 = vld [vmem:[%s9601_s1 + $0x438] sm:$0xff]  ;;  %v7967_v19 = vld [vmem:[%s9601_s1 + $0x5b0] sm:$0xff]  ;;  %v7990_v21 = vld [vmem:[%s9601_s1 + $0x4c0] sm:$0xff] }
  0x63   :  { %6235 = vmatpush3.bf16.msra.mxu1 %v9627_v15  ;;  %v577_v17 = vrot.slane %v576_v57, 1  ;;  %v6244_v62 = vpack.c.bf16 %v863_v33, %v862_v0  ;;  %v1016_v63 = vsel %vm1011_vm1, %v704_v45, %v688_v7  ;;  %v6246_v42 = vpack.c.bf16 %v847_v49, %v846_v50  ;;  %v7973_v37 = vld [vmem:[%s9601_s1 + $0x5b8] sm:$0xff]  ;;  %v7978_v38 = vld [vmem:[%s9601_s1 + $0x530] sm:$0xff]  ;;  %v7995_v6 = vld [vmem:[%s9601_s1 + $0x4c8] sm:$0xff] }
  0x64   :  { %6237 = vmatprep.subr.bf16.mxu1 %v6236_v29  ;;  %v354_v51 = vrot.slane %v353_v40, 2  ;;  %v560_v13 = vrot.slane %v559_v1, 4  ;;  %1249 = vmatmul.mubr.f32.vlgmr.msra.gmra.mrb[2].mxu0 %v1016_v63  ;;  %v691_v46 = vmul.f32 0.020408163, %v370_v39  ;;  %v6248_v32 = vpack.c.bf16 %v865_v43, %v864_v22  ;;  %v7983_v14 = vld [vmem:[%s9601_s1 + $0x538] sm:$0xff]  ;;  %v8000_v7 = vld [vmem:[%s9601_s1 + $0x440] sm:$0xff] }
  0x65   :  { %v578_v29 = vadd.f32 %v577_v17, %v576_v57  ;;  %6243 = vmatpush3.bf16.msra.mxu0 %v6242_v3  ;;  %v6250_v11 = vpack.c.bf16 %v7906_v12, %v7901_v56  ;;  %v8005_v30 = vld [vmem:[%s9601_s1 + $0x448] sm:$0xff]  ;;  %v8010_v36 = vld [vmem:[%s9601_s1 + $0x5c0] sm:$0xff]  ;;  %v6274_v41 = vpack.c.bf16 %v7896_v23, %v7891_v61  ;;  %v6252_v10 = vpack.c.bf16 %v867_v34, %v866_v53  ;;  %v8032_v28 = vld [vmem:[%s9601_s1 + $0x4d0] sm:$0xff] }
  0x66   :  { %v355_v58 = vadd.f32 %v354_v51, %v353_v40  ;;  %v561_v60 = vadd.f32 %v560_v13, %v559_v1  ;;  %6245 = vmatprep.subr.bf16.mxu0 %v6244_v62  ;;  %v8015_v24 = vld [vmem:[%s9601_s1 + $0x5c8] sm:$0xff]  ;;  %v8020_v25 = vld [vmem:[%s9601_s1 + $0x540] sm:$0xff]  ;;  %v8037_v0 = vld [vmem:[%s9601_s1 + $0x4d8] sm:$0xff]  ;;  %v6276_v3 = vpack.c.bf16 %v7916_v27, %v7911_v26  ;;  %v6278_v15 = vpack.c.bf16 %v7926_v31, %v7921_v54 }
  0x67   :  { %6239 = vmatpush3.bf16.msra.mxu1 %v6238_v16  ;;  %v707_v35 = vmul.f32 0.020408163, %v578_v29  ;;  %v8025_v47 = vld [vmem:[%s9601_s1 + $0x548] sm:$0xff]  ;;  %v6280_v45 = vpack.c.bf16 %v7936_v52, %v7931_v55  ;;  %v8054_v39 = vld [vmem:[%s9601_s1 + $0x450] sm:$0xff]  ;;  %v8059_v40 = vld [vmem:[%s9601_s1 + $0x458] sm:$0xff]  ;;  %v6254_v63 = vpack.c.bf16 %v7962_v44, %v7957_v48  ;;  %v6256_v34 = vpack.c.bf16 %v7995_v6, %v7990_v21 }
  0x68   :  { %6273 = vmatprep.subr.bf16.mxu1 %v6272_v2  ;;  %v356_v8 = vrot.slane %v355_v58, 1  ;;  %v562_v4 = vrot.slane %v561_v60, 2  ;;  %v51_v33 = vld [vmem:[%s9600_s0 + $0x48] sm:$0xff]  ;;  %v8064_v1 = vld [vmem:[%s9601_s1 + $0x5d0] sm:$0xff]  ;;  %v8069_v17 = vld [vmem:[%s9601_s1 + $0x5d8] sm:$0xff] }
  0x69   :  { %v1019_v20 = vsel %vm1011_vm1, %v707_v35, %v691_v46  ;;  %6247 = vmatpush3.bf16.msra.mxu0 %v6246_v42  ;;  %v67_v16 = vld [vmem:[%s9600_s0 + $0xc8] sm:$0xff]  ;;  %v8074_v2 = vld [vmem:[%s9601_s1 + $0x550] sm:$0xff]  ;;  %v8079_v62 = vld [vmem:[%s9601_s1 + $0x558] sm:$0xff] }
  0x6a   :  { %1318 = vmatprep.mubr.f32.mxu1 %v1019_v20  ;;  %v357_v59 = vadd.f32 %v356_v8, %v355_v58  ;;  %v563_v18 = vadd.f32 %v562_v4, %v561_v60  ;;  %6249 = vmatprep.subr.bf16.mxu0 %v6248_v32  ;;  %v83_v50 = vld [vmem:[%s9600_s0 + $0x148] sm:$0xff]  ;;  %v8095_v22 = vld [vmem:[%s9601_s1 + $0x4e0] sm:$0xff]  ;;  %v384_v32 = vadd.f32 %v67_v16, %v51_v33  ;;  %v8203_v4 = vld [vmem:[%s9601_s1 + $0x470] sm:$0xff] }
  0x6b   :  { %v8100_v43 = vld [vmem:[%s9601_s1 + $0x4e8] sm:$0xff]  ;;  %v8114_v56 = vld [vmem:[%s9601_s1 + $0x460] sm:$0xff]  ;;  %v6258_v8 = vpack.c.bf16 %v8005_v30, %v8000_v7  ;;  %v6260_v30 = vpack.c.bf16 %v8037_v0, %v8032_v28  ;;  %v8208_v13 = vld [vmem:[%s9601_s1 + $0x478] sm:$0xff] }
  0x6c   :  { %v564_v57 = vrot.slane %v563_v18, 1  ;;  %v163_v29 = vld [vmem:[%s9600_s0 + $0x3c8] sm:$0xff]  ;;  %v690_v42 = vmul.f32 0.020408163, %v357_v59  ;;  %v8135_v44 = vld [vmem:[%s9601_s1 + $0x5e0] sm:$0xff]  ;;  %v385_v16 = vadd.f32 %v384_v32, %v83_v50  ;;  %v8186_v50 = vld [vmem:[%s9601_s1 + $0x4f8] sm:$0xff] }
  0x6d   :  { %v179_v46 = vld [vmem:[%s9600_s0 + $0x448] sm:$0xff]  ;;  %6251 = vmatpush3.bf16.msra.mxu0 %v6250_v11  ;;  %v8145_v59 = vld [vmem:[%s9601_s1 + $0x560] sm:$0xff]  ;;  %v85_v48 = vld [vmem:[%s9600_s0 + $0x158] sm:$0xff] }
  0x6e   :  { %v195_v58 = vld [vmem:[%s9600_s0 + $0x4c8] sm:$0xff]  ;;  %v565_v60 = vadd.f32 %v564_v57, %v563_v18  ;;  %v592_v53 = vadd.f32 %v179_v46, %v163_v29  ;;  %6253 = vmatprep.subr.bf16.mxu0 %v6252_v10  ;;  %v50_v21 = vld [vmem:[%s9600_s0 + $0x40] sm:$0xff]  ;;  %v6262_v46 = vpack.c.bf16 %v8059_v40, %v8054_v39  ;;  %v133_v40 = vld [vmem:[%s9600_s0 + $0x2d8] sm:$0xff] }
  0x6f   :  { %v8119_v12 = vld [vmem:[%s9601_s1 + $0x468] sm:$0xff]  ;;  %v66_v6 = vld [vmem:[%s9600_s0 + $0xc0] sm:$0xff] }
  0x70   :  { %v99_v35 = vld [vmem:[%s9600_s0 + $0x1c8] sm:$0xff]  ;;  %v706_v7 = vmul.f32 0.020408163, %v565_v60  ;;  %v593_v57 = vadd.f32 %v592_v53, %v195_v58  ;;  %v82_v29 = vld [vmem:[%s9600_s0 + $0x140] sm:$0xff]  ;;  %v8181_v60 = vld [vmem:[%s9601_s1 + $0x4f0] sm:$0xff]  ;;  %v371_v0 = vadd.f32 %v66_v6, %v50_v21 }
  0x71   :  { %v8140_v20 = vld [vmem:[%s9601_s1 + $0x5e8] sm:$0xff]  ;;  %v162_v53 = vld [vmem:[%s9600_s0 + $0x3c0] sm:$0xff]  ;;  %6255 = vmatpush3.bf16.msra.mxu0 %v6254_v63  ;;  %v386_v51 = vadd.f32 %v385_v16, %v99_v35  ;;  %v8240_v6 = vld [vmem:[%s9601_s1 + $0x5f0] sm:$0xff]  ;;  %v6268_v26 = vpack.c.bf16 %v8186_v50, %v8181_v60  ;;  %v9633_v50 = vpack.c.bf16 %v8015_v24, %v8010_v36 }
  0x72   :  { %v8150_v18 = vld [vmem:[%s9601_s1 + $0x568] sm:$0xff]  ;;  %v1018_v28 = vsel %vm1011_vm1, %v706_v7, %v690_v42  ;;  %v98_v42 = vld [vmem:[%s9600_s0 + $0x1c0] sm:$0xff]  ;;  %6257 = vmatprep.subr.bf16.mxu0 %v6256_v34  ;;  %v372_v16 = vadd.f32 %v371_v0, %v82_v29  ;;  %v8245_v29 = vld [vmem:[%s9601_s1 + $0x5f8] sm:$0xff] }
  0x73   :  { %v211_v11 = vld [vmem:[%s9600_s0 + $0x548] sm:$0xff]  ;;  %v178_v63 = vld [vmem:[%s9600_s0 + $0x440] sm:$0xff]  ;;  %1319 = vmatmul.mubr.f32.vlgmr.msra.gmra.mrb[2].mxu1 %v1018_v28  ;;  %v69_v34 = vld [vmem:[%s9600_s0 + $0xd8] sm:$0xff]  ;;  %v6300_v54 = vpack.c.bf16 %v8245_v29, %v8240_v6 }
  0x74   :  { %v115_v10 = vld [vmem:[%s9600_s0 + $0x248] sm:$0xff]  ;;  %v594_v49 = vadd.f32 %v593_v57, %v211_v11  ;;  %v194_v21 = vld [vmem:[%s9600_s0 + $0x4c0] sm:$0xff]  ;;  %v579_v57 = vadd.f32 %v178_v63, %v162_v53  ;;  %6275 = vmatpush3.bf16.msra.mxu1 %v6274_v41  ;;  %v53_v63 = vld [vmem:[%s9600_s0 + $0x58] sm:$0xff] }
  0x75   :  { %v147_v33 = vld [vmem:[%s9600_s0 + $0x348] sm:$0x1]  ;;  %v114_v7 = vld [vmem:[%s9600_s0 + $0x240] sm:$0xff]  ;;  %v387_v0 = vadd.f32 %v386_v51, %v115_v10  ;;  %6277 = vmatprep.subr.bf16.mxu1 %v6276_v3  ;;  %6259 = vmatpush3.bf16.msra.mxu0 %v6258_v8  ;;  %v6270_v8 = vpack.c.bf16 %v8208_v13, %v8203_v4  ;;  %v196_v60 = vld [vmem:[%s9600_s0 + $0x4d0] sm:$0xff]  ;;  %v9634_v13 = vpack.c.bf16 %v8025_v47, %v8020_v25 }
  0x76   :  { %v227_v58 = vld [vmem:[%s9600_s0 + $0x5c8] sm:$0xff]  ;;  %v130_v61 = vld [vmem:[%s9600_s0 + $0x2c0] sm:$0xff]  ;;  %v580_v28 = vadd.f32 %v579_v57, %v194_v21  ;;  %v410_v21 = vadd.f32 %v69_v34, %v53_v63  ;;  %6261 = vmatprep.subr.bf16.mxu0 %v6260_v30  ;;  %v165_v57 = vld [vmem:[%s9600_s0 + $0x3d8] sm:$0xff] }
  0x77   :  { %v259_v32 = vld [vmem:[%s9600_s0 + $0x6c8] sm:$0x1]  ;;  %v595_v53 = vadd.f32 %v594_v49, %v227_v58  ;;  %v146_v23 = vld [vmem:[%s9600_s0 + $0x340] sm:$0x1]  ;;  %v389_v49 = vsel %vm271_vm0, %v147_v33, 0.0  ;;  %v373_v58 = vadd.f32 %v372_v16, %v98_v42  ;;  %v101_v42 = vld [vmem:[%s9600_s0 + $0x1d8] sm:$0xff] }
  0x78   :  { %v131_v35 = vld [vmem:[%s9600_s0 + $0x2c8] sm:$0xff]  ;;  %v210_v41 = vld [vmem:[%s9600_s0 + $0x540] sm:$0xff]  ;;  %v597_v51 = vsel %vm271_vm0, %v259_v32, 0.0  ;;  %v197_v34 = vld [vmem:[%s9600_s0 + $0x4d8] sm:$0xff]  ;;  %6279 = vmatpush3.bf16.msra.mxu1 %v6278_v15 }
  0x79   :  { %v243_v11 = vld [vmem:[%s9600_s0 + $0x648] sm:$0xff]  ;;  %v226_v10 = vld [vmem:[%s9600_s0 + $0x5c0] sm:$0xff]  ;;  %v388_v27 = vadd.f32 %v387_v0, %v131_v35  ;;  %v374_v16 = vadd.f32 %v373_v58, %v114_v7  ;;  %v376_v35 = vsel %vm271_vm0, %v146_v23, 0.0  ;;  %v181_v0 = vld [vmem:[%s9600_s0 + $0x458] sm:$0xff]  ;;  %6281 = vmatprep.subr.bf16.mxu1 %v6280_v45  ;;  %6263 = vmatpush3.bf16.msra.mxu0 %v6262_v46 }
  0x7a   :  { %v596_v3 = vadd.f32 %v595_v53, %v243_v11  ;;  %v242_v33 = vld [vmem:[%s9600_s0 + $0x640] sm:$0xff]  ;;  %v581_v11 = vadd.f32 %v580_v28, %v210_v41  ;;  %v8307_v53 = vld [vmem:[%s9601_s1 + $0x688] sm:$0xff]  ;;  %v149_v23 = vld [vmem:[%s9600_s0 + $0x358] sm:$0x1]  ;;  %v411_v41 = vadd.f32 %v410_v21, %v85_v48  ;;  %v618_v63 = vadd.f32 %v181_v0, %v165_v57 }
  0x7b   :  { %v258_v32 = vld [vmem:[%s9600_s0 + $0x6c0] sm:$0x1]  ;;  %v390_v30 = vadd.f32 %v389_v49, %v388_v27  ;;  %v375_v31 = vadd.f32 %v374_v16, %v130_v61  ;;  %v213_v48 = vld [vmem:[%s9600_s0 + $0x558] sm:$0xff]  ;;  %v52_v58 = vld [vmem:[%s9600_s0 + $0x50] sm:$0xff]  ;;  %v9628_v27 = vpack.c.bf16 %v8100_v43, %v8095_v22  ;;  %v9629_v43 = vpack.c.bf16 %v7952_v9, %v7947_v5 }
  0x7c   :  { %v598_v7 = vadd.f32 %v597_v51, %v596_v3  ;;  %v8302_v28 = vld [vmem:[%s9601_s1 + $0x680] sm:$0xff]  ;;  %v582_v15 = vadd.f32 %v581_v11, %v226_v10  ;;  %v584_v49 = vsel %vm271_vm0, %v258_v32, 0.0  ;;  %v117_v51 = vld [vmem:[%s9600_s0 + $0x258] sm:$0xff]  ;;  %v412_v61 = vadd.f32 %v411_v41, %v101_v42  ;;  %v68_v22 = vld [vmem:[%s9600_s0 + $0xd0] sm:$0xff] }
  0x7d   :  { %v391_v55 = vrot.slane %v390_v30, 4  ;;  %v261_v45 = vld [vmem:[%s9600_s0 + $0x6d8] sm:$0x1]  ;;  %v619_v10 = vadd.f32 %v618_v63, %v197_v34  ;;  %6265 = vmatprep.subr.bf16.mxu0 %v9628_v27  ;;  %v377_v3 = vadd.f32 %v376_v35, %v375_v31  ;;  %v6304_v39 = vpack.c.bf16 %v8307_v53, %v8302_v28  ;;  %6283 = vmatpush3.bf16.msra.mxu1 %v9629_v43  ;;  %v84_v11 = vld [vmem:[%s9600_s0 + $0x150] sm:$0xff]  ;;  %v8470_v29 = vld [vmem:[%s9601_s1 + $0x700] sm:$0xff] }
  0x7e   :  { %v599_v52 = vrot.slane %v598_v7, 4  ;;  %v583_v32 = vadd.f32 %v582_v15, %v242_v33  ;;  %v229_v46 = vld [vmem:[%s9600_s0 + $0x5d8] sm:$0xff]  ;;  %v415_v42 = vsel %vm271_vm0, %v149_v23, 0.0  ;;  %v413_v16 = vadd.f32 %v412_v61, %v117_v51  ;;  %v148_v57 = vld [vmem:[%s9600_s0 + $0x350] sm:$0x1] }
  0x7f   :  { %v392_v33 = vadd.f32 %v391_v55, %v390_v30  ;;  %v620_v35 = vadd.f32 %v619_v10, %v213_v48  ;;  %v9630_v0 = vpack.c.bf16 %v7973_v37, %v7967_v19  ;;  %v378_v34 = vrot.slane %v377_v3, 4  ;;  %v245_v5 = vld [vmem:[%s9600_s0 + $0x658] sm:$0xff]  ;;  %v100_v19 = vld [vmem:[%s9600_s0 + $0x1d0] sm:$0xff] }
  0x80   :  { %v600_v21 = vadd.f32 %v599_v52, %v598_v7  ;;  %v585_v28 = vadd.f32 %v584_v49, %v583_v32  ;;  %v623_v9 = vsel %vm271_vm0, %v261_v45, 0.0  ;;  %v397_v30 = vadd.f32 %v68_v22, %v52_v58  ;;  %v164_v37 = vld [vmem:[%s9600_s0 + $0x3d0] sm:$0xff] }
  0x81   :  { %6285 = vmatprep.subr.bf16.mxu1 %v9630_v0  ;;  %v9631_v7 = vpack.c.bf16 %v8119_v12, %v8114_v56  ;;  %v393_v53 = vrot.slane %v392_v33, 2  ;;  %v414_v41 = vadd.f32 %v413_v16, %v133_v40  ;;  %v621_v63 = vadd.f32 %v620_v35, %v229_v46  ;;  %v180_v31 = vld [vmem:[%s9600_s0 + $0x450] sm:$0xff] }
  0x82   :  { %v601_v23 = vrot.slane %v600_v21, 2  ;;  %v379_v56 = vadd.f32 %v378_v34, %v377_v3  ;;  %v586_v12 = vrot.slane %v585_v28, 4  ;;  %v398_v15 = vadd.f32 %v397_v30, %v84_v11  ;;  %v116_v61 = vld [vmem:[%s9600_s0 + $0x250] sm:$0xff] }
  0x83   :  { %6267 = vmatpush3.bf16.msra.mxu0 %v9631_v7  ;;  %v402_v49 = vsel %vm271_vm0, %v148_v57, 0.0  ;;  %v9632_v51 = vpack.c.bf16 %v7983_v14, %v7978_v38  ;;  %v394_v48 = vadd.f32 %v393_v53, %v392_v33  ;;  %v416_v52 = vadd.f32 %v415_v42, %v414_v41  ;;  %v132_v40 = vld [vmem:[%s9600_s0 + $0x2d0] sm:$0xff] }
  0x84   :  { %6269 = vmatprep.subr.bf16.mxu0 %v6268_v26  ;;  %v602_v55 = vadd.f32 %v601_v23, %v600_v21  ;;  %v622_v45 = vadd.f32 %v621_v63, %v245_v5  ;;  %v380_v26 = vrot.slane %v379_v56, 2  ;;  %v587_v10 = vadd.f32 %v586_v12, %v585_v28  ;;  %v212_v36 = vld [vmem:[%s9600_s0 + $0x550] sm:$0xff] }
  0x85   :  { %6287 = vmatpush3.bf16.msra.mxu1 %v9632_v51  ;;  %v399_v38 = vadd.f32 %v398_v15, %v100_v19  ;;  %v605_v14 = vadd.f32 %v180_v31, %v164_v37  ;;  %v395_v58 = vrot.slane %v394_v48, 1  ;;  %v417_v3 = vrot.slane %v416_v52, 4  ;;  %v228_v21 = vld [vmem:[%s9600_s0 + $0x5d0] sm:$0xff]  ;;  %v908_v19 = vld [vmem:[%s9601_s1 + $0x600] sm:$0xff]  ;;  %v909_v37 = vld [vmem:[%s9601_s1 + $0x608] sm:$0xff] }
  0x86   :  { %6289 = vmatprep.subr.bf16.mxu1 %v9633_v50  ;;  %v603_v27 = vrot.slane %v602_v55, 1  ;;  %v624_v32 = vadd.f32 %v623_v9, %v622_v45  ;;  %v381_v24 = vadd.f32 %v380_v26, %v379_v56  ;;  %v588_v46 = vrot.slane %v587_v10, 2  ;;  %v260_v11 = vld [vmem:[%s9600_s0 + $0x6d0] sm:$0x1] }
  0x87   :  { %6271 = vmatpush3.bf16.msra.mxu0 %v6270_v8  ;;  %v400_v42 = vadd.f32 %v399_v38, %v116_v61  ;;  %v606_v22 = vadd.f32 %v605_v14, %v196_v60  ;;  %v396_v4 = vadd.f32 %v395_v58, %v394_v48  ;;  %v418_v43 = vadd.f32 %v417_v3, %v416_v52  ;;  %v244_v5 = vld [vmem:[%s9600_s0 + $0x650] sm:$0xff]  ;;  %v927_v48 = vld [vmem:[%s9601_s1 + $0x698] sm:$0xff]  ;;  %v957_v52 = vld [vmem:[%s9601_s1 + $0x788] sm:$0xff] }
  0x88   :  { %6305 = vmatprep.subr.bf16.mxu0 %v6304_v39  ;;  %v604_v8 = vadd.f32 %v603_v27, %v602_v55  ;;  %v625_v33 = vrot.slane %v624_v32, 4  ;;  %v9635_v16 = vpack.c.bf16 %v8069_v17, %v8064_v1  ;;  %v382_v35 = vrot.slane %v381_v24, 1  ;;  %v890_v53 = vld [vmem:[%s9601_s1 + $0x570] sm:$0xff]  ;;  %v911_v3 = vld [vmem:[%s9601_s1 + $0x618] sm:$0xff] }
  0x89   :  { %6291 = vmatpush3.bf16.msra.mxu1 %v9634_v13  ;;  %v589_v39 = vadd.f32 %v588_v46, %v587_v10  ;;  %v401_v25 = vadd.f32 %v400_v42, %v132_v40  ;;  %v607_v47 = vadd.f32 %v606_v22, %v212_v36  ;;  %v693_v57 = vmul.f32 0.020408163, %v396_v4  ;;  %v926_v51 = vld [vmem:[%s9601_s1 + $0x690] sm:$0xff]  ;;  %v928_v36 = vld [vmem:[%s9601_s1 + $0x6a0] sm:$0xff] }
  0x8a   :  { %6293 = vmatprep.subr.bf16.mxu1 %v9635_v16  ;;  %v709_v0 = vmul.f32 0.020408163, %v604_v8  ;;  %v419_v34 = vrot.slane %v418_v43, 2  ;;  %v626_v28 = vadd.f32 %v625_v33, %v624_v32  ;;  %v383_v9 = vadd.f32 %v382_v35, %v381_v24  ;;  %v910_v27 = vld [vmem:[%s9601_s1 + $0x610] sm:$0xff]  ;;  %v929_v24 = vld [vmem:[%s9601_s1 + $0x6a8] sm:$0xff]  ;;  %v8485_v8 = vld [vmem:[%s9601_s1 + $0x798] sm:$0xff] }
  0x8b   :  { %v590_v30 = vrot.slane %v589_v39, 1  ;;  %v403_v1 = vadd.f32 %v402_v49, %v401_v25  ;;  %v608_v17 = vadd.f32 %v607_v47, %v228_v21  ;;  %v9636_v7 = vpack.c.bf16 %v8079_v62, %v8074_v2  ;;  %v891_v62 = vld [vmem:[%s9601_s1 + $0x578] sm:$0xff]  ;;  %v8480_v4 = vld [vmem:[%s9601_s1 + $0x790] sm:$0xff]  ;;  %v8500_v21 = vld [vmem:[%s9601_s1 + $0x620] sm:$0xff] }
  0x8c   :  { %v1021_v23 = vsel %vm1011_vm1, %v709_v0, %v693_v57  ;;  %v420_v41 = vadd.f32 %v419_v34, %v418_v43  ;;  %v627_v63 = vrot.slane %v626_v28, 2  ;;  %v610_v31 = vsel %vm271_vm0, %v260_v11, 0.0  ;;  %v8490_v43 = vld [vmem:[%s9601_s1 + $0x710] sm:$0xff]  ;;  %v8495_v33 = vld [vmem:[%s9601_s1 + $0x718] sm:$0xff]  ;;  %v8505_v16 = vld [vmem:[%s9601_s1 + $0x628] sm:$0xff] }
  0x8d   :  { %6295 = vmatpush3.bf16.msra.mxu1 %v9636_v7  ;;  %v9637_v2 = vpack.c.bf16 %v8140_v20, %v8135_v44  ;;  %1388 = vmatprep.mubr.f32.mxu0 %v1021_v23  ;;  %v591_v56 = vadd.f32 %v590_v30, %v589_v39  ;;  %v692_v12 = vmul.f32 0.020408163, %v383_v9  ;;  %v404_v15 = vrot.slane %v403_v1, 4  ;;  %v956_v20 = vld [vmem:[%s9601_s1 + $0x780] sm:$0xff]  ;;  %v8510_v35 = vld [vmem:[%s9601_s1 + $0x6b0] sm:$0xff]  ;;  %v8520_v47 = vld [vmem:[%s9601_s1 + $0x7a8] sm:$0xff] }
  0x8e   :  { %v609_v49 = vadd.f32 %v608_v17, %v244_v5  ;;  %v421_v55 = vrot.slane %v420_v41, 1  ;;  %v628_v44 = vadd.f32 %v627_v63, %v626_v28  ;;  %v6306_v61 = vpack.c.bf16 %v909_v37, %v908_v19  ;;  %v8515_v25 = vld [vmem:[%s9601_s1 + $0x7a0] sm:$0xff]  ;;  %v8530_v0 = vld [vmem:[%s9601_s1 + $0x728] sm:$0xff]  ;;  %v8535_v34 = vld [vmem:[%s9601_s1 + $0x6b8] sm:$0xff] }
  0x8f   :  { %6297 = vmatprep.subr.bf16.mxu1 %v9637_v2  ;;  %v708_v45 = vmul.f32 0.020408163, %v591_v56  ;;  %v405_v60 = vadd.f32 %v404_v15, %v403_v1  ;;  %v9638_v26 = vpack.c.bf16 %v8150_v18, %v8145_v59  ;;  %v6302_v10 = vpack.c.bf16 %v891_v62, %v890_v53  ;;  %v8525_v57 = vld [vmem:[%s9601_s1 + $0x720] sm:$0xff]  ;;  %v8540_v28 = vld [vmem:[%s9601_s1 + $0x630] sm:$0xff]  ;;  %v8545_v5 = vld [vmem:[%s9601_s1 + $0x638] sm:$0xff] }
  0x90   :  { %v611_v50 = vadd.f32 %v610_v31, %v609_v49  ;;  %v422_v38 = vadd.f32 %v421_v55, %v420_v41  ;;  %v629_v14 = vrot.slane %v628_v44, 1  ;;  %v6308_v58 = vpack.c.bf16 %v927_v48, %v926_v51  ;;  %v8550_v1 = vld [vmem:[%s9601_s1 + $0x7b0] sm:$0xff]  ;;  %v8555_v17 = vld [vmem:[%s9601_s1 + $0x7b8] sm:$0xff]  ;;  %v8570_v23 = vld [vmem:[%s9601_s1 + $0x6c0] sm:$0xff] }
  0x91   :  { %6299 = vmatpush3.bf16.msra.mxu1 %v9638_v26  ;;  %v1020_v32 = vsel %vm1011_vm1, %v708_v45, %v692_v12  ;;  %v6336_v59 = vpack.c.bf16 %v957_v52, %v956_v20  ;;  %v406_v18 = vrot.slane %v405_v60, 2  ;;  %v6310_v13 = vpack.c.bf16 %v911_v3, %v910_v27  ;;  %v8560_v7 = vld [vmem:[%s9601_s1 + $0x730] sm:$0xff]  ;;  %v8565_v53 = vld [vmem:[%s9601_s1 + $0x738] sm:$0xff]  ;;  %v8576_v63 = vld [vmem:[%s9601_s1 + $0x6c8] sm:$0xff] }
  0x92   :  { %6301 = vmatprep.subr.bf16.mxu1 %v6300_v54  ;;  %v612_v40 = vrot.slane %v611_v50, 4  ;;  %1389 = vmatmul.mubr.f32.vlgmr.msra.gmra.mrb[4].mxu0 %v1020_v32  ;;  %v630_v46 = vadd.f32 %v629_v14, %v628_v44  ;;  %v695_v42 = vmul.f32 0.020408163, %v422_v38  ;;  %v8475_v54 = vld [vmem:[%s9601_s1 + $0x708] sm:$0xff]  ;;  %v6312_v11 = vpack.c.bf16 %v929_v24, %v928_v36  ;;  %v8581_v19 = vld [vmem:[%s9601_s1 + $0x640] sm:$0xff]  ;;  %v8613_v51 = vld [vmem:[%s9601_s1 + $0x6d0] sm:$0xff] }
  0x93   :  { %6307 = vmatpush3.bf16.msra.mxu0 %v6306_v61  ;;  %v407_v22 = vadd.f32 %v406_v18, %v405_v60  ;;  %v8586_v37 = vld [vmem:[%s9601_s1 + $0x648] sm:$0xff]  ;;  %v6314_v62 = vpack.c.bf16 %v8505_v16, %v8500_v21  ;;  %v8593_v56 = vld [vmem:[%s9601_s1 + $0x7c0] sm:$0xff]  ;;  %v8618_v48 = vld [vmem:[%s9601_s1 + $0x6d8] sm:$0xff]  ;;  %v6316_v61 = vpack.c.bf16 %v8535_v34, %v8510_v35  ;;  %v6318_v27 = vpack.c.bf16 %v8545_v5, %v8540_v28 }
  0x94   :  { %v613_v6 = vadd.f32 %v612_v40, %v611_v50  ;;  %v711_v39 = vmul.f32 0.020408163, %v630_v46  ;;  %6309 = vmatprep.subr.bf16.mxu0 %v6308_v58  ;;  %v8598_v12 = vld [vmem:[%s9601_s1 + $0x7c8] sm:$0xff]  ;;  %v8603_v15 = vld [vmem:[%s9601_s1 + $0x740] sm:$0xff]  ;;  %v8623_v55 = vld [vmem:[%s9601_s1 + $0x650] sm:$0xff] }
  0x95   :  { %6303 = vmatpush3.bf16.msra.mxu1 %v6302_v10  ;;  %v408_v9 = vrot.slane %v407_v22, 1  ;;  %v8608_v49 = vld [vmem:[%s9601_s1 + $0x748] sm:$0xff]  ;;  %v8628_v44 = vld [vmem:[%s9601_s1 + $0x658] sm:$0xff]  ;;  %v8641_v60 = vld [vmem:[%s9601_s1 + $0x7d0] sm:$0xff] }
  0x96   :  { %6337 = vmatprep.subr.bf16.mxu1 %v6336_v59  ;;  %v614_v30 = vrot.slane %v613_v6, 2  ;;  %v1023_v41 = vsel %vm1011_vm1, %v711_v39, %v695_v42  ;;  %v8646_v50 = vld [vmem:[%s9601_s1 + $0x7d8] sm:$0xff]  ;;  %v55_v26 = vld [vmem:[%s9600_s0 + $0x68] sm:$0xff]  ;;  %v8663_v3 = vld [vmem:[%s9601_s1 + $0x750] sm:$0xff] }
  0x97   :  { %1458 = vmatprep.mubr.f32.mxu1 %v1023_v41  ;;  %v409_v31 = vadd.f32 %v408_v9, %v407_v22  ;;  %6311 = vmatpush3.bf16.msra.mxu0 %v6310_v13  ;;  %v71_v10 = vld [vmem:[%s9600_s0 + $0xe8] sm:$0xff]  ;;  %9639 = vst [vmem:[#allocation5_spill] sm:$0xff] %v8663_v3  ;;  %v8668_v32 = vld [vmem:[%s9601_s1 + $0x758] sm:$0xff]  ;;  %v8673_v59 = vld [vmem:[%s9601_s1 + $0x6e0] sm:$0xff]  ;;  %v6320_v22 = vpack.c.bf16 %v8576_v63, %v8570_v23 }
  0x98   :  { %v615_v2 = vadd.f32 %v614_v30, %v613_v6  ;;  %6313 = vmatprep.subr.bf16.mxu0 %v6312_v11  ;;  %9640 = vst [vmem:[#allocation6_spill] sm:$0xff] %v8668_v32  ;;  %v8678_v18 = vld [vmem:[%s9601_s1 + $0x6e8] sm:$0xff]  ;;  %v8683_v40 = vld [vmem:[%s9601_s1 + $0x660] sm:$0xff]  ;;  %v436_v30 = vadd.f32 %v71_v10, %v55_v26  ;;  %v8783_v45 = vld [vmem:[%s9601_s1 + $0x670] sm:$0xff] }
  0x99   :  { %v8688_v36 = vld [vmem:[%s9601_s1 + $0x668] sm:$0xff]  ;;  %v8704_v13 = vld [vmem:[%s9601_s1 + $0x7e0] sm:$0xff]  ;;  %v694_v34 = vmul.f32 0.020408163, %v409_v31  ;;  %v57_v6 = vld [vmem:[%s9600_s0 + $0x78] sm:$0xff] }
  0x9a   :  { %v616_v38 = vrot.slane %v615_v2, 1  ;;  %v87_v24 = vld [vmem:[%s9600_s0 + $0x168] sm:$0xff]  ;;  %v8723_v28 = vld [vmem:[%s9601_s1 + $0x760] sm:$0xff] }
  0x9b   :  { %v8709_v21 = vld [vmem:[%s9601_s1 + $0x7e8] sm:$0xff]  ;;  %6315 = vmatpush3.bf16.msra.mxu0 %v6314_v62  ;;  %v8744_v62 = vld [vmem:[%s9601_s1 + $0x6f0] sm:$0xff]  ;;  %v437_v46 = vadd.f32 %v436_v30, %v87_v24  ;;  %v8788_v24 = vld [vmem:[%s9601_s1 + $0x678] sm:$0xff] }
  0x9c   :  { %v167_v16 = vld [vmem:[%s9600_s0 + $0x3e8] sm:$0xff]  ;;  %v617_v11 = vadd.f32 %v616_v38, %v615_v2  ;;  %6317 = vmatprep.subr.bf16.mxu0 %v6316_v61  ;;  %v8749_v61 = vld [vmem:[%s9601_s1 + $0x6f8] sm:$0xff]  ;;  %v54_v38 = vld [vmem:[%s9600_s0 + $0x60] sm:$0xff] }
  0x9d   :  { %v183_v35 = vld [vmem:[%s9600_s0 + $0x468] sm:$0xff]  ;;  %v86_v2 = vld [vmem:[%s9600_s0 + $0x160] sm:$0xff] }
  0x9e   :  { %v199_v39 = vld [vmem:[%s9600_s0 + $0x4e8] sm:$0xff]  ;;  %v644_v23 = vadd.f32 %v183_v35, %v167_v16  ;;  %v70_v16 = vld [vmem:[%s9600_s0 + $0xe0] sm:$0xff]  ;;  %v710_v35 = vmul.f32 0.020408163, %v617_v11 }
  0x9f   :  { %v8728_v5 = vld [vmem:[%s9601_s1 + $0x768] sm:$0xff]  ;;  %v102_v11 = vld [vmem:[%s9600_s0 + $0x1e0] sm:$0xff]  ;;  %v423_v63 = vadd.f32 %v70_v16, %v54_v38  ;;  %6319 = vmatpush3.bf16.msra.mxu0 %v6318_v27 }
  0xa0   :  { %v103_v9 = vld [vmem:[%s9600_s0 + $0x1e8] sm:$0xff]  ;;  %v645_v58 = vadd.f32 %v644_v23, %v199_v39  ;;  %v166_v14 = vld [vmem:[%s9600_s0 + $0x3e0] sm:$0xff]  ;;  %v1022_v31 = vsel %vm1011_vm1, %v710_v35, %v694_v34  ;;  %6321 = vmatprep.subr.bf16.mxu0 %v6320_v22  ;;  %v9641_v22 = vpack.c.bf16 %v8475_v54, %v8470_v29  ;;  %v89_v29 = vld [vmem:[%s9600_s0 + $0x178] sm:$0xff]  ;;  %v9642_v54 = vpack.c.bf16 %v8485_v8, %v8480_v4 }
  0xa1   :  { %v119_v26 = vld [vmem:[%s9600_s0 + $0x268] sm:$0xff]  ;;  %v438_v52 = vadd.f32 %v437_v46, %v103_v9  ;;  %v118_v3 = vld [vmem:[%s9600_s0 + $0x260] sm:$0xff]  ;;  %1459 = vmatmul.mubr.f32.vlgmr.msra.gmra.mrb[4].mxu1 %v1022_v31  ;;  %v424_v9 = vadd.f32 %v423_v63, %v86_v2  ;;  %v6332_v31 = vpack.c.bf16 %v8749_v61, %v8744_v62  ;;  %v73_v63 = vld [vmem:[%s9600_s0 + $0xf8] sm:$0xff]  ;;  %v9643_v4 = vpack.c.bf16 %v8586_v37, %v8581_v19 }
  0xa2   :  { %v215_v10 = vld [vmem:[%s9600_s0 + $0x568] sm:$0xff]  ;;  %v182_v32 = vld [vmem:[%s9600_s0 + $0x460] sm:$0xff]  ;;  %6339 = vmatpush3.bf16.msra.mxu1 %v9641_v22  ;;  %v462_v2 = vadd.f32 %v73_v63, %v57_v6  ;;  %v6334_v8 = vpack.c.bf16 %v8788_v24, %v8783_v45  ;;  %v185_v19 = vld [vmem:[%s9600_s0 + $0x478] sm:$0xff]  ;;  %v9644_v37 = vpack.c.bf16 %v8618_v48, %v8613_v51 }
  0xa3   :  { %v151_v41 = vld [vmem:[%s9600_s0 + $0x368] sm:$0x1]  ;;  %v646_v20 = vadd.f32 %v645_v58, %v215_v10  ;;  %v198_v38 = vld [vmem:[%s9600_s0 + $0x4e0] sm:$0xff]  ;;  %v631_v10 = vadd.f32 %v182_v32, %v166_v14  ;;  %v439_v16 = vadd.f32 %v438_v52, %v119_v26  ;;  %6341 = vmatprep.subr.bf16.mxu1 %v9642_v54  ;;  %v425_v32 = vadd.f32 %v424_v9, %v102_v11  ;;  %v153_v11 = vld [vmem:[%s9600_s0 + $0x378] sm:$0x1] }
  0xa4   :  { %v231_v42 = vld [vmem:[%s9600_s0 + $0x5e8] sm:$0xff]  ;;  %v150_v58 = vld [vmem:[%s9600_s0 + $0x360] sm:$0x1]  ;;  %v441_v35 = vsel %vm271_vm0, %v151_v41, 0.0  ;;  %v105_v41 = vld [vmem:[%s9600_s0 + $0x1f8] sm:$0xff]  ;;  %6323 = vmatpush3.bf16.msra.mxu0 %v9643_v4  ;;  %v463_v9 = vadd.f32 %v462_v2, %v89_v29 }
  0xa5   :  { %v135_v39 = vld [vmem:[%s9600_s0 + $0x2e8] sm:$0xff]  ;;  %v214_v46 = vld [vmem:[%s9600_s0 + $0x560] sm:$0xff]  ;;  %v647_v27 = vadd.f32 %v646_v20, %v231_v42  ;;  %v632_v42 = vadd.f32 %v631_v10, %v198_v38  ;;  %v428_v22 = vsel %vm271_vm0, %v150_v58, 0.0  ;;  %v169_v38 = vld [vmem:[%s9600_s0 + $0x3f8] sm:$0xff]  ;;  %6325 = vmatprep.subr.bf16.mxu0 %v9644_v37  ;;  %v9645_v10 = vpack.c.bf16 %v8495_v33, %v8490_v43 }
  0xa6   :  { %v247_v30 = vld [vmem:[%s9600_s0 + $0x668] sm:$0xff]  ;;  %v262_v34 = vld [vmem:[%s9600_s0 + $0x6e0] sm:$0x1]  ;;  %v440_v26 = vadd.f32 %v439_v16, %v135_v39  ;;  %v426_v39 = vadd.f32 %v425_v32, %v118_v3  ;;  %v201_v58 = vld [vmem:[%s9600_s0 + $0x4f8] sm:$0xff]  ;;  %v9646_v43 = vpack.c.bf16 %v8520_v47, %v8515_v25  ;;  %v464_v54 = vadd.f32 %v463_v9, %v105_v41 }
  0xa7   :  { %v263_v23 = vld [vmem:[%s9600_s0 + $0x6e8] sm:$0x1]  ;;  %v134_v20 = vld [vmem:[%s9600_s0 + $0x2e0] sm:$0xff]  ;;  %6343 = vmatpush3.bf16.msra.mxu1 %v9645_v10  ;;  %v121_v48 = vld [vmem:[%s9600_s0 + $0x278] sm:$0xff]  ;;  %v9647_v25 = vpack.c.bf16 %v8628_v44, %v8623_v55  ;;  %v9648_v55 = vpack.c.bf16 %v8678_v18, %v8673_v59  ;;  %v9649_v59 = vpack.c.bf16 %v8530_v0, %v8525_v57  ;;  %v9650_v9 = vpack.c.bf16 %v8555_v17, %v8550_v1 }
  0xa8   :  { %v649_v52 = vsel %vm271_vm0, %v263_v23, 0.0  ;;  %v230_v14 = vld [vmem:[%s9600_s0 + $0x5e0] sm:$0xff]  ;;  %v648_v23 = vadd.f32 %v647_v27, %v247_v30  ;;  %v633_v30 = vadd.f32 %v632_v42, %v214_v46  ;;  %v636_v27 = vsel %vm271_vm0, %v262_v34, 0.0  ;;  %v265_v3 = vld [vmem:[%s9600_s0 + $0x6f8] sm:$0x1]  ;;  %v56_v63 = vld [vmem:[%s9600_s0 + $0x70] sm:$0xff]  ;;  %6345 = vmatprep.subr.bf16.mxu1 %v9646_v43 }
  0xa9   :  { %v246_v6 = vld [vmem:[%s9600_s0 + $0x660] sm:$0xff]  ;;  %v442_v16 = vadd.f32 %v441_v35, %v440_v26  ;;  %v467_v46 = vsel %vm271_vm0, %v153_v11, 0.0  ;;  %v670_v34 = vadd.f32 %v185_v19, %v169_v38  ;;  %v427_v33 = vadd.f32 %v426_v39, %v134_v20  ;;  %v217_v29 = vld [vmem:[%s9600_s0 + $0x578] sm:$0xff]  ;;  %v72_v32 = vld [vmem:[%s9600_s0 + $0xf0] sm:$0xff]  ;;  %6327 = vmatpush3.bf16.msra.mxu0 %v9647_v25 }
  0xaa   :  { %v650_v51 = vadd.f32 %v649_v52, %v648_v23  ;;  %v634_v35 = vadd.f32 %v633_v30, %v230_v14  ;;  %v675_v52 = vsel %vm271_vm0, %v265_v3, 0.0  ;;  %v88_v42 = vld [vmem:[%s9600_s0 + $0x170] sm:$0xff]  ;;  %v137_v14 = vld [vmem:[%s9600_s0 + $0x2f8] sm:$0xff]  ;;  %v449_v26 = vadd.f32 %v72_v32, %v56_v63  ;;  %6329 = vmatprep.subr.bf16.mxu0 %v9648_v55 }
  0xab   :  { %v443_v47 = vrot.slane %v442_v16, 4  ;;  %v233_v41 = vld [vmem:[%s9600_s0 + $0x5f8] sm:$0xff]  ;;  %v671_v2 = vadd.f32 %v670_v34, %v201_v58  ;;  %v152_v4 = vld [vmem:[%s9600_s0 + $0x370] sm:$0x1]  ;;  %v429_v44 = vadd.f32 %v428_v22, %v427_v33  ;;  %v465_v11 = vadd.f32 %v464_v54, %v121_v48  ;;  %6347 = vmatpush3.bf16.msra.mxu1 %v9649_v59 }
  0xac   :  { %v651_v20 = vrot.slane %v650_v51, 4  ;;  %v635_v23 = vadd.f32 %v634_v35, %v246_v6  ;;  %v104_v38 = vld [vmem:[%s9600_s0 + $0x1f0] sm:$0xff]  ;;  %v454_v39 = vsel %vm271_vm0, %v152_v4, 0.0  ;;  %v450_v58 = vadd.f32 %v449_v26, %v88_v42  ;;  %6349 = vmatprep.subr.bf16.mxu1 %v9650_v9  ;;  %v249_v3 = vld [vmem:[%s9600_s0 + $0x678] sm:$0xff] }
  0xad   :  { %v168_v19 = vld [vmem:[%s9600_s0 + $0x3f0] sm:$0xff]  ;;  %v444_v18 = vadd.f32 %v443_v47, %v442_v16  ;;  %v672_v6 = vadd.f32 %v671_v2, %v217_v29  ;;  %v430_v10 = vrot.slane %v429_v44, 4  ;;  %v466_v57 = vadd.f32 %v465_v11, %v137_v14 }
  0xae   :  { %v184_v37 = vld [vmem:[%s9600_s0 + $0x470] sm:$0xff]  ;;  %v652_v22 = vadd.f32 %v651_v20, %v650_v51  ;;  %v637_v48 = vadd.f32 %v636_v27, %v635_v23  ;;  %v9651_v51 = vpack.c.bf16 %v8688_v36, %v8683_v40  ;;  %v451_v27 = vadd.f32 %v450_v58, %v104_v38 }
  0xaf   :  { %v200_v30 = vld [vmem:[%s9600_s0 + $0x4f0] sm:$0xff]  ;;  %v657_v16 = vadd.f32 %v184_v37, %v168_v19  ;;  %v445_v34 = vrot.slane %v444_v18, 2  ;;  %v673_v1 = vadd.f32 %v672_v6, %v233_v41 }
  0xb0   :  { %v120_v0 = vld [vmem:[%s9600_s0 + $0x270] sm:$0xff]  ;;  %6331 = vmatpush3.bf16.msra.mxu0 %v9651_v51  ;;  %v653_v63 = vrot.slane %v652_v22, 2 }
  0xb1   :  { %v216_v17 = vld [vmem:[%s9600_s0 + $0x570] sm:$0xff] }
  0xb2   :  { %17 = vsyncpa [#allocation3], 0  ;;  %6333 = vmatprep.subr.bf16.mxu0 %v6332_v31  ;;  %v431_v43 = vadd.f32 %v430_v10, %v429_v44  ;;  %v638_v33 = vrot.slane %v637_v48, 4  ;;  %v468_v35 = vadd.f32 %v467_v46, %v466_v57  ;;  %v136_v40 = vld [vmem:[%s9600_s0 + $0x2f0] sm:$0xff]  ;;  %v658_v36 = vadd.f32 %v657_v16, %v200_v30  ;;  %v971_v37 = vld [vmem:[%s9601_s1 + $0x7f8] sm:$0xff]  ;;  %s6818_s18 = smov 64  }
  0xb3   :  { %v9652_v29 = vpack.c.bf16 %v8565_v53, %v8560_v7  ;;  %v446_v54 = vadd.f32 %v445_v34, %v444_v18  ;;  %v654_v32 = vadd.f32 %v653_v63, %v652_v22  ;;  %v674_v42 = vadd.f32 %v673_v1, %v249_v3  ;;  %v232_v62 = vld [vmem:[%s9600_s0 + $0x5f0] sm:$0xff]  ;;  %v9656_v58 = vld [vmem:[#allocation6_spill] sm:$0xff]  ;;  %s6820_s15 = smov 96  }
  0xb4   :  { %v452_v61 = vadd.f32 %v451_v27, %v120_v0  ;;  %v9653_v31 = vpack.c.bf16 %v8598_v12, %v8593_v56  ;;  %v432_v46 = vrot.slane %v431_v43, 2  ;;  %v639_v25 = vadd.f32 %v638_v33, %v637_v48  ;;  %6335 = vmatpush3.bf16.msra.mxu0 %v6334_v8  ;;  %v248_v41 = vld [vmem:[%s9600_s0 + $0x670] sm:$0xff]  ;;  %v955_v63 = vld [vmem:[%s9601_s1 + $0x778] sm:$0xff] }
  0xb5   :  { %6351 = vmatpush3.bf16.msra.mxu1 %v9652_v29  ;;  %v469_v47 = vrot.slane %v468_v35, 4  ;;  %v659_v20 = vadd.f32 %v658_v36, %v216_v17  ;;  %v447_v7 = vrot.slane %v446_v54, 1  ;;  %v655_v53 = vrot.slane %v654_v32, 1  ;;  %v264_v24 = vld [vmem:[%s9600_s0 + $0x6f0] sm:$0x1] }
  0xb6   :  { %6353 = vmatprep.subr.bf16.mxu1 %v9653_v31  ;;  %v676_v14 = vadd.f32 %v675_v52, %v674_v42  ;;  %v453_v2 = vadd.f32 %v452_v61, %v136_v40  ;;  %v433_v4 = vadd.f32 %v432_v46, %v431_v43  ;;  %v640_v26 = vrot.slane %v639_v25, 2  ;;  %v970_v11 = vld [vmem:[%s9601_s1 + $0x7f0] sm:$0xff] }
  0xb7   :  { %v470_v56 = vadd.f32 %v469_v47, %v468_v35  ;;  %v660_v12 = vadd.f32 %v659_v20, %v232_v62  ;;  %v9654_v55 = vpack.c.bf16 %v8608_v49, %v8603_v15  ;;  %v448_v44 = vadd.f32 %v447_v7, %v446_v54  ;;  %v9657_v9 = vld [vmem:[#allocation5_spill] sm:$0xff] }
  0xb8   :  { %v656_v23 = vadd.f32 %v655_v53, %v654_v32  ;;  %v677_v45 = vrot.slane %v676_v14, 4  ;;  %v455_v8 = vadd.f32 %v454_v39, %v453_v2  ;;  %v9655_v52 = vpack.c.bf16 %v8646_v50, %v8641_v60  ;;  %v954_v34 = vld [vmem:[%s9601_s1 + $0x770] sm:$0xff] }
  0xb9   :  { %6355 = vmatpush3.bf16.msra.mxu1 %v9654_v55  ;;  %v434_v38 = vrot.slane %v433_v4, 1  ;;  %v641_v19 = vadd.f32 %v640_v26, %v639_v25  ;;  %v471_v15 = vrot.slane %v470_v56, 2  ;;  %v661_v49 = vadd.f32 %v660_v12, %v248_v41  ;;  %v1606_v12 = vld [vmem:[%s9603_s3 + $0x8] sm:$0xff] }
  0xba   :  { %6357 = vmatprep.subr.bf16.mxu1 %v9655_v52  ;;  %v697_v59 = vmul.f32 0.020408163, %v448_v44  ;;  %v713_v18 = vmul.f32 0.020408163, %v656_v23  ;;  %v678_v22 = vadd.f32 %v677_v45, %v676_v14  ;;  %v456_v39 = vrot.slane %v455_v8, 4  ;;  %v1607_v23 = vld [vmem:[%s9603_s3 + $0x10] sm:$0xff] }
  0xbb   :  { %v435_v6 = vadd.f32 %v434_v38, %v433_v4  ;;  %v642_v30 = vrot.slane %v641_v19, 1  ;;  %v472_v60 = vadd.f32 %v471_v15, %v470_v56  ;;  %v662_v50 = vsel %vm271_vm0, %v264_v24, 0.0  ;;  %v1605_v56 = vld [vmem:[%s9603_s3] sm:$0xff]  ;;  %v1608_v45 = vld [vmem:[%s9603_s3 + $0x18] sm:$0xff] }
  0xbc   :  { %v9658_v10 = vpack.c.bf16 %v9656_v58, %v9657_v9  ;;  %v1025_v48 = vsel %vm1011_vm1, %v713_v18, %v697_v59  ;;  %v679_v3 = vrot.slane %v678_v22, 2  ;;  %v457_v57 = vadd.f32 %v456_v39, %v455_v8  ;;  %v5112_v8 = vld [vmem:[%s9602_s2] ss:$0 sm:$0xff]  ;;  %v1695_v59 = vld [vmem:[%s9609_s9 + $0x8] sm:$0xff]  ;;  %v1697_v39 = vld [vmem:[%s9609_s9 + $0x18] sm:$0xff] }
  0xbd   :  { %v663_v0 = vadd.f32 %v662_v50, %v661_v49  ;;  %v9659_v16 = vpack.c.bf16 %v8709_v21, %v8704_v13  ;;  %v6364_v51 = vpack.c.bf16 %v971_v37, %v970_v11  ;;  %1528 = vmatprep.mubr.f32.mxu0 %v1025_v48  ;;  %v643_v1 = vadd.f32 %v642_v30, %v641_v19  ;;  %v1694_v37 = vld [vmem:[%s9609_s9] sm:$0xff]  ;;  %v1708_v58 = vld [vmem:[%s9606_s6 + $0x10] sm:$0xff]  ;;  %v1709_v9 = vld [vmem:[%s9606_s6 + $0x18] sm:$0xff] }
  0xbe   :  { %6359 = vmatpush3.bf16.msra.mxu1 %v9658_v10  ;;  %v696_v17 = vmul.f32 0.020408163, %v435_v6  ;;  %v473_v27 = vrot.slane %v472_v60, 1  ;;  %v680_v43 = vadd.f32 %v679_v3, %v678_v22  ;;  %v458_v33 = vrot.slane %v457_v57, 2  ;;  %v1696_v22 = vld [vmem:[%s9609_s9 + $0x10] sm:$0xff]  ;;  %v1706_v30 = vld [vmem:[%s9606_s6] sm:$0xff] }
  0xbf   :  { %6361 = vmatprep.subr.bf16.mxu1 %v9659_v16  ;;  %v664_v35 = vrot.slane %v663_v0, 4  ;;  %v712_v40 = vmul.f32 0.020408163, %v643_v1  ;;  %v9660_v13 = vpack.c.bf16 %v8728_v5, %v8723_v28  ;;  %v6366_v21 = vpack.c.bf16 %v955_v63, %v954_v34 }
  0xc0   :  { %v474_v36 = vadd.f32 %v473_v27, %v472_v60  ;;  %v681_v29 = vrot.slane %v680_v43, 1  ;;  %v459_v54 = vadd.f32 %v458_v33, %v457_v57  ;;  %v6369_v55 = vpack.c.bf16 %v1606_v12, %v1605_v56  ;;  %v1707_v60 = vld [vmem:[%s9606_s6 + $0x8] sm:$0xff] }
  0xc1   :  { %v665_v32 = vadd.f32 %v664_v35, %v663_v0  ;;  %v1024_v42 = vsel %vm1011_vm1, %v712_v40, %v696_v17  ;;  %v6815_v44 = vmov 0.0|0.0   ;;  %v6372_v24 = vpack.c.bf16 %v1608_v45, %v1607_v23 }
  0xc2   :  { %6363 = vmatpush3.bf16.msra.mxu1 %v9660_v13  ;;  %1529 = vmatmul.mubr.f32.vlgmr.msra.gmra.mrb[6].mxu0 %v1024_v42  ;;  %v682_v62 = vadd.f32 %v681_v29, %v680_v43  ;;  %v699_v61 = vmul.f32 0.020408163, %v474_v36  ;;  %v460_v31 = vrot.slane %v459_v54, 1  ;;  %vm6816_vm2 = vmmov 0  }
  0xc3   :  { %6365 = vmatprep.subr.bf16.mxu1 %v6364_v51  ;;  %v666_v46 = vrot.slane %v665_v32, 2  ;;  %6380 = vmatprep.subr.bf16.mxu0 %v6815_v44  ;;  %v6817_v38 = vmov 0.0   ;;  %v9038_v18 = vpack.c.bf16 %v1695_v59, %v1694_v37  ;;  %v9048_v6 = vpack.c.bf16 %v1697_v39, %v1696_v22  ;;  %v1702_v22 = vld [vmem:[%s9611_s11] sm:$0xff]  ;;  %v1703_v39 = vld [vmem:[%s9611_s11 + $0x8] sm:$0xff] }
  0xc4   :  { %v715_v25 = vmul.f32 0.020408163, %v682_v62  ;;  %v461_v47 = vadd.f32 %v460_v31, %v459_v54  ;;  %5691 = vmatprep.mubr.msk.f32.mxu0 %vm6816_vm2, %v6817_v38  ;;  %v9058_v50 = vpack.c.bf16 %v1707_v60, %v1706_v30  ;;  %v9071_v10 = vpack.c.bf16 %v1709_v9, %v1708_v58  ;;  %v1704_v30 = vld [vmem:[%s9611_s11 + $0x10] sm:$0xff]  ;;  %v1705_v58 = vld [vmem:[%s9611_s11 + $0x18] sm:$0xff]  ;;  %v5120_v9 = vld [vmem:[%s9605_s5 + $0x2] sm:$0x3] }
  0xc5   :  { %v667_v20 = vadd.f32 %v666_v46, %v665_v32  ;;  %6382 = vmatpush3.bf16.msra.mxu0 %v9038_v18  ;;  %vm1616_vm3 = vcmask 261120   ;;  %v1690_v46 = vld [vmem:[%s9608_s8] sm:$0xff]  ;;  %v9131_v60 = vpack.c.bf16 %v1703_v39, %v1702_v22  ;;  %vm2133_vm4 = vcmask 254976  }
  0xc6   :  { %6367 = vmatpush3.bf16.msra.mxu1 %v6366_v21  ;;  %v1027_v7 = vsel %vm1011_vm1, %v715_v25, %v699_v61  ;;  %v698_v53 = vmul.f32 0.020408163, %v461_v47  ;;  %6383 = vmatprep.subr.bf16.mxu0 %v6815_v44  ;;  %v1691_v25 = vld [vmem:[%s9608_s8 + $0x8] sm:$0xff]  ;;  %v1711_v47 = vld [vmem:[%s9605_s5] sm:$0x3] }
  0xc7   :  { %v668_v28 = vrot.slane %v667_v20, 1  ;;  %1598 = vmatprep.mubr.f32.mxu1 %v1027_v7  ;;  %6368 = vmatprep.subr.bf16.mxu1 %v6815_v44  ;;  %v1692_v7 = vld [vmem:[%s9608_s8 + $0x10] sm:$0xff] }
  0xc9   :  { %v669_v5 = vadd.f32 %v668_v28, %v667_v20  ;;  %6385 = vmatpush3.bf16.msra.mxu0 %v9048_v6  ;;  %v9090_v20 = vpack.c.bf16 %v1691_v25, %v1690_v46  ;;  %v1693_v28 = vld [vmem:[%s9608_s8 + $0x18] sm:$0xff] }
  0xca   :  { %6404 = vmatprep.subr.bf16.mxu0 %v6815_v44 }
  0xcb   :  { %v714_v14 = vmul.f32 0.020408163, %v669_v5  ;;  %v9101_v5 = vpack.c.bf16 %v1693_v28, %v1692_v7 }
  0xcc   :  { %5692 = vmatmul.mubr.f32.vlgmr.msra.gmra.mrb[8].mxu0 %v6817_v38 }
  0xcd   :  { %v1026_v41 = vsel %vm1011_vm1, %v714_v14, %v698_v53  ;;  %6406 = vmatpush3.bf16.msra.mxu0 %v9058_v50  ;;  %5735 = vmatprep.mubr.msk.f32.mxu0 %vm6816_vm2, %v6817_v38 }
  0xce   :  { %1599 = vmatmul.mubr.f32.vlgmr.msra.gmra.mrb[6].mxu1 %v1026_v41  ;;  %6407 = vmatprep.subr.bf16.mxu0 %v6815_v44 }
  0xcf   :  { %6370 = vmatpush3.bf16.msra.mxu1 %v6369_v55  ;;  %5669 = vmatprep.mubr.msk.f32.mxu1 %vm6816_vm2, %v6817_v38 }
  0xd0   :  { %6371 = vmatprep.subr.bf16.mxu1 %v6815_v44 }
  0xd1   :  { %6409 = vmatpush3.bf16.msra.mxu0 %v9071_v10 }
  0xd2   :  { %6410 = vmatprep.subr.bf16.mxu0 %v6815_v44 }
  0xd3   :  { %6373 = vmatpush3.bf16.msra.mxu1 %v6372_v24 }
  0xd4   :  { %6374 = vmatprep.subr.bf16.mxu1 %v6815_v44  ;;  %5736 = vmatmul.mubr.msk.f32.vlgmr.msra.gmra.mrb[10].mxu0 %vm1616_vm3, %v5120_v9 }
  0xd5   :  { %6412 = vmatpush3.bf16.msra.mxu0 %v9038_v18  ;;  %5746 = vmatprep.mubr.msk.f32.mxu0 %vm6816_vm2, %v6817_v38 }
  0xd6   :  { %6413 = vmatprep.subr.bf16.mxu0 %v6815_v44 }
  0xd9   :  { %6415 = vmatpush3.bf16.msra.mxu0 %v9048_v6 }
  0xda   :  { %6416 = vmatprep.subr.bf16.mxu0 %v6815_v44 }
 0x10c   :  { %v5208_v2 = vpop.f32.mrb[0].mxu0 }
 0x10d   :  { %v5209_v4 = vpop.f32.mrb[1].mxu0 }
 0x10e   :  { %v5210_v26 = vadd.f32 %v5209_v4, %v5208_v2  ;;  %v5113_v4 = vld [vmem:[%s9604_s4] ss:$0 sm:$0xff]  ;;  %s6819_s4 = smov 32  }
 0x110   :  { %v1111_v52 = vadd.f32 %v5210_v26, %v5112_v8 }
 0x117   :  { %v5243_v11 = vpop.f32.mrb[0].mxu1 }
 0x118   :  { %v5244_v19 = vpop.f32.mrb[1].mxu1 }
 0x119   :  { %v5245_v15 = vadd.f32 %v5244_v19, %v5243_v11 }
 0x11b   :  { %v1181_v49 = vadd.f32 %v5245_v15, %v1111_v52 }
 0x137   :  { %v5278_v48 = vpop.f32.mrb[2].mxu0 }
 0x138   :  { %v5279_v3 = vpop.f32.mrb[3].mxu0 }
 0x139   :  { %v5280_v57 = vadd.f32 %v5279_v3, %v5278_v48  ;;  %v9140_v48 = vpack.c.bf16 %v1705_v58, %v1704_v30  ;;  %v1698_v3 = vld [vmem:[%s9610_s10] sm:$0xff] }
 0x13b   :  { %v1251_v0 = vadd.f32 %v5280_v57, %v1181_v49  ;;  %v1699_v57 = vld [vmem:[%s9610_s10 + $0x8] sm:$0xff] }
 0x146   :  { %v5313_v16 = vpop.f32.mrb[2].mxu1 }
 0x147   :  { %v5314_v51 = vpop.f32.mrb[3].mxu1 }
 0x148   :  { %v5315_v34 = vadd.f32 %v5314_v51, %v5313_v16  ;;  %v1700_v16 = vld [vmem:[%s9610_s10 + $0x10] sm:$0xff]  ;;  %v1701_v51 = vld [vmem:[%s9610_s10 + $0x18] sm:$0xff] }
 0x14a   :  { %v1321_v63 = vadd.f32 %v5315_v34, %v1251_v0  ;;  %v9155_v0 = vpack.c.bf16 %v1699_v57, %v1698_v3 }
 0x165   :  { %v5348_v1 = vpop.f32.mrb[4].mxu0 }
 0x166   :  { %v5349_v17 = vpop.f32.mrb[5].mxu0 }
 0x167   :  { %v5350_v27 = vadd.f32 %v5349_v17, %v5348_v1 }
 0x169   :  { %v1391_v43 = vadd.f32 %v5350_v27, %v1321_v63  ;;  %v9169_v63 = vpack.c.bf16 %v1701_v51, %v1700_v16 }
 0x174   :  { %v5383_v33 = vpop.f32.mrb[4].mxu1 }
 0x175   :  { %v5384_v35 = vpop.f32.mrb[5].mxu1 }
 0x176   :  { %v5385_v40 = vadd.f32 %v5384_v35, %v5383_v33 }
 0x178   :  { %v1461_v36 = vadd.f32 %v5385_v40, %v1391_v43  ;;  %v9194_v43 = vld [vmem:[%s9607_s7] ss:$0 sm:$0xff] }
 0x195   :  { %v5418_v13 = vpop.f32.mrb[6].mxu0 }
 0x196   :  { %v5419_v21 = vpop.f32.mrb[7].mxu0 }
 0x197   :  { %v5420_v29 = vadd.f32 %v5419_v21, %v5418_v13 }
 0x199   :  { %v1531_v54 = vadd.f32 %v5420_v29, %v1461_v36 }
 0x19f   :  { %v1860_v53 = vpop.f32.mrb[8].mxu0 }
 0x1a0   :  { %v5693_v14 = vpop.f32.mrb[9].mxu0 }
 0x1a1   :  { %v5453_v32 = vpop.f32.mrb[6].mxu1 }
 0x1a2   :  { %v5454_v42 = vpop.f32.mrb[7].mxu1 }
 0x1a3   :  { %v5455_v62 = vadd.f32 %v5454_v42, %v5453_v32 }
 0x1a5   :  { %v1601_v61 = vadd.f32 %v5455_v62, %v1531_v54 }
 0x1a7   :  { %v1604_v31 = vmax.f32 %v1601_v61, 0.0 }
 0x1a9   :  { %5670 = vmatmul.mubr.msk.f32.vlgmr.msra.gmra.mrb[8].mxu1 %vm1616_vm3, %v1604_v31 }
 0x1aa   :  { %6376 = vmatpush3.bf16.msra.mxu1 %v9058_v50  ;;  %5680 = vmatprep.mubr.msk.f32.mxu1 %vm6816_vm2, %v6817_v38 }
 0x1ab   :  { %6377 = vmatprep.subr.bf16.mxu1 %v6815_v44 }
 0x1ae   :  { %6379 = vmatpush3.bf16.msra.mxu1 %v9071_v10 }
 0x1af   :  { %6386 = vmatprep.subr.bf16.mxu1 %v6815_v44 }
 0x1b1   :  { %5681 = vmatmul.mubr.msk.f32.vlgmr.msra.gmra.mrb[10].mxu1 %vm1616_vm3, %v1711_v47 }
 0x1b2   :  { %6388 = vmatpush3.bf16.msra.mxu1 %v9090_v20  ;;  %5702 = vmatprep.mubr.msk.f32.mxu1 %vm6816_vm2, %v6817_v38 }
 0x1b3   :  { %6389 = vmatprep.subr.bf16.mxu1 %v6815_v44 }
 0x1b6   :  { %6391 = vmatpush3.bf16.msra.mxu1 %v9101_v5 }
 0x1b7   :  { %6392 = vmatprep.subr.bf16.mxu1 %v6815_v44 }
 0x1b9   :  { %5703 = vmatmul.mubr.f32.vlgmr.msra.gmra.mrb[12].mxu1 %v6817_v38 }
 0x1ba   :  { %5713 = vmatprep.mubr.msk.f32.mxu1 %vm6816_vm2, %v6817_v38  ;;  %6394 = vmatpush3.bf16.msra.mxu1 %v9131_v60 }
 0x1bb   :  { %6395 = vmatprep.subr.bf16.mxu1 %v6815_v44 }
 0x1be   :  { %6397 = vmatpush3.bf16.msra.mxu1 %v9140_v48 }
 0x1bf   :  { %6398 = vmatprep.subr.bf16.mxu1 %v6815_v44 }
 0x1c1   :  { %5714 = vmatmul.mubr.f32.vlgmr.msra.gmra.mrb[10].mxu1 %v6817_v38 }
 0x1c2   :  { %6400 = vmatpush3.bf16.msra.mxu1 %v9155_v0  ;;  %5724 = vmatprep.mubr.msk.f32.mxu1 %vm6816_vm2, %v6817_v38 }
 0x1c3   :  { %6401 = vmatprep.subr.bf16.mxu1 %v6815_v44 }
 0x1c6   :  { %6403 = vmatpush3.bf16.msra.mxu1 %v9169_v63 }
 0x1c7   :  { %6434 = vmatprep.subr.bf16.mxu1 %v6815_v44 }
 0x27c   :  { %v1686_v41 = vpop.f32.mrb[8].mxu1 }
 0x27d   :  { %v5671_v2 = vpop.f32.mrb[9].mxu1  ;;  %v9114_v56 = vadd.f32 %v5113_v4, %v1686_v41 }
 0x28c   :  { %v1930_v26 = vpop.f32.mrb[12].mxu1 }
 0x28d   :  { %v1931_v12 = vadd.f32 %v1930_v26, %v1860_v53  ;;  %v5704_v55 = vpop.f32.mrb[13].mxu1 }
 0x28f   :  { %v1934_v23 = vadd.f32 %v1931_v12, %v9114_v56 }
 0x291   :  { %6662 = vtanh.f32 %v1934_v23  ;;  %v5117_v24 = vmul.f32 -1.442695, %v1934_v23 }
 0x293   :  { %6664 = vpow2.f32 %v5117_v24 }
 0x29b   :  { %v6663_v45 = vpop.eup %6662 }
 0x29c   :  { %1944 = vrot.lane.b32.xlu0 %v6663_v45, %s6818_s18 }
 0x29d   :  { %v6665_v8 = vpop.eup %6664 }
 0x29e   :  { %v1938_v52 = vadd.f32 1.0, %v6665_v8 }
 0x2a0   :  { %6666 = vrcp.f32 %v1938_v52 }
 0x2aa   :  { %v6667_v11 = vpop.eup %6666 }
 0x2ab   :  { %v1942_v49 = vmul.f32 0.0, %v6667_v11 }
 0x30e   :  { %v1945_v19 = vpop.permute.xlu0 %1944 }
 0x30f   :  { %v1947_v15 = vmul.f32 %v6667_v11, %v1945_v19 }
 0x311   :  { %1949 = vrot.lane.b32.xlu0 %v1947_v15, %s6819_s4  ;;  %v5128_v15 = vld [vmem:[%s9605_s5 + $0x4] sm:$0x3] }
 0x383   :  { %v1950_v37 = vpop.permute.xlu0 %1949 }
 0x384   :  { %v9119_v59 = vadd.f32 %v1950_v37, %v1942_v49 }
 0x386   :  { %6668 = vtanh.f32 %v9119_v59 }
 0x390   :  { %v6669_v34 = vpop.eup %6668 }
 0x391   :  { %1955 = vrot.lane.b32.xlu1 %v6669_v34, %s6818_s18 }
 0x403   :  { %v1956_v1 = vpop.permute.xlu1 %1955 }
 0x404   :  { %v1958_v17 = vmul.f32 %v6667_v11, %v1956_v1 }
 0x406   :  { %2030 = vrot.lane.b32.xlu1 %v1958_v17, %s6819_s4 }
 0x478   :  { %v2031_v27 = vpop.permute.xlu1 %2030 }
 0x479   :  { %5725 = vmatmul.mubr.msk.f32.vlgmr.msra.gmra.mrb[10].mxu1 %vm1616_vm3, %v2031_v27  ;;  %5747 = vmatmul.mubr.msk.f32.vlgmr.msra.gmra.mrb[12].mxu0 %vm1616_vm3, %v2031_v27 }
 0x47a   :  { %6418 = vmatpush3.bf16.msra.mxu0 %v9090_v20  ;;  %5757 = vmatprep.mubr.msk.f32.mxu0 %vm6816_vm2, %v6817_v38 }
 0x47b   :  { %6419 = vmatprep.subr.bf16.mxu0 %v6815_v44  ;;  %6436 = vmatpush3.bf16.msra.mxu1 %v9058_v50 }
 0x47c   :  { %6437 = vmatprep.subr.bf16.mxu1 %v6815_v44  ;;  %5790 = vmatprep.mubr.msk.f32.mxu1 %vm6816_vm2, %v6817_v38 }
 0x47e   :  { %6421 = vmatpush3.bf16.msra.mxu0 %v9101_v5 }
 0x47f   :  { %6422 = vmatprep.subr.bf16.mxu0 %v6815_v44  ;;  %6439 = vmatpush3.bf16.msra.mxu1 %v9071_v10 }
 0x480   :  { %6440 = vmatprep.subr.bf16.mxu1 %v6815_v44 }
 0x482   :  { %5791 = vmatmul.mubr.msk.f32.vlgmr.msra.gmra.mrb[14].mxu1 %vm1616_vm3, %v5128_v15 }
 0x483   :  { %6442 = vmatpush3.bf16.msra.mxu1 %v9038_v18  ;;  %5801 = vmatprep.mubr.msk.f32.mxu1 %vm6816_vm2, %v6817_v38 }
 0x484   :  { %6443 = vmatprep.subr.bf16.mxu1 %v6815_v44 }
 0x487   :  { %6445 = vmatpush3.bf16.msra.mxu1 %v9048_v6 }
 0x488   :  { %6446 = vmatprep.subr.bf16.mxu1 %v6815_v44 }
 0x54c   :  { %v2100_v33 = vpop.f32.mrb[10].mxu1  ;;  %v2276_v35 = vpop.f32.mrb[12].mxu0 }
 0x54d   :  { %v6614_v40 = vadd.f32 %v9194_v43, %v2100_v33  ;;  %v5726_v36 = vpop.f32.mrb[11].mxu1  ;;  %v5748_v13 = vpop.f32.mrb[13].mxu0 }
 0x54f   :  { %6670 = vtanh.f32 %v6614_v40  ;;  %v5119_v29 = vmul.f32 -1.442695, %v6614_v40 }
 0x551   :  { %6672 = vpow2.f32 %v5119_v29 }
 0x559   :  { %v6671_v21 = vpop.eup %6670 }
 0x55a   :  { %2114 = vrot.lane.b32.xlu0 %v6671_v21, %s6818_s18 }
 0x55b   :  { %v6673_v54 = vpop.eup %6672 }
 0x55c   :  { %v2108_v32 = vadd.f32 1.0, %v6673_v54 }
 0x55e   :  { %6674 = vrcp.f32 %v2108_v32 }
 0x568   :  { %v6675_v42 = vpop.eup %6674 }
 0x569   :  { %v2112_v31 = vmul.f32 0.0, %v6675_v42 }
 0x5cc   :  { %v2115_v62 = vpop.permute.xlu0 %2114 }
 0x5cd   :  { %v2117_v61 = vmul.f32 %v6675_v42, %v2115_v62 }
 0x5cf   :  { %2119 = vrot.lane.b32.xlu1 %v2117_v61, %s6819_s4 }
 0x641   :  { %v2120_v46 = vpop.permute.xlu1 %2119 }
 0x642   :  { %v9199_v25 = vadd.f32 %v2120_v46, %v2112_v31 }
 0x644   :  { %2281 = vrot.lane.b32.xlu0 %v9199_v25, %s6820_s15 }
 0x6b6   :  { %v2282_v47 = vpop.permute.xlu0 %2281 }
 0x6b7   :  { %5758 = vmatmul.mubr.msk.f32.vlgmr.msra.gmra.mrb[14].mxu0 %vm1616_vm3, %v2282_v47 }
 0x6b8   :  { %6424 = vmatpush3.bf16.msra.mxu0 %v9131_v60  ;;  %5768 = vmatprep.mubr.msk.f32.mxu0 %vm6816_vm2, %v6817_v38 }
 0x6b9   :  { %6425 = vmatprep.subr.bf16.mxu0 %v6815_v44 }
 0x6bc   :  { %6427 = vmatpush3.bf16.msra.mxu0 %v9140_v48 }
 0x6bd   :  { %6428 = vmatprep.subr.bf16.mxu0 %v6815_v44 }
 0x78a   :  { %v2351_v7 = vpop.f32.mrb[14].mxu0 }
 0x78b   :  { %v2352_v28 = vadd.f32 %v2351_v7, %v2276_v35  ;;  %v5759_v53 = vpop.f32.mrb[15].mxu0 }
 0x78d   :  { %v2355_v14 = vadd.f32 %v2352_v28, %v9114_v56 }
 0x78f   :  { %6676 = vtanh.f32 %v2355_v14  ;;  %v5124_v4 = vmul.f32 -1.442695, %v2355_v14 }
 0x790   :  { %6678 = vtanh.f32 %v9199_v25 }
 0x791   :  { %6680 = vpow2.f32 %v5124_v4  ;;  %v5136_v4 = vld [vmem:[%s9605_s5 + $0x6] sm:$0x3] }
 0x799   :  { %v6677_v41 = vpop.eup %6676 }
 0x79a   :  { %2365 = vrot.lane.b32.xlu1 %v6677_v41, %s6818_s18  ;;  %v6679_v2 = vpop.eup %6678 }
 0x79b   :  { %v6681_v26 = vpop.eup %6680 }
 0x79c   :  { %v2359_v12 = vadd.f32 1.0, %v6681_v26 }
 0x79e   :  { %2125 = vrot.lane.b32.xlu1 %v6679_v2, %s6818_s18  ;;  %6682 = vrcp.f32 %v2359_v12 }
 0x7a8   :  { %v6683_v55 = vpop.eup %6682 }
 0x7a9   :  { %v2363_v52 = vmul.f32 %v6683_v55, %v9119_v59 }
 0x80c   :  { %v2366_v23 = vpop.permute.xlu1 %2365 }
 0x80d   :  { %v2368_v45 = vmul.f32 %v6683_v55, %v2366_v23 }
 0x80f   :  { %2370 = vrot.lane.b32.xlu0 %v2368_v45, %s6819_s4 }
 0x810   :  { %v2126_v24 = vpop.permute.xlu1 %2125 }
 0x811   :  { %v2128_v8 = vmul.f32 %v6675_v42, %v2126_v24 }
 0x813   :  { %2130 = vrot.lane.b32.xlu1 %v2128_v8, %s6819_s4 }
 0x881   :  { %v2371_v11 = vpop.permute.xlu0 %2370 }
 0x882   :  { %v9217_v19 = vadd.f32 %v2371_v11, %v2363_v52 }
 0x884   :  { %6684 = vtanh.f32 %v9217_v19 }
 0x885   :  { %v2131_v49 = vpop.permute.xlu1 %2130 }
 0x886   :  { %2134 = vst.msk [vmem:[#allocation2] sm:$0x3] %vm2133_vm4, %v2131_v49  ;;  %5769 = vmatmul.mubr.msk.f32.vlgmr.msra.gmra.mrb[10].mxu0 %vm1616_vm3, %v2131_v49 }
 0x887   :  { %6430 = vmatpush3.bf16.msra.mxu0 %v9155_v0  ;;  %5779 = vmatprep.mubr.msk.f32.mxu0 %vm6816_vm2, %v6817_v38 }
 0x888   :  { %6431 = vmatprep.subr.bf16.mxu0 %v6815_v44 }
 0x88b   :  { %6433 = vmatpush3.bf16.msra.mxu0 %v9169_v63 }
 0x88c   :  { %6464 = vmatprep.subr.bf16.mxu0 %v6815_v44 }
 0x88e   :  { %v6685_v37 = vpop.eup %6684 }
 0x88f   :  { %2376 = vrot.lane.b32.xlu0 %v6685_v37, %s6818_s18 }
 0x901   :  { %v2377_v59 = vpop.permute.xlu0 %2376 }
 0x902   :  { %v2379_v22 = vmul.f32 %v6683_v55, %v2377_v59 }
 0x904   :  { %2453 = vrot.lane.b32.xlu0 %v2379_v22, %s6819_s4 }
 0x976   :  { %v2454_v39 = vpop.permute.xlu0 %2453 }
 0x977   :  { %5780 = vmatmul.mubr.msk.f32.vlgmr.msra.gmra.mrb[10].mxu0 %vm1616_vm3, %v2454_v39  ;;  %5802 = vmatmul.mubr.msk.f32.vlgmr.msra.gmra.mrb[16].mxu1 %vm1616_vm3, %v2454_v39 }
 0x978   :  { %6448 = vmatpush3.bf16.msra.mxu1 %v9090_v20  ;;  %5812 = vmatprep.mubr.msk.f32.mxu1 %vm6816_vm2, %v6817_v38 }
 0x979   :  { %6449 = vmatprep.subr.bf16.mxu1 %v6815_v44  ;;  %6466 = vmatpush3.bf16.msra.mxu0 %v9058_v50 }
 0x97a   :  { %6467 = vmatprep.subr.bf16.mxu0 %v6815_v44  ;;  %5845 = vmatprep.mubr.msk.f32.mxu0 %vm6816_vm2, %v6817_v38 }
 0x97c   :  { %6451 = vmatpush3.bf16.msra.mxu1 %v9101_v5 }
 0x97d   :  { %6452 = vmatprep.subr.bf16.mxu1 %v6815_v44  ;;  %6469 = vmatpush3.bf16.msra.mxu0 %v9071_v10 }
 0x97e   :  { %6470 = vmatprep.subr.bf16.mxu0 %v6815_v44 }
 0x980   :  { %5846 = vmatmul.mubr.msk.f32.vlgmr.msra.gmra.mrb[16].mxu0 %vm1616_vm3, %v5136_v4 }
 0x981   :  { %6472 = vmatpush3.bf16.msra.mxu0 %v9038_v18  ;;  %5856 = vmatprep.mubr.msk.f32.mxu0 %vm6816_vm2, %v6817_v38 }
 0x982   :  { %6473 = vmatprep.subr.bf16.mxu0 %v6815_v44 }
 0x985   :  { %6475 = vmatpush3.bf16.msra.mxu0 %v9048_v6 }
 0x986   :  { %6476 = vmatprep.subr.bf16.mxu0 %v6815_v44 }
 0xa4a   :  { %v2523_v30 = vpop.f32.mrb[10].mxu0  ;;  %v2699_v58 = vpop.f32.mrb[16].mxu1 }
 0xa4b   :  { %v6615_v9 = vadd.f32 %v9194_v43, %v2523_v30  ;;  %v5781_v3 = vpop.f32.mrb[11].mxu0  ;;  %v5803_v57 = vpop.f32.mrb[17].mxu1 }
 0xa4d   :  { %6686 = vtanh.f32 %v6615_v9  ;;  %v5127_v51 = vmul.f32 -1.442695, %v6615_v9 }
 0xa4f   :  { %6688 = vpow2.f32 %v5127_v51 }
 0xa57   :  { %v6687_v16 = vpop.eup %6686 }
 0xa58   :  { %2537 = vrot.lane.b32.xlu1 %v6687_v16, %s6818_s18 }
 0xa59   :  { %v6689_v34 = vpop.eup %6688 }
 0xa5a   :  { %v2531_v1 = vadd.f32 1.0, %v6689_v34 }
 0xa5c   :  { %6690 = vrcp.f32 %v2531_v1 }
 0xa66   :  { %v6691_v17 = vpop.eup %6690 }
 0xa67   :  { %v2535_v35 = vmul.f32 %v6691_v17, %v9199_v25 }
 0xaca   :  { %v2538_v27 = vpop.permute.xlu1 %2537 }
 0xacb   :  { %v2540_v33 = vmul.f32 %v6691_v17, %v2538_v27 }
 0xacd   :  { %2542 = vrot.lane.b32.xlu0 %v2540_v33, %s6819_s4 }
 0xb3f   :  { %v2543_v40 = vpop.permute.xlu0 %2542 }
 0xb40   :  { %v9258_v36 = vadd.f32 %v2543_v40, %v2535_v35 }
 0xb42   :  { %2704 = vrot.lane.b32.xlu1 %v9258_v36, %s6820_s15 }
 0xbb4   :  { %v2705_v13 = vpop.permute.xlu1 %2704 }
 0xbb5   :  { %5813 = vmatmul.mubr.msk.f32.vlgmr.msra.gmra.mrb[18].mxu1 %vm1616_vm3, %v2705_v13 }
 0xbb6   :  { %6454 = vmatpush3.bf16.msra.mxu1 %v9131_v60  ;;  %5823 = vmatprep.mubr.msk.f32.mxu1 %vm6816_vm2, %v6817_v38 }
 0xbb7   :  { %6455 = vmatprep.subr.bf16.mxu1 %v6815_v44 }
 0xbba   :  { %6457 = vmatpush3.bf16.msra.mxu1 %v9140_v48 }
 0xbbb   :  { %6458 = vmatprep.subr.bf16.mxu1 %v6815_v44 }
 0xc88   :  { %v2774_v21 = vpop.f32.mrb[18].mxu1 }
 0xc89   :  { %v2775_v29 = vadd.f32 %v2774_v21, %v2699_v58  ;;  %v5814_v54 = vpop.f32.mrb[19].mxu1 }
 0xc8b   :  { %v2778_v32 = vadd.f32 %v2775_v29, %v9114_v56 }
 0xc8d   :  { %6692 = vtanh.f32 %v2778_v32  ;;  %v5132_v61 = vmul.f32 -1.442695, %v2778_v32 }
 0xc8e   :  { %6694 = vtanh.f32 %v9258_v36 }
 0xc8f   :  { %6696 = vpow2.f32 %v5132_v61  ;;  %v5144_v61 = vld [vmem:[%s9605_s5 + $0x8] sm:$0x3] }
 0xc97   :  { %v6693_v42 = vpop.eup %6692 }
 0xc98   :  { %2788 = vrot.lane.b32.xlu0 %v6693_v42, %s6818_s18  ;;  %v6695_v62 = vpop.eup %6694 }
 0xc99   :  { %v6697_v31 = vpop.eup %6696 }
 0xc9a   :  { %v2782_v46 = vadd.f32 1.0, %v6697_v31 }
 0xc9c   :  { %2548 = vrot.lane.b32.xlu0 %v6695_v62, %s6818_s18  ;;  %6698 = vrcp.f32 %v2782_v46 }
 0xca6   :  { %v6699_v25 = vpop.eup %6698 }
 0xca7   :  { %v2786_v14 = vmul.f32 %v6699_v25, %v9217_v19 }
 0xd0a   :  { %v2789_v47 = vpop.permute.xlu0 %2788 }
 0xd0b   :  { %v2791_v7 = vmul.f32 %v6699_v25, %v2789_v47 }
 0xd0d   :  { %2793 = vrot.lane.b32.xlu1 %v2791_v7, %s6819_s4 }
 0xd0e   :  { %v2549_v28 = vpop.permute.xlu0 %2548 }
 0xd0f   :  { %v2551_v53 = vmul.f32 %v6691_v17, %v2549_v28 }
 0xd11   :  { %2553 = vrot.lane.b32.xlu0 %v2551_v53, %s6819_s4 }
 0xd7f   :  { %v2794_v41 = vpop.permute.xlu1 %2793 }
 0xd80   :  { %v9276_v2 = vadd.f32 %v2794_v41, %v2786_v14 }
 0xd82   :  { %6700 = vtanh.f32 %v9276_v2 }
 0xd83   :  { %v2554_v26 = vpop.permute.xlu0 %2553 }
 0xd84   :  { %2557 = vst.msk [vmem:[#allocation2 + $0x2] sm:$0x3] %vm2133_vm4, %v2554_v26  ;;  %5824 = vmatmul.mubr.msk.f32.vlgmr.msra.gmra.mrb[14].mxu1 %vm1616_vm3, %v2554_v26 }
 0xd85   :  { %6460 = vmatpush3.bf16.msra.mxu1 %v9155_v0  ;;  %5834 = vmatprep.mubr.msk.f32.mxu1 %vm6816_vm2, %v6817_v38 }
 0xd86   :  { %6461 = vmatprep.subr.bf16.mxu1 %v6815_v44 }
 0xd89   :  { %6463 = vmatpush3.bf16.msra.mxu1 %v9169_v63 }
 0xd8a   :  { %6494 = vmatprep.subr.bf16.mxu1 %v6815_v44 }
 0xd8c   :  { %v6701_v12 = vpop.eup %6700 }
 0xd8d   :  { %2799 = vrot.lane.b32.xlu1 %v6701_v12, %s6818_s18 }
 0xdff   :  { %v2800_v55 = vpop.permute.xlu1 %2799 }
 0xe00   :  { %v2802_v23 = vmul.f32 %v6699_v25, %v2800_v55 }
 0xe02   :  { %2876 = vrot.lane.b32.xlu1 %v2802_v23, %s6819_s4 }
 0xe74   :  { %v2877_v45 = vpop.permute.xlu1 %2876 }
 0xe75   :  { %5835 = vmatmul.mubr.msk.f32.vlgmr.msra.gmra.mrb[14].mxu1 %vm1616_vm3, %v2877_v45  ;;  %5857 = vmatmul.mubr.msk.f32.vlgmr.msra.gmra.mrb[18].mxu0 %vm1616_vm3, %v2877_v45 }
 0xe76   :  { %6478 = vmatpush3.bf16.msra.mxu0 %v9090_v20  ;;  %5867 = vmatprep.mubr.msk.f32.mxu0 %vm6816_vm2, %v6817_v38 }
 0xe77   :  { %6479 = vmatprep.subr.bf16.mxu0 %v6815_v44  ;;  %6496 = vmatpush3.bf16.msra.mxu1 %v9058_v50 }
 0xe78   :  { %6497 = vmatprep.subr.bf16.mxu1 %v6815_v44  ;;  %5900 = vmatprep.mubr.msk.f32.mxu1 %vm6816_vm2, %v6817_v38 }
 0xe7a   :  { %6481 = vmatpush3.bf16.msra.mxu0 %v9101_v5 }
 0xe7b   :  { %6482 = vmatprep.subr.bf16.mxu0 %v6815_v44  ;;  %6499 = vmatpush3.bf16.msra.mxu1 %v9071_v10 }
 0xe7c   :  { %6500 = vmatprep.subr.bf16.mxu1 %v6815_v44 }
 0xe7e   :  { %5901 = vmatmul.mubr.msk.f32.vlgmr.msra.gmra.mrb[20].mxu1 %vm1616_vm3, %v5144_v61 }
 0xe7f   :  { %6502 = vmatpush3.bf16.msra.mxu1 %v9038_v18  ;;  %5911 = vmatprep.mubr.msk.f32.mxu1 %vm6816_vm2, %v6817_v38 }
 0xe80   :  { %6503 = vmatprep.subr.bf16.mxu1 %v6815_v44 }
 0xe83   :  { %6505 = vmatpush3.bf16.msra.mxu1 %v9048_v6 }
 0xe84   :  { %6506 = vmatprep.subr.bf16.mxu1 %v6815_v44 }
 0xf48   :  { %v2946_v24 = vpop.f32.mrb[14].mxu1  ;;  %v3122_v8 = vpop.f32.mrb[18].mxu0 }
 0xf49   :  { %v6616_v52 = vadd.f32 %v9194_v43, %v2946_v24  ;;  %v5836_v11 = vpop.f32.mrb[15].mxu1  ;;  %v5858_v19 = vpop.f32.mrb[19].mxu0 }
 0xf4b   :  { %6702 = vtanh.f32 %v6616_v52  ;;  %v5135_v49 = vmul.f32 -1.442695, %v6616_v52 }
 0xf4d   :  { %6704 = vpow2.f32 %v5135_v49 }
 0xf55   :  { %v6703_v15 = vpop.eup %6702 }
 0xf56   :  { %2960 = vrot.lane.b32.xlu0 %v6703_v15, %s6818_s18 }
 0xf57   :  { %v6705_v37 = vpop.eup %6704 }
 0xf58   :  { %v2954_v59 = vadd.f32 1.0, %v6705_v37 }
 0xf5a   :  { %6706 = vrcp.f32 %v2954_v59 }
 0xf64   :  { %v6707_v22 = vpop.eup %6706 }
 0xf65   :  { %v2958_v58 = vmul.f32 %v6707_v22, %v9258_v36 }
 0xfc8   :  { %v2961_v39 = vpop.permute.xlu0 %2960 }
 0xfc9   :  { %v2963_v30 = vmul.f32 %v6707_v22, %v2961_v39 }
 0xfcb   :  { %2965 = vrot.lane.b32.xlu1 %v2963_v30, %s6819_s4 }
0x103d   :  { %v2966_v9 = vpop.permute.xlu1 %2965 }
0x103e   :  { %v9317_v3 = vadd.f32 %v2966_v9, %v2958_v58 }
0x1040   :  { %3127 = vrot.lane.b32.xlu0 %v9317_v3, %s6820_s15 }
0x10b2   :  { %v3128_v57 = vpop.permute.xlu0 %3127 }
0x10b3   :  { %5868 = vmatmul.mubr.msk.f32.vlgmr.msra.gmra.mrb[20].mxu0 %vm1616_vm3, %v3128_v57 }
0x10b4   :  { %6484 = vmatpush3.bf16.msra.mxu0 %v9131_v60  ;;  %5878 = vmatprep.mubr.msk.f32.mxu0 %vm6816_vm2, %v6817_v38 }
0x10b5   :  { %6485 = vmatprep.subr.bf16.mxu0 %v6815_v44 }
0x10b8   :  { %6487 = vmatpush3.bf16.msra.mxu0 %v9140_v48 }
0x10b9   :  { %6488 = vmatprep.subr.bf16.mxu0 %v6815_v44 }
0x1186   :  { %v3197_v16 = vpop.f32.mrb[20].mxu0 }
0x1187   :  { %v3198_v51 = vadd.f32 %v3197_v16, %v3122_v8  ;;  %v5869_v34 = vpop.f32.mrb[21].mxu0 }
0x1189   :  { %v3201_v1 = vadd.f32 %v3198_v51, %v9114_v56 }
0x118b   :  { %6708 = vtanh.f32 %v3201_v1  ;;  %v5140_v33 = vmul.f32 -1.442695, %v3201_v1 }
0x118c   :  { %6710 = vtanh.f32 %v9317_v3 }
0x118d   :  { %6712 = vpow2.f32 %v5140_v33  ;;  %v5152_v33 = vld [vmem:[%s9605_s5 + $0xa] sm:$0x3] }
0x1195   :  { %v6709_v17 = vpop.eup %6708 }
0x1196   :  { %3211 = vrot.lane.b32.xlu1 %v6709_v17, %s6818_s18  ;;  %v6711_v27 = vpop.eup %6710 }
0x1197   :  { %v6713_v35 = vpop.eup %6712 }
0x1198   :  { %v3205_v40 = vadd.f32 1.0, %v6713_v35 }
0x119a   :  { %2971 = vrot.lane.b32.xlu1 %v6711_v27, %s6818_s18  ;;  %6714 = vrcp.f32 %v3205_v40 }
0x11a4   :  { %v6715_v36 = vpop.eup %6714 }
0x11a5   :  { %v3209_v32 = vmul.f32 %v6715_v36, %v9276_v2 }
0x1208   :  { %v3212_v13 = vpop.permute.xlu1 %3211 }
0x1209   :  { %v3214_v21 = vmul.f32 %v6715_v36, %v3212_v13 }
0x120b   :  { %3216 = vrot.lane.b32.xlu0 %v3214_v21, %s6819_s4 }
0x120c   :  { %v2972_v29 = vpop.permute.xlu1 %2971 }
0x120d   :  { %v2974_v54 = vmul.f32 %v6707_v22, %v2972_v29 }
0x120f   :  { %2976 = vrot.lane.b32.xlu1 %v2974_v54, %s6819_s4 }
0x127d   :  { %v3217_v42 = vpop.permute.xlu0 %3216 }
0x127e   :  { %v9335_v62 = vadd.f32 %v3217_v42, %v3209_v32 }
0x1280   :  { %6716 = vtanh.f32 %v9335_v62 }
0x1281   :  { %v2977_v31 = vpop.permute.xlu1 %2976 }
0x1282   :  { %2980 = vst.msk [vmem:[#allocation2 + $0x4] sm:$0x3] %vm2133_vm4, %v2977_v31  ;;  %5879 = vmatmul.mubr.msk.f32.vlgmr.msra.gmra.mrb[16].mxu0 %vm1616_vm3, %v2977_v31 }
0x1283   :  { %6490 = vmatpush3.bf16.msra.mxu0 %v9155_v0  ;;  %5889 = vmatprep.mubr.msk.f32.mxu0 %vm6816_vm2, %v6817_v38 }
0x1284   :  { %6491 = vmatprep.subr.bf16.mxu0 %v6815_v44 }
0x1287   :  { %6493 = vmatpush3.bf16.msra.mxu0 %v9169_v63 }
0x1288   :  { %6524 = vmatprep.subr.bf16.mxu0 %v6815_v44 }
0x128a   :  { %v6717_v46 = vpop.eup %6716 }
0x128b   :  { %3222 = vrot.lane.b32.xlu0 %v6717_v46, %s6818_s18 }
0x12fd   :  { %v3223_v25 = vpop.permute.xlu0 %3222 }
0x12fe   :  { %v3225_v47 = vmul.f32 %v6715_v36, %v3223_v25 }
0x1300   :  { %3299 = vrot.lane.b32.xlu0 %v3225_v47, %s6819_s4 }
0x1372   :  { %v3300_v7 = vpop.permute.xlu0 %3299 }
0x1373   :  { %5890 = vmatmul.mubr.msk.f32.vlgmr.msra.gmra.mrb[16].mxu0 %vm1616_vm3, %v3300_v7  ;;  %5912 = vmatmul.mubr.msk.f32.vlgmr.msra.gmra.mrb[22].mxu1 %vm1616_vm3, %v3300_v7 }
0x1374   :  { %6508 = vmatpush3.bf16.msra.mxu1 %v9090_v20  ;;  %5922 = vmatprep.mubr.msk.f32.mxu1 %vm6816_vm2, %v6817_v38 }
0x1375   :  { %6509 = vmatprep.subr.bf16.mxu1 %v6815_v44  ;;  %6526 = vmatpush3.bf16.msra.mxu0 %v9058_v50 }
0x1376   :  { %6527 = vmatprep.subr.bf16.mxu0 %v6815_v44  ;;  %5955 = vmatprep.mubr.msk.f32.mxu0 %vm6816_vm2, %v6817_v38 }
0x1378   :  { %6511 = vmatpush3.bf16.msra.mxu1 %v9101_v5 }
0x1379   :  { %6512 = vmatprep.subr.bf16.mxu1 %v6815_v44  ;;  %6529 = vmatpush3.bf16.msra.mxu0 %v9071_v10 }
0x137a   :  { %6530 = vmatprep.subr.bf16.mxu0 %v6815_v44 }
0x137c   :  { %5956 = vmatmul.mubr.msk.f32.vlgmr.msra.gmra.mrb[22].mxu0 %vm1616_vm3, %v5152_v33 }
0x137d   :  { %6532 = vmatpush3.bf16.msra.mxu0 %v9038_v18  ;;  %5966 = vmatprep.mubr.msk.f32.mxu0 %vm6816_vm2, %v6817_v38 }
0x137e   :  { %6533 = vmatprep.subr.bf16.mxu0 %v6815_v44 }
0x1381   :  { %6535 = vmatpush3.bf16.msra.mxu0 %v9048_v6 }
0x1382   :  { %6536 = vmatprep.subr.bf16.mxu0 %v6815_v44 }
0x1446   :  { %v3369_v28 = vpop.f32.mrb[16].mxu0  ;;  %v3545_v53 = vpop.f32.mrb[22].mxu1 }
0x1447   :  { %v6617_v14 = vadd.f32 %v9194_v43, %v3369_v28  ;;  %v5891_v41 = vpop.f32.mrb[17].mxu0  ;;  %v5913_v2 = vpop.f32.mrb[23].mxu1 }
0x1449   :  { %6718 = vtanh.f32 %v6617_v14  ;;  %v5143_v26 = vmul.f32 -1.442695, %v6617_v14 }
0x144b   :  { %6720 = vpow2.f32 %v5143_v26 }
0x1453   :  { %v6719_v4 = vpop.eup %6718 }
0x1454   :  { %3383 = vrot.lane.b32.xlu1 %v6719_v4, %s6818_s18 }
0x1455   :  { %v6721_v12 = vpop.eup %6720 }
0x1456   :  { %v3377_v55 = vadd.f32 1.0, %v6721_v12 }
0x1458   :  { %6722 = vrcp.f32 %v3377_v55 }
0x1462   :  { %v6723_v23 = vpop.eup %6722 }
0x1463   :  { %v3381_v8 = vmul.f32 %v6723_v23, %v9317_v3 }
0x14c6   :  { %v3384_v45 = vpop.permute.xlu1 %3383 }
0x14c7   :  { %v3386_v24 = vmul.f32 %v6723_v23, %v3384_v45 }
0x14c9   :  { %3388 = vrot.lane.b32.xlu0 %v3386_v24, %s6819_s4 }
0x153b   :  { %v3389_v52 = vpop.permute.xlu0 %3388 }
0x153c   :  { %v9376_v11 = vadd.f32 %v3389_v52, %v3381_v8 }
0x153e   :  { %3550 = vrot.lane.b32.xlu1 %v9376_v11, %s6820_s15 }
0x15b0   :  { %v3551_v19 = vpop.permute.xlu1 %3550 }
0x15b1   :  { %5923 = vmatmul.mubr.msk.f32.vlgmr.msra.gmra.mrb[24].mxu1 %vm1616_vm3, %v3551_v19 }
0x15b2   :  { %6514 = vmatpush3.bf16.msra.mxu1 %v9131_v60  ;;  %5933 = vmatprep.mubr.msk.f32.mxu1 %vm6816_vm2, %v6817_v38 }
0x15b3   :  { %6515 = vmatprep.subr.bf16.mxu1 %v6815_v44 }
0x15b6   :  { %6517 = vmatpush3.bf16.msra.mxu1 %v9140_v48 }
0x15b7   :  { %6518 = vmatprep.subr.bf16.mxu1 %v6815_v44 }
0x1684   :  { %v3620_v15 = vpop.f32.mrb[24].mxu1 }
0x1685   :  { %v3621_v49 = vadd.f32 %v3620_v15, %v3545_v53  ;;  %v5924_v37 = vpop.f32.mrb[25].mxu1 }
0x1687   :  { %v3624_v59 = vadd.f32 %v3621_v49, %v9114_v56 }
0x1689   :  { %6724 = vtanh.f32 %v3624_v59  ;;  %v5148_v30 = vmul.f32 -1.442695, %v3624_v59 }
0x168a   :  { %6726 = vtanh.f32 %v9376_v11 }
0x168b   :  { %6728 = vpow2.f32 %v5148_v30  ;;  %v5160_v30 = vld [vmem:[%s9605_s5 + $0xc] sm:$0x3] }
0x1693   :  { %v6725_v22 = vpop.eup %6724 }
0x1694   :  { %3634 = vrot.lane.b32.xlu0 %v6725_v22, %s6818_s18  ;;  %v6727_v39 = vpop.eup %6726 }
0x1695   :  { %v6729_v58 = vpop.eup %6728 }
0x1696   :  { %v3628_v9 = vadd.f32 1.0, %v6729_v58 }
0x1698   :  { %3394 = vrot.lane.b32.xlu0 %v6727_v39, %s6818_s18  ;;  %6730 = vrcp.f32 %v3628_v9 }
0x16a2   :  { %v6731_v3 = vpop.eup %6730 }
0x16a3   :  { %v3632_v1 = vmul.f32 %v6731_v3, %v9335_v62 }
0x1706   :  { %v3635_v57 = vpop.permute.xlu0 %3634 }
0x1707   :  { %v3637_v16 = vmul.f32 %v6731_v3, %v3635_v57 }
0x1709   :  { %3639 = vrot.lane.b32.xlu1 %v3637_v16, %s6819_s4 }
0x170a   :  { %v3395_v51 = vpop.permute.xlu0 %3394 }
0x170b   :  { %v3397_v34 = vmul.f32 %v6723_v23, %v3395_v51 }
0x170d   :  { %3399 = vrot.lane.b32.xlu0 %v3397_v34, %s6819_s4 }
0x177b   :  { %v3640_v17 = vpop.permute.xlu1 %3639 }
0x177c   :  { %v9394_v27 = vadd.f32 %v3640_v17, %v3632_v1 }
0x177e   :  { %6732 = vtanh.f32 %v9394_v27 }
0x177f   :  { %v3400_v35 = vpop.permute.xlu0 %3399 }
0x1780   :  { %3403 = vst.msk [vmem:[#allocation2 + $0x6] sm:$0x3] %vm2133_vm4, %v3400_v35  ;;  %5934 = vmatmul.mubr.msk.f32.vlgmr.msra.gmra.mrb[20].mxu1 %vm1616_vm3, %v3400_v35 }
0x1781   :  { %6520 = vmatpush3.bf16.msra.mxu1 %v9155_v0  ;;  %5944 = vmatprep.mubr.msk.f32.mxu1 %vm6816_vm2, %v6817_v38 }
0x1782   :  { %6521 = vmatprep.subr.bf16.mxu1 %v6815_v44 }
0x1785   :  { %6523 = vmatpush3.bf16.msra.mxu1 %v9169_v63 }
0x1786   :  { %6554 = vmatprep.subr.bf16.mxu1 %v6815_v44 }
0x1788   :  { %v6733_v40 = vpop.eup %6732 }
0x1789   :  { %3645 = vrot.lane.b32.xlu1 %v6733_v40, %s6818_s18 }
0x17fb   :  { %v3646_v36 = vpop.permute.xlu1 %3645 }
0x17fc   :  { %v3648_v13 = vmul.f32 %v6731_v3, %v3646_v36 }
0x17fe   :  { %3722 = vrot.lane.b32.xlu1 %v3648_v13, %s6819_s4 }
0x1870   :  { %v3723_v21 = vpop.permute.xlu1 %3722 }
0x1871   :  { %5945 = vmatmul.mubr.msk.f32.vlgmr.msra.gmra.mrb[20].mxu1 %vm1616_vm3, %v3723_v21  ;;  %5967 = vmatmul.mubr.msk.f32.vlgmr.msra.gmra.mrb[24].mxu0 %vm1616_vm3, %v3723_v21 }
0x1872   :  { %6538 = vmatpush3.bf16.msra.mxu0 %v9090_v20  ;;  %5977 = vmatprep.mubr.msk.f32.mxu0 %vm6816_vm2, %v6817_v38 }
0x1873   :  { %6539 = vmatprep.subr.bf16.mxu0 %v6815_v44  ;;  %6556 = vmatpush3.bf16.msra.mxu1 %v9058_v50 }
0x1874   :  { %6557 = vmatprep.subr.bf16.mxu1 %v6815_v44  ;;  %6010 = vmatprep.mubr.msk.f32.mxu1 %vm6816_vm2, %v6817_v38 }
0x1876   :  { %6541 = vmatpush3.bf16.msra.mxu0 %v9101_v5 }
0x1877   :  { %6542 = vmatprep.subr.bf16.mxu0 %v6815_v44  ;;  %6559 = vmatpush3.bf16.msra.mxu1 %v9071_v10 }
0x1878   :  { %6560 = vmatprep.subr.bf16.mxu1 %v6815_v44 }
0x187a   :  { %6011 = vmatmul.mubr.msk.f32.vlgmr.msra.gmra.mrb[26].mxu1 %vm1616_vm3, %v5160_v30 }
0x187b   :  { %6562 = vmatpush3.bf16.msra.mxu1 %v9038_v18  ;;  %6021 = vmatprep.mubr.msk.f32.mxu1 %vm6816_vm2, %v6817_v38 }
0x187c   :  { %6563 = vmatprep.subr.bf16.mxu1 %v6815_v44 }
0x187f   :  { %6565 = vmatpush3.bf16.msra.mxu1 %v9048_v6 }
0x1880   :  { %6566 = vmatprep.subr.bf16.mxu1 %v6815_v44 }
0x1944   :  { %v3792_v29 = vpop.f32.mrb[20].mxu1  ;;  %v3968_v54 = vpop.f32.mrb[24].mxu0 }
0x1945   :  { %v6618_v32 = vadd.f32 %v9194_v43, %v3792_v29  ;;  %v5946_v42 = vpop.f32.mrb[21].mxu1  ;;  %v5968_v62 = vpop.f32.mrb[25].mxu0 }
0x1947   :  { %6734 = vtanh.f32 %v6618_v32  ;;  %v5151_v31 = vmul.f32 -1.442695, %v6618_v32 }
0x1949   :  { %6736 = vpow2.f32 %v5151_v31 }
0x1951   :  { %v6735_v61 = vpop.eup %6734 }
0x1952   :  { %3806 = vrot.lane.b32.xlu0 %v6735_v61, %s6818_s18 }
0x1953   :  { %v6737_v46 = vpop.eup %6736 }
0x1954   :  { %v3800_v25 = vadd.f32 1.0, %v6737_v46 }
0x1956   :  { %6738 = vrcp.f32 %v3800_v25 }
0x1960   :  { %v6739_v47 = vpop.eup %6738 }
0x1961   :  { %v3804_v53 = vmul.f32 %v6739_v47, %v9376_v11 }
0x19c4   :  { %v3807_v7 = vpop.permute.xlu0 %3806 }
0x19c5   :  { %v3809_v28 = vmul.f32 %v6739_v47, %v3807_v7 }
0x19c7   :  { %3811 = vrot.lane.b32.xlu1 %v3809_v28, %s6819_s4 }
0x1a39   :  { %v3812_v14 = vpop.permute.xlu1 %3811 }
0x1a3a   :  { %v9435_v41 = vadd.f32 %v3812_v14, %v3804_v53 }
0x1a3c   :  { %3973 = vrot.lane.b32.xlu0 %v9435_v41, %s6820_s15 }
0x1aae   :  { %v3974_v2 = vpop.permute.xlu0 %3973 }
0x1aaf   :  { %5978 = vmatmul.mubr.msk.f32.vlgmr.msra.gmra.mrb[26].mxu0 %vm1616_vm3, %v3974_v2 }
0x1ab0   :  { %6544 = vmatpush3.bf16.msra.mxu0 %v9131_v60  ;;  %5988 = vmatprep.mubr.msk.f32.mxu0 %vm6816_vm2, %v6817_v38 }
0x1ab1   :  { %6545 = vmatprep.subr.bf16.mxu0 %v6815_v44 }
0x1ab4   :  { %6547 = vmatpush3.bf16.msra.mxu0 %v9140_v48 }
0x1ab5   :  { %6548 = vmatprep.subr.bf16.mxu0 %v6815_v44 }
0x1b82   :  { %v4043_v4 = vpop.f32.mrb[26].mxu0 }
0x1b83   :  { %v4044_v26 = vadd.f32 %v4043_v4, %v3968_v54  ;;  %v5979_v12 = vpop.f32.mrb[27].mxu0 }
0x1b85   :  { %v4047_v55 = vadd.f32 %v4044_v26, %v9114_v56 }
0x1b87   :  { %6740 = vtanh.f32 %v4047_v55  ;;  %v5156_v24 = vmul.f32 -1.442695, %v4047_v55  ;;  %v5168_v55 = vld [vmem:[%s9605_s5 + $0xe] sm:$0x3] }
0x1b88   :  { %6742 = vtanh.f32 %v9435_v41 }
0x1b89   :  { %6744 = vpow2.f32 %v5156_v24 }
0x1b91   :  { %v6741_v23 = vpop.eup %6740 }
0x1b92   :  { %4057 = vrot.lane.b32.xlu1 %v6741_v23, %s6818_s18  ;;  %v6743_v45 = vpop.eup %6742 }
0x1b93   :  { %v6745_v8 = vpop.eup %6744 }
0x1b94   :  { %v4051_v52 = vadd.f32 1.0, %v6745_v8 }
0x1b96   :  { %3817 = vrot.lane.b32.xlu1 %v6743_v45, %s6818_s18  ;;  %6746 = vrcp.f32 %v4051_v52 }
0x1ba0   :  { %v6747_v11 = vpop.eup %6746 }
0x1ba1   :  { %v4055_v59 = vmul.f32 %v6747_v11, %v9394_v27 }
0x1c04   :  { %v4058_v19 = vpop.permute.xlu1 %4057 }
0x1c05   :  { %v4060_v15 = vmul.f32 %v6747_v11, %v4058_v19 }
0x1c07   :  { %4062 = vrot.lane.b32.xlu0 %v4060_v15, %s6819_s4 }
0x1c08   :  { %v3818_v49 = vpop.permute.xlu1 %3817 }
0x1c09   :  { %v3820_v37 = vmul.f32 %v6739_v47, %v3818_v49 }
0x1c0b   :  { %3822 = vrot.lane.b32.xlu1 %v3820_v37, %s6819_s4 }
0x1c79   :  { %v4063_v22 = vpop.permute.xlu0 %4062 }
0x1c7a   :  { %v9453_v39 = vadd.f32 %v4063_v22, %v4055_v59 }
0x1c7c   :  { %6748 = vtanh.f32 %v9453_v39 }
0x1c7d   :  { %v3823_v58 = vpop.permute.xlu1 %3822 }
0x1c7e   :  { %3826 = vst.msk [vmem:[#allocation2 + $0x8] sm:$0x3] %vm2133_vm4, %v3823_v58  ;;  %5989 = vmatmul.mubr.msk.f32.vlgmr.msra.gmra.mrb[22].mxu0 %vm1616_vm3, %v3823_v58 }
0x1c7f   :  { %6550 = vmatpush3.bf16.msra.mxu0 %v9155_v0  ;;  %5999 = vmatprep.mubr.msk.f32.mxu0 %vm6816_vm2, %v6817_v38 }
0x1c80   :  { %6551 = vmatprep.subr.bf16.mxu0 %v6815_v44 }
0x1c83   :  { %6553 = vmatpush3.bf16.msra.mxu0 %v9169_v63 }
0x1c84   :  { %6584 = vmatprep.subr.bf16.mxu0 %v6815_v44 }
0x1c86   :  { %v6749_v9 = vpop.eup %6748 }
0x1c87   :  { %4068 = vrot.lane.b32.xlu0 %v6749_v9, %s6818_s18 }
0x1cf9   :  { %v4069_v3 = vpop.permute.xlu0 %4068 }
0x1cfa   :  { %v4071_v57 = vmul.f32 %v6747_v11, %v4069_v3  ;;  %v9545_v11 = vld [vmem:[%s9607_s7] ss:$0 sm:$0xff]  ;;  %s6821_s7 = smov [#allocation2]  }
0x1cfb   :  { %s5101_s1 = sshll.u32 %s6821_s7, 4  ;;  %s5102_s1 = int_to_ptr.vmem [resolvable:$true] %s5101_s1 }
0x1cfc   :  { %4145 = vrot.lane.b32.xlu0 %v4071_v57, %s6819_s4  ;;  %s6791_s26 = scalar_lea.vmem %s5102_s1, 256  ;;  %p6796_p1 = scmp.lt.s32.totalorder %s5102_s1, %s5102_s1 }
0x1cfd   :  { %p6792_p0 = scmp.ne.s32.totalorder %s5102_s1, %s6791_s26  ;;  %p6797_p2 = scmp.lt.s32.totalorder %s6791_s26, %s6791_s26 }
0x1cff   :  { %p6798_p3 = por %p6797_p2, %p6796_p1 }
0x1d01   :  { %p6799_p4 = pnand %p6798_p3, %p6792_p0 }
0x1d6e   :  { %v4146_v16 = vpop.permute.xlu0 %4145 }
0x1d6f   :  { %6000 = vmatmul.mubr.msk.f32.vlgmr.msra.gmra.mrb[22].mxu0 %vm1616_vm3, %v4146_v16  ;;  %6022 = vmatmul.mubr.msk.f32.vlgmr.msra.gmra.mrb[28].mxu1 %vm1616_vm3, %v4146_v16 }
0x1d70   :  { %6568 = vmatpush3.bf16.msra.mxu1 %v9090_v20  ;;  %6032 = vmatprep.mubr.msk.f32.mxu1 %vm6816_vm2, %v6817_v38 }
0x1d71   :  { %6569 = vmatprep.subr.bf16.mxu1 %v6815_v44  ;;  %6586 = vmatpush3.bf16.msra.mxu0 %v9058_v50 }
0x1d72   :  { %6587 = vmatprep.subr.bf16.mxu0 %v6815_v44  ;;  %6065 = vmatprep.mubr.msk.f32.mxu0 %vm6816_vm2, %v6817_v38 }
0x1d74   :  { %6571 = vmatpush3.bf16.msra.mxu1 %v9101_v5 }
0x1d75   :  { %6572 = vmatprep.subr.bf16.mxu1 %v6815_v44  ;;  %6589 = vmatpush3.bf16.msra.mxu0 %v9071_v10 }
0x1d76   :  { %6590 = vmatprep.subr.bf16.mxu0 %v6815_v44 }
0x1d78   :  { %6066 = vmatmul.mubr.msk.f32.vlgmr.msra.gmra.mrb[28].mxu0 %vm1616_vm3, %v5168_v55 }
0x1d79   :  { %6592 = vmatpush3.bf16.msra.mxu0 %v9038_v18  ;;  %6076 = vmatprep.mubr.msk.f32.mxu0 %vm6816_vm2, %v6817_v38 }
0x1d7a   :  { %6593 = vmatprep.subr.bf16.mxu0 %v6815_v44 }
0x1d7d   :  { %6595 = vmatpush3.bf16.msra.mxu0 %v9048_v6 }
0x1d7e   :  { %6596 = vmatprep.subr.bf16.mxu0 %v6815_v44 }
0x1e42   :  { %v4215_v51 = vpop.f32.mrb[22].mxu0  ;;  %v4391_v34 = vpop.f32.mrb[28].mxu1 }
0x1e43   :  { %v6619_v1 = vadd.f32 %v9194_v43, %v4215_v51  ;;  %v6001_v17 = vpop.f32.mrb[23].mxu0  ;;  %v6023_v27 = vpop.f32.mrb[29].mxu1 }
0x1e45   :  { %6750 = vtanh.f32 %v6619_v1  ;;  %v5159_v33 = vmul.f32 -1.442695, %v6619_v1 }
0x1e47   :  { %6752 = vpow2.f32 %v5159_v33 }
0x1e4f   :  { %v6751_v50 = vpop.eup %6750 }
0x1e50   :  { %4229 = vrot.lane.b32.xlu1 %v6751_v50, %s6818_s18 }
0x1e51   :  { %v6753_v35 = vpop.eup %6752 }
0x1e52   :  { %v4223_v40 = vadd.f32 1.0, %v6753_v35 }
0x1e54   :  { %6754 = vrcp.f32 %v4223_v40 }
0x1e5e   :  { %v6755_v36 = vpop.eup %6754 }
0x1e5f   :  { %v4227_v21 = vmul.f32 %v6755_v36, %v9435_v41 }
0x1ec2   :  { %v4230_v13 = vpop.permute.xlu1 %4229 }
0x1ec3   :  { %v4232_v10 = vmul.f32 %v6755_v36, %v4230_v13 }
0x1ec5   :  { %4234 = vrot.lane.b32.xlu0 %v4232_v10, %s6819_s4 }
0x1f37   :  { %v4235_v29 = vpop.permute.xlu0 %4234 }
0x1f38   :  { %v9494_v43 = vadd.f32 %v4235_v29, %v4227_v21 }
0x1f3a   :  { %4396 = vrot.lane.b32.xlu1 %v9494_v43, %s6820_s15 }
0x1fac   :  { %v4397_v54 = vpop.permute.xlu1 %4396 }
0x1fad   :  { %6033 = vmatmul.mubr.msk.f32.vlgmr.msra.gmra.mrb[30].mxu1 %vm1616_vm3, %v4397_v54 }
0x1fae   :  { %6574 = vmatpush3.bf16.msra.mxu1 %v9131_v60  ;;  %6043 = vmatprep.mubr.msk.f32.mxu1 %vm6816_vm2, %v6817_v38 }
0x1faf   :  { %6575 = vmatprep.subr.bf16.mxu1 %v6815_v44 }
0x1fb2   :  { %6577 = vmatpush3.bf16.msra.mxu1 %v9140_v48 }
0x1fb3   :  { %6578 = vmatprep.subr.bf16.mxu1 %v6815_v44 }
0x2080   :  { %v4466_v32 = vpop.f32.mrb[30].mxu1 }
0x2081   :  { %v4467_v42 = vadd.f32 %v4466_v32, %v4391_v34  ;;  %v6034_v62 = vpop.f32.mrb[31].mxu1 }
0x2083   :  { %v4470_v61 = vadd.f32 %v4467_v42, %v9114_v56 }
0x2085   :  { %6756 = vtanh.f32 %v4470_v61  ;;  %v5164_v25 = vmul.f32 -1.442695, %v4470_v61 }
0x2086   :  { %6758 = vtanh.f32 %v9494_v43 }
0x2087   :  { %6760 = vpow2.f32 %v5164_v25 }
0x208f   :  { %v6757_v31 = vpop.eup %6756 }
0x2090   :  { %4480 = vrot.lane.b32.xlu0 %v6757_v31, %s6818_s18  ;;  %v6759_v46 = vpop.eup %6758 }
0x2091   :  { %v6761_v47 = vpop.eup %6760 }
0x2092   :  { %v4474_v7 = vadd.f32 1.0, %v6761_v47 }
0x2094   :  { %4240 = vrot.lane.b32.xlu0 %v6759_v46, %s6818_s18  ;;  %6762 = vrcp.f32 %v4474_v7 }
0x209e   :  { %v6763_v28 = vpop.eup %6762 }
0x209f   :  { %v4478_v4 = vmul.f32 %v6763_v28, %v9453_v39 }
0x2102   :  { %v4481_v53 = vpop.permute.xlu0 %4480 }
0x2103   :  { %v4483_v14 = vmul.f32 %v6763_v28, %v4481_v53 }
0x2105   :  { %4485 = vrot.lane.b32.xlu1 %v4483_v14, %s6819_s4 }
0x2106   :  { %v4241_v41 = vpop.permute.xlu0 %4240 }
0x2107   :  { %v4243_v2 = vmul.f32 %v6755_v36, %v4241_v41 }
0x2109   :  { %4245 = vrot.lane.b32.xlu0 %v4243_v2, %s6819_s4 }
0x2177   :  { %v4486_v26 = vpop.permute.xlu1 %4485 }
0x2178   :  { %v9512_v12 = vadd.f32 %v4486_v26, %v4478_v4 }
0x217a   :  { %6764 = vtanh.f32 %v9512_v12 }
0x217b   :  { %v4246_v23 = vpop.permute.xlu0 %4245 }
0x217c   :  { %4249 = vst.msk [vmem:[#allocation2 + $0xa] sm:$0x3] %vm2133_vm4, %v4246_v23  ;;  %6044 = vmatmul.mubr.msk.f32.vlgmr.msra.gmra.mrb[26].mxu1 %vm1616_vm3, %v4246_v23 }
0x217d   :  { %6580 = vmatpush3.bf16.msra.mxu1 %v9155_v0  ;;  %6054 = vmatprep.mubr.msk.f32.mxu1 %vm6816_vm2, %v6817_v38 }
0x217e   :  { %6581 = vmatprep.subr.bf16.mxu1 %v6815_v44 }
0x2181   :  { %6583 = vmatpush3.bf16.msra.mxu1 %v9169_v63 }
0x2184   :  { %v6765_v45 = vpop.eup %6764 }
0x2185   :  { %4491 = vrot.lane.b32.xlu1 %v6765_v45, %s6818_s18 }
0x21f7   :  { %v4492_v18 = vpop.permute.xlu1 %4491 }
0x21f8   :  { %v4494_v24 = vmul.f32 %v6763_v28, %v4492_v18 }
0x21fa   :  { %4568 = vrot.lane.b32.xlu1 %v4494_v24, %s6819_s4 }
0x226c   :  { %v4569_v8 = vpop.permute.xlu1 %4568 }
0x226d   :  { %6055 = vmatmul.mubr.msk.f32.vlgmr.msra.gmra.mrb[26].mxu1 %vm1616_vm3, %v4569_v8  ;;  %6077 = vmatmul.mubr.msk.f32.vlgmr.msra.gmra.mrb[30].mxu0 %vm1616_vm3, %v4569_v8 }
0x226e   :  { %6598 = vmatpush3.bf16.msra.mxu0 %v9090_v20  ;;  %6087 = vmatprep.mubr.msk.f32.mxu0 %vm6816_vm2, %v6817_v38 }
0x226f   :  { %6599 = vmatprep.subr.bf16.mxu0 %v6815_v44 }
0x2272   :  { %6601 = vmatpush3.bf16.msra.mxu0 %v9101_v5 }
0x2273   :  { %6602 = vmatprep.subr.bf16.mxu0 %v6815_v44 }
0x2340   :  { %v4638_v6 = vpop.f32.mrb[26].mxu1  ;;  %v4814_v52 = vpop.f32.mrb[30].mxu0 }
0x2341   :  { %v6620_v19 = vadd.f32 %v9545_v11, %v4638_v6  ;;  %v6056_v15 = vpop.f32.mrb[27].mxu1  ;;  %v6078_v20 = vpop.f32.mrb[31].mxu0 }
0x2343   :  { %6766 = vtanh.f32 %v6620_v19  ;;  %v5167_v37 = vmul.f32 -1.442695, %v6620_v19 }
0x2345   :  { %6768 = vpow2.f32 %v5167_v37 }
0x234d   :  { %v6767_v49 = vpop.eup %6766 }
0x234e   :  { %4652 = vrot.lane.b32.xlu0 %v6767_v49, %s6818_s18 }
0x234f   :  { %v6769_v5 = vpop.eup %6768 }
0x2350   :  { %v4646_v59 = vadd.f32 1.0, %v6769_v5 }
0x2352   :  { %6770 = vrcp.f32 %v4646_v59 }
0x235c   :  { %v6771_v22 = vpop.eup %6770 }
0x235d   :  { %v4650_v58 = vmul.f32 %v6771_v22, %v9494_v43 }
0x23c0   :  { %v4653_v39 = vpop.permute.xlu0 %4652 }
0x23c1   :  { %v4655_v30 = vmul.f32 %v6771_v22, %v4653_v39 }
0x23c3   :  { %4657 = vrot.lane.b32.xlu1 %v4655_v30, %s6819_s4 }
0x2435   :  { %v4658_v9 = vpop.permute.xlu1 %4657 }
0x2436   :  { %v9551_v3 = vadd.f32 %v4658_v9, %v4650_v58 }
0x2438   :  { %4819 = vrot.lane.b32.xlu0 %v9551_v3, %s6820_s15 }
0x24aa   :  { %v4820_v57 = vpop.permute.xlu0 %4819 }
0x24ab   :  { %6088 = vmatmul.mubr.msk.f32.vlgmr.msra.gmra.mrb[32].mxu0 %vm1616_vm3, %v4820_v57 }
0x24ac   :  { %6604 = vmatpush3.bf16.msra.mxu0 %v9131_v60  ;;  %6098 = vmatprep.mubr.msk.f32.mxu0 %vm6816_vm2, %v6817_v38 }
0x24ad   :  { %6605 = vmatprep.subr.bf16.mxu0 %v6815_v44 }
0x24b0   :  { %6607 = vmatpush3.bf16.msra.mxu0 %v9140_v48 }
0x24b1   :  { %6608 = vmatprep.subr.bf16.mxu0 %v6815_v44 }
0x257e   :  { %v4889_v16 = vpop.f32.mrb[32].mxu0 }
0x257f   :  { %v4890_v51 = vadd.f32 %v4889_v16, %v4814_v52  ;;  %v6089_v34 = vpop.f32.mrb[33].mxu0 }
0x2581   :  { %v4893_v1 = vadd.f32 %v4890_v51, %v9114_v56 }
0x2583   :  { %6772 = vtanh.f32 %v4893_v1  ;;  %v5172_v27 = vmul.f32 -1.442695, %v4893_v1 }
0x2584   :  { %6774 = vtanh.f32 %v9551_v3 }
0x2585   :  { %6776 = vpow2.f32 %v5172_v27 }
0x258d   :  { %v6773_v17 = vpop.eup %6772 }
0x258e   :  { %4903 = vrot.lane.b32.xlu1 %v6773_v17, %s6818_s18  ;;  %v6775_v60 = vpop.eup %6774 }
0x258f   :  { %v6777_v50 = vpop.eup %6776 }
0x2590   :  { %v4897_v48 = vadd.f32 1.0, %v6777_v50 }
0x2592   :  { %4663 = vrot.lane.b32.xlu1 %v6775_v60, %s6818_s18  ;;  %6778 = vrcp.f32 %v4897_v48 }
0x259c   :  { %v6779_v33 = vpop.eup %6778 }
0x259d   :  { %v4901_v13 = vmul.f32 %v6779_v33, %v9512_v12 }
0x2600   :  { %v4904_v35 = vpop.permute.xlu1 %4903 }
0x2601   :  { %v4906_v40 = vmul.f32 %v6779_v33, %v4904_v35 }
0x2603   :  { %4908 = vrot.lane.b32.xlu0 %v4906_v40, %s6819_s4 }
0x2604   :  { %v4664_v56 = vpop.permute.xlu1 %4663 }
0x2605   :  { %v4666_v36 = vmul.f32 %v6771_v22, %v4664_v56 }
0x2607   :  { %4668 = vrot.lane.b32.xlu1 %v4666_v36, %s6819_s4 }
0x2675   :  { %v4909_v10 = vpop.permute.xlu0 %4908 }
0x2676   :  { %v4911_v21 = vadd.f32 %v4909_v10, %v4901_v13 }
0x2678   :  { %6780 = vtanh.f32 %v4911_v21 }
0x2679   :  { %v4669_v29 = vpop.permute.xlu1 %4668 }
0x267a   :  { %4672 = vst.msk [vmem:[#allocation2 + $0xc] sm:$0x3] %vm2133_vm4, %v4669_v29  ;;  %6099 = vmatmul.mubr.msk.f32.vlgmr.msra.gmra.mrb[28].mxu0 %vm1616_vm3, %v4669_v29 }
0x267b   :  { %6610 = vmatpush3.bf16.msra.mxu0 %v9155_v0  ;;  %6109 = vmatprep.mubr.msk.f32.mxu0 %vm6816_vm2, %v6817_v38 }
0x267c   :  { %6611 = vmatprep.subr.bf16.mxu0 %v6815_v44 }
0x267f   :  { %6613 = vmatpush3.bf16.msra.mxu0 %v9169_v63 }
0x2682   :  { %v6781_v43 = vpop.eup %6780 }
0x2683   :  { %4914 = vrot.lane.b32.xlu0 %v6781_v43, %s6818_s18 }
0x26f5   :  { %v4915_v54 = vpop.permute.xlu0 %4914 }
0x26f6   :  { %v4917_v32 = vmul.f32 %v6779_v33, %v4915_v54 }
0x26f8   :  { %4991 = vrot.lane.b32.xlu0 %v4917_v32, %s6819_s4 }
0x276a   :  { %v4992_v42 = vpop.permute.xlu0 %4991 }
0x276b   :  { %6110 = vmatmul.mubr.msk.f32.vlgmr.msra.gmra.mrb[28].mxu0 %vm1616_vm3, %v4992_v42 }
0x283e   :  { %v5061_v62 = vpop.f32.mrb[28].mxu0 }
0x283f   :  { %v6621_v0 = vadd.f32 %v9545_v11, %v5061_v62  ;;  %v6111_v61 = vpop.f32.mrb[29].mxu0 }
0x2841   :  { %6782 = vtanh.f32 %v6621_v0  ;;  %v5175_v44 = vmul.f32 -1.442695, %v6621_v0 }
0x2843   :  { %6784 = vpow2.f32 %v5175_v44 }
0x284b   :  { %v6783_v38 = vpop.eup %6782 }
0x284c   :  { %5075 = vrot.lane.b32.xlu1 %v6783_v38, %s6818_s18 }
0x284d   :  { %v6785_v63 = vpop.eup %6784 }
0x284e   :  { %v5069_v31 = vadd.f32 1.0, %v6785_v63 }
0x2850   :  { %6786 = vrcp.f32 %v5069_v31 }
0x285a   :  { %v6787_v46 = vpop.eup %6786 }
0x285b   :  { %v5073_v7 = vmul.f32 %v6787_v46, %v9551_v3 }
0x28be   :  { %v5076_v25 = vpop.permute.xlu1 %5075 }
0x28bf   :  { %v5078_v47 = vmul.f32 %v6787_v46, %v5076_v25 }
0x28c1   :  { %5080 = vrot.lane.b32.xlu0 %v5078_v47, %s6819_s4 }
0x2933   :  { %v5081_v28 = vpop.permute.xlu0 %5080 }
0x2934   :  { %v5083_v53 = vadd.f32 %v5081_v28, %v5073_v7 }
0x2936   :  { %6788 = vtanh.f32 %v5083_v53 }
0x2940   :  { %v6789_v14 = vpop.eup %6788 }
0x2941   :  { %5086 = vrot.lane.b32.xlu1 %v6789_v14, %s6818_s18 }
0x29b3   :  { %v5087_v41 = vpop.permute.xlu1 %5086 }
0x29b4   :  { %v5089_v2 = vmul.f32 %v6787_v46, %v5087_v41 }
0x29b6   :  { %5091 = vrot.lane.b32.xlu0 %v5089_v2, %s6819_s4 }
0x2a28   :  { %v5092_v4 = vpop.permute.xlu0 %5091 }
0x2a29   :  { %5095 = vst.msk [vmem:[#allocation2 + $0xe] sm:$0x3] %vm2133_vm4, %v5092_v4 }
0x2a2a   :  { %6802 = shalt.err (!%p6799_p4)
}
0x2a2b   :  { %s6803_s18 = scalar_lea.hbm %s9612_s12, 256 }
0x2a2c   :  { %p6804_p5 = scmp.ne.s32.totalorder %s9612_s12, %s6803_s18  ;;  %p6807_p6 = scmp.lt.u32.totalorder %s6803_s18, %s9612_s12 }
0x2a2e   :  { %p6809_p7 = pnand %p6807_p6, %p6804_p5 }
0x2a30   :  { %6812 = shalt.err (!%p6809_p7)
}
0x2a31   :  { %s6822_s30 = smov 2  }
0x2a32   :  { %5107 = dma.vmem_to_hbm [thread:$0]  %s5102_s1, 256, %s9612_s12, [#allocation3], %s6819_s4, %s6819_s4, %s6822_s30  }
0x2a33   :  { %6813 = dma.done.wait [#allocation3], 256  }
0x2a34   :  { %6814 = vsyncadd [#allocation3], 4294967040 }
0x2a35   :  { %5111 = vsyncpa [#allocation3], 1 }

</bundles_post_ra>
